<compile_context>
chip_gen: v6e
topology: v6e:2x2x1
jax: 0.10.0
libtpu: 0.0.40
codegen_flags: <defaults>
</compile_context>

<pallas_src>
import functools

import jax
import jax.numpy as jnp
from jax import lax
from jax.experimental import pallas as pl
from jax.experimental.pallas import tpu as pltpu


def _sigmoid(v):
    # Same explicit formulation in kernel and reference (exp lowers to the EUP).
    return 1.0 / (1.0 + jnp.exp(-v))


# ----------------------------------------------------------------------------
# Fused CBAM kernel: one sample per grid step.
# ----------------------------------------------------------------------------
def _cbam_kernel(x_ref, w1_ref, w2t_ref, wsp_ref, o_ref, smax_ref, savg_ref, *,
                 H, W, C, KS):
    """x_ref/o_ref: (H, W, C) f32 VMEM (leading batch dim squeezed by BlockSpec)
    w1_ref:  (Cr, C) f32 VMEM   mlp[0] weight (PyTorch layout)
    w2t_ref: (Cr, C) f32 VMEM   mlp[2] weight, transposed
    wsp_ref: (2*KS*KS,) f32 SMEM  spatial conv taps: [0:KS*KS]=max, rest=avg
    smax_ref/savg_ref: (KS, H+2P, W) f32 VMEM  lane-shifted padded map slabs
    """
    P = KS // 2
    Cr = w1_ref.shape[0]
    inv_hw = 1.0 / float(H * W)
    inv_c = 1.0 / float(C)
    HB = 8 if H % 8 == 0 else H          # row-chunk size: bounds vreg live ranges

    # ----------------- channel attention: global max / mean pooling ---------
    mx = jnp.full((1, C), -jnp.inf, dtype=jnp.float32)
    sm = jnp.zeros((1, C), dtype=jnp.float32)
    for h0 in range(0, H, HB):
        blk = x_ref[h0:h0 + HB, :, :]                          # (HB, W, C)
        # cross-vreg (row-chunk) reduce on the VPU first, then one sublane reduce
        mx = jnp.maximum(mx, jnp.max(jnp.max(blk, axis=0), axis=0, keepdims=True))
        sm = sm + jnp.sum(jnp.sum(blk, axis=0), axis=0, keepdims=True)
    pooled = jnp.concatenate([mx, sm * inv_hw], axis=0)        # (2, C): [max; avg]

    # ----------------- shared MLP: both branches in one stacked pass --------
    h_cols = []
    for j in range(Cr):                                        # layer 1: (2,C)x(C,Cr)
        h_cols.append(jnp.sum(pooled * w1_ref[j:j + 1, :], axis=-1, keepdims=True))
    h = jnp.maximum(jnp.concatenate(h_cols, axis=1), 0.0)      # (2, Cr), ReLU
    z = jnp.zeros((2, C), dtype=jnp.float32)
    for r in range(Cr):                                        # layer 2: (2,Cr)x(Cr,C)
        z = z + h[:, r:r + 1] * w2t_ref[r:r + 1, :]
    gate_c = _sigmoid(z[0:1, :] + z[1:2, :])                   # (1, C) channel gate

    # ----------------- spatial attention: channel max / mean maps -----------
    cmax_rows = []
    cavg_rows = []
    for h0 in range(0, H, HB):
        blkg = x_ref[h0:h0 + HB, :, :] * gate_c[None, :, :]    # gated chunk (HB,W,C)
        cmax_rows.append(jnp.max(blkg, axis=-1))               # (HB, W)
        cavg_rows.append(jnp.sum(blkg, axis=-1) * inv_c)
    cmax = jnp.concatenate(cmax_rows, axis=0)                  # (H, W)
    cavg = jnp.concatenate(cavg_rows, axis=0)

    # Pre-shift: one zero-padded, column(lane)-shifted slab per dj, stored in
    # scratch (7 lane shuffles per map instead of ~98 per-tap shuffles).
    zero_rows = jnp.zeros((P, W), dtype=jnp.float32)

    def shifted_slab(m2d, s_off):
        if s_off > 0:
            mid = jnp.concatenate(
                [m2d[:, s_off:], jnp.zeros((H, s_off), jnp.float32)], axis=1)
        elif s_off < 0:
            mid = jnp.concatenate(
                [jnp.zeros((H, -s_off), jnp.float32), m2d[:, :W + s_off]], axis=1)
        else:
            mid = m2d
        return jnp.concatenate([zero_rows, mid, zero_rows], axis=0)    # (H+2P, W)

    for dj in range(KS):
        s_off = dj - P
        smax_ref[dj] = shifted_slab(cmax, s_off)
        savg_ref[dj] = shifted_slab(cavg, s_off)

    # 7x7 conv over the 2-channel [max, mean] map: sublane-offset slice reads
    # straight from scratch + VPU FMAs, scalar taps from SMEM.
    acc = jnp.zeros((H, W), dtype=jnp.float32)
    for di in range(KS):
        for dj in range(KS):
            acc = acc + wsp_ref[di * KS + dj] * smax_ref[dj, di:di + H, :] \
                      + wsp_ref[KS * KS + di * KS + dj] * savg_ref[dj, di:di + H, :]
    gate_s = _sigmoid(acc)                                     # (H, W) spatial gate

    # ----------------- single-pass output: x * gate_c * gate_s --------------
    for h0 in range(0, H, HB):
        xb = x_ref[h0:h0 + HB, :, :]
        o_ref[h0:h0 + HB, :, :] = (xb * gate_c[None, :, :]
                                   * gate_s[h0:h0 + HB, :, None]).astype(o_ref.dtype)


# ----------------------------------------------------------------------------
# Wrapper: channels-last activations, PyTorch-shaped weights.
# ----------------------------------------------------------------------------
def cbam_forward(x_nhwc, w1, w2, wsp):
    """CBAM forward.

    x_nhwc: (N, H, W, C) channels-last activations.
    w1:  (C//r, C)      mlp[0] 1x1-conv weight (PyTorch layout, squeezed)
    w2:  (C, C//r)      mlp[2] 1x1-conv weight
    wsp: (1, 2, k, k)   spatial conv weight; in-ch 0 = max map, 1 = avg map.
    """
    N, H, W, C = x_nhwc.shape
    Cr = w1.shape[0]
    KS = wsp.shape[-1]
    assert KS % 2 == 1, "symmetric padding KS//2 matches PyTorch only for odd kernels"
    P = KS // 2

    x = x_nhwc.astype(jnp.float32)
    w1f = w1.astype(jnp.float32)                        # (Cr, C), lane-dense over C
    w2t = jnp.transpose(w2).astype(jnp.float32)         # (C, Cr) -> (Cr, C) (tiny)
    wspf = wsp.reshape(-1).astype(jnp.float32)          # (2*KS*KS,)

    kernel = functools.partial(_cbam_kernel, H=H, W=W, C=C, KS=KS)
    return pl.pallas_call(
        kernel,
        out_shape=jax.ShapeDtypeStruct((N, H, W, C), jnp.float32),
        grid=(N,),
        in_specs=[
            pl.BlockSpec((None, H, W, C), lambda n: (n, 0, 0, 0)),    # x (per-sample)
            pl.BlockSpec((Cr, C), lambda n: (0, 0)),                  # w1
            pl.BlockSpec((Cr, C), lambda n: (0, 0)),                  # w2^T
            pl.BlockSpec(memory_space=pltpu.MemorySpace.SMEM),        # spatial taps
        ],
        out_specs=pl.BlockSpec((None, H, W, C), lambda n: (n, 0, 0, 0)),
        scratch_shapes=[
            pltpu.VMEM((KS, H + 2 * P, W), jnp.float32),              # shifted max slabs
            pltpu.VMEM((KS, H + 2 * P, W), jnp.float32),              # shifted avg slabs
        ],
        compiler_params=pltpu.CompilerParams(
            dimension_semantics=("parallel",),
            vmem_limit_bytes=32 * 1024 * 1024,
        ),
    )(x, w1f, w2t, wspf)


# ----------------------------------------------------------------------------
# Pure-JAX reference (channels-last, ~f32-exact) for the correctness check.
# ----------------------------------------------------------------------------
def cbam_reference(x_nhwc, w1, w2, wsp):
    hi = jax.lax.Precision.HIGHEST
    mx = jnp.max(x_nhwc, axis=(1, 2))                             # (N, C)
    av = jnp.mean(x_nhwc, axis=(1, 2))

    def mlp(v):
        h = jnp.maximum(jnp.einsum("nc,rc->nr", v, w1, precision=hi), 0.0)
        return jnp.einsum("nr,cr->nc", h, w2, precision=hi)

    gate_c = _sigmoid(mlp(mx) + mlp(av))                          # (N, C)
    xg = x_nhwc * gate_c[:, None, None, :]
    cmax = jnp.max(xg, axis=-1, keepdims=True)
    cavg = jnp.mean(xg, axis=-1, keepdims=True)
    maps = jnp.concatenate([cmax, cavg], axis=-1)                 # (N, H, W, 2)
    pad = wsp.shape[-1] // 2
    w_hwio = jnp.transpose(wsp, (2, 3, 1, 0))                     # (k, k, 2, 1)
    conv = lax.conv_general_dilated(
        maps, w_hwio, window_strides=(1, 1),
        padding=[(pad, pad), (pad, pad)],
        dimension_numbers=("NHWC", "HWIO", "NHWC"),
        precision=hi)
    gate_s = _sigmoid(conv)                                       # (N, H, W, 1)
    return xg * gate_s


# ----------------------------------------------------------------------------
# Main
# ----------------------------------------------------------------------------
if __name__ == "__main__":
    key = jax.random.PRNGKey(0)
    kx, k1, k2, ks = jax.random.split(key, 4)

    # channel=128 (one full lane tile), reduction=16 -> hidden 8,
    # spatial_kernel=7, batch=2, 16x16 feature map, channels-last.
    N, H, W, C = 2, 16, 16, 128
    reduction, KS = 16, 7
    Cr = C // reduction

    x = jax.random.normal(kx, (N, H, W, C), jnp.float32)
    # Parameters in PyTorch shapes (1x1 conv kernels squeezed):
    #   mlp[0]: Conv2d(C, C//r, 1, bias=False)        -> (Cr, C)
    #   mlp[2]: Conv2d(C//r, C, 1, bias=False)        -> (C, Cr)
    #   conv  : Conv2d(2, 1, 7, padding=3, bias=False)-> (1, 2, 7, 7)
    #           (in-channel 0 = max map, 1 = avg map, per torch.cat order)
    w1 = jax.random.normal(k1, (Cr, C), jnp.float32) * (1.0 / jnp.sqrt(C))
    w2 = jax.random.normal(k2, (C, Cr), jnp.float32) * (1.0 / jnp.sqrt(Cr))
    wsp = jax.random.normal(ks, (1, 2, KS, KS), jnp.float32) * (1.0 / jnp.sqrt(2.0 * KS * KS))

    out = jax.block_until_ready(jax.jit(cbam_forward)(x, w1, w2, wsp))
    assert out.shape == (N, H, W, C) and out.dtype == jnp.float32

    ref = jax.block_until_ready(cbam_reference(x, w1, w2, wsp))
    max_err = float(jnp.max(jnp.abs(out - ref)))
    assert max_err < 1e-4, f"kernel/reference mismatch: max abs err = {max_err}"

    print("KERNEL_OK")
</pallas_src>

<mosaic_0001>
module attributes {stable_mosaic.version = 11 : i64} {
  func.func @_cbam_kernel(%arg0: i32, %arg1: memref<1x16x16x128xf32, #tpu.memory_space<vmem>>, %arg2: memref<8x128xf32, #tpu.memory_space<vmem>>, %arg3: memref<8x128xf32, #tpu.memory_space<vmem>>, %arg4: memref<98xf32, #tpu.memory_space<smem>>, %arg5: memref<1x16x16x128xf32, #tpu.memory_space<vmem>>, %arg6: memref<7x22x16xf32, #tpu.memory_space<vmem>>, %arg7: memref<7x22x16xf32, #tpu.memory_space<vmem>>) attributes {dimension_semantics = [#tpu.dimension_semantics<parallel>], iteration_bounds = array<i64: 2>, scalar_prefetch = 0 : i64, scratch_operands = 2 : i64, tpu.core_type = #tpu.core_type<tc>, window_params = [{transform_indices = @transform_0, window_bounds = array<i64: 1, 16, 16, 128>}, {pipeline_mode = #tpu.pipeline_mode<synchronous>, transform_indices = @transform_1, window_bounds = array<i64: 8, 128>}, {pipeline_mode = #tpu.pipeline_mode<synchronous>, transform_indices = @transform_2, window_bounds = array<i64: 8, 128>}, {transform_indices = @transform_3, window_bounds = array<i64: 98>}, {transform_indices = @transform_4, window_bounds = array<i64: 1, 16, 16, 128>}]} {
    %cst = arith.constant 0xFF800000 : f32
    %0 = vector.broadcast %cst : f32 to vector<1x128xf32>
    %cst_0 = arith.constant 0.000000e+00 : f32
    %1 = vector.broadcast %cst_0 : f32 to vector<1x128xf32>
    %c0 = arith.constant 0 : index
    %c0_1 = arith.constant 0 : index
    %c0_2 = arith.constant 0 : index
    %c0_3 = arith.constant 0 : index
    %2 = vector.load %arg1[%c0, %c0_1, %c0_2, %c0_3] : memref<1x16x16x128xf32, #tpu.memory_space<vmem>>, vector<1x8x16x128xf32>
    %3 = vector.shape_cast %2 : vector<1x8x16x128xf32> to vector<8x16x128xf32>
    %cst_4 = arith.constant dense<0xFF800000> : vector<16x128xf32>
    %4 = vector.multi_reduction <maximumf>, %3, %cst_4 [0] : vector<8x16x128xf32> to vector<16x128xf32>
    %cst_5 = arith.constant dense<0xFF800000> : vector<128xf32>
    %5 = vector.multi_reduction <maximumf>, %4, %cst_5 [0] : vector<16x128xf32> to vector<128xf32>
    %6 = vector.shape_cast %5 : vector<128xf32> to vector<1x128xf32>
    %7 = arith.maximumf %0, %6 : vector<1x128xf32>
    %cst_6 = arith.constant dense<0.000000e+00> : vector<16x128xf32>
    %8 = vector.multi_reduction <add>, %3, %cst_6 [0] : vector<8x16x128xf32> to vector<16x128xf32>
    %cst_7 = arith.constant dense<0.000000e+00> : vector<128xf32>
    %9 = vector.multi_reduction <add>, %8, %cst_7 [0] : vector<16x128xf32> to vector<128xf32>
    %10 = vector.shape_cast %9 : vector<128xf32> to vector<1x128xf32>
    %11 = arith.addf %1, %10 : vector<1x128xf32>
    %c0_8 = arith.constant 0 : index
    %c8 = arith.constant 8 : index
    %c0_9 = arith.constant 0 : index
    %c0_10 = arith.constant 0 : index
    %12 = vector.load %arg1[%c0_8, %c8, %c0_9, %c0_10] : memref<1x16x16x128xf32, #tpu.memory_space<vmem>>, vector<1x8x16x128xf32>
    %13 = vector.shape_cast %12 : vector<1x8x16x128xf32> to vector<8x16x128xf32>
    %cst_11 = arith.constant dense<0xFF800000> : vector<16x128xf32>
    %14 = vector.multi_reduction <maximumf>, %13, %cst_11 [0] : vector<8x16x128xf32> to vector<16x128xf32>
    %cst_12 = arith.constant dense<0xFF800000> : vector<128xf32>
    %15 = vector.multi_reduction <maximumf>, %14, %cst_12 [0] : vector<16x128xf32> to vector<128xf32>
    %16 = vector.shape_cast %15 : vector<128xf32> to vector<1x128xf32>
    %17 = arith.maximumf %7, %16 : vector<1x128xf32>
    %cst_13 = arith.constant dense<0.000000e+00> : vector<16x128xf32>
    %18 = vector.multi_reduction <add>, %13, %cst_13 [0] : vector<8x16x128xf32> to vector<16x128xf32>
    %cst_14 = arith.constant dense<0.000000e+00> : vector<128xf32>
    %19 = vector.multi_reduction <add>, %18, %cst_14 [0] : vector<16x128xf32> to vector<128xf32>
    %20 = vector.shape_cast %19 : vector<128xf32> to vector<1x128xf32>
    %21 = arith.addf %11, %20 : vector<1x128xf32>
    %cst_15 = arith.constant 3.906250e-03 : f32
    %22 = vector.broadcast %cst_15 : f32 to vector<1x128xf32>
    %23 = arith.mulf %21, %22 : vector<1x128xf32>
    %24 = tpu.concatenate %17, %23 in 0 : vector<1x128xf32>, vector<1x128xf32> -> vector<2x128xf32>
    %c0_16 = arith.constant 0 : index
    %c0_17 = arith.constant 0 : index
    %25 = vector.load %arg2[%c0_16, %c0_17] : memref<8x128xf32, #tpu.memory_space<vmem>>, vector<1x128xf32>
    %26 = vector.broadcast %25 : vector<1x128xf32> to vector<2x128xf32>
    %27 = arith.mulf %24, %26 : vector<2x128xf32>
    %cst_18 = arith.constant dense<0.000000e+00> : vector<2xf32>
    %28 = vector.multi_reduction <add>, %27, %cst_18 [1] : vector<2x128xf32> to vector<2xf32>
    %29 = vector.shape_cast %28 : vector<2xf32> to vector<2x1xf32>
    %c1 = arith.constant 1 : index
    %c0_19 = arith.constant 0 : index
    %30 = vector.load %arg2[%c1, %c0_19] : memref<8x128xf32, #tpu.memory_space<vmem>>, vector<1x128xf32>
    %31 = vector.broadcast %30 : vector<1x128xf32> to vector<2x128xf32>
    %32 = arith.mulf %24, %31 : vector<2x128xf32>
    %cst_20 = arith.constant dense<0.000000e+00> : vector<2xf32>
    %33 = vector.multi_reduction <add>, %32, %cst_20 [1] : vector<2x128xf32> to vector<2xf32>
    %34 = vector.shape_cast %33 : vector<2xf32> to vector<2x1xf32>
    %c2 = arith.constant 2 : index
    %c0_21 = arith.constant 0 : index
    %35 = vector.load %arg2[%c2, %c0_21] : memref<8x128xf32, #tpu.memory_space<vmem>>, vector<1x128xf32>
    %36 = vector.broadcast %35 : vector<1x128xf32> to vector<2x128xf32>
    %37 = arith.mulf %24, %36 : vector<2x128xf32>
    %cst_22 = arith.constant dense<0.000000e+00> : vector<2xf32>
    %38 = vector.multi_reduction <add>, %37, %cst_22 [1] : vector<2x128xf32> to vector<2xf32>
    %39 = vector.shape_cast %38 : vector<2xf32> to vector<2x1xf32>
    %c3 = arith.constant 3 : index
    %c0_23 = arith.constant 0 : index
    %40 = vector.load %arg2[%c3, %c0_23] : memref<8x128xf32, #tpu.memory_space<vmem>>, vector<1x128xf32>
    %41 = vector.broadcast %40 : vector<1x128xf32> to vector<2x128xf32>
    %42 = arith.mulf %24, %41 : vector<2x128xf32>
    %cst_24 = arith.constant dense<0.000000e+00> : vector<2xf32>
    %43 = vector.multi_reduction <add>, %42, %cst_24 [1] : vector<2x128xf32> to vector<2xf32>
    %44 = vector.shape_cast %43 : vector<2xf32> to vector<2x1xf32>
    %c4 = arith.constant 4 : index
    %c0_25 = arith.constant 0 : index
    %45 = vector.load %arg2[%c4, %c0_25] : memref<8x128xf32, #tpu.memory_space<vmem>>, vector<1x128xf32>
    %46 = vector.broadcast %45 : vector<1x128xf32> to vector<2x128xf32>
    %47 = arith.mulf %24, %46 : vector<2x128xf32>
    %cst_26 = arith.constant dense<0.000000e+00> : vector<2xf32>
    %48 = vector.multi_reduction <add>, %47, %cst_26 [1] : vector<2x128xf32> to vector<2xf32>
    %49 = vector.shape_cast %48 : vector<2xf32> to vector<2x1xf32>
    %c5 = arith.constant 5 : index
    %c0_27 = arith.constant 0 : index
    %50 = vector.load %arg2[%c5, %c0_27] : memref<8x128xf32, #tpu.memory_space<vmem>>, vector<1x128xf32>
    %51 = vector.broadcast %50 : vector<1x128xf32> to vector<2x128xf32>
    %52 = arith.mulf %24, %51 : vector<2x128xf32>
    %cst_28 = arith.constant dense<0.000000e+00> : vector<2xf32>
    %53 = vector.multi_reduction <add>, %52, %cst_28 [1] : vector<2x128xf32> to vector<2xf32>
    %54 = vector.shape_cast %53 : vector<2xf32> to vector<2x1xf32>
    %c6 = arith.constant 6 : index
    %c0_29 = arith.constant 0 : index
    %55 = vector.load %arg2[%c6, %c0_29] : memref<8x128xf32, #tpu.memory_space<vmem>>, vector<1x128xf32>
    %56 = vector.broadcast %55 : vector<1x128xf32> to vector<2x128xf32>
    %57 = arith.mulf %24, %56 : vector<2x128xf32>
    %cst_30 = arith.constant dense<0.000000e+00> : vector<2xf32>
    %58 = vector.multi_reduction <add>, %57, %cst_30 [1] : vector<2x128xf32> to vector<2xf32>
    %59 = vector.shape_cast %58 : vector<2xf32> to vector<2x1xf32>
    %c7 = arith.constant 7 : index
    %c0_31 = arith.constant 0 : index
    %60 = vector.load %arg2[%c7, %c0_31] : memref<8x128xf32, #tpu.memory_space<vmem>>, vector<1x128xf32>
    %61 = vector.broadcast %60 : vector<1x128xf32> to vector<2x128xf32>
    %62 = arith.mulf %24, %61 : vector<2x128xf32>
    %cst_32 = arith.constant dense<0.000000e+00> : vector<2xf32>
    %63 = vector.multi_reduction <add>, %62, %cst_32 [1] : vector<2x128xf32> to vector<2xf32>
    %64 = vector.shape_cast %63 : vector<2xf32> to vector<2x1xf32>
    %65 = tpu.concatenate %29, %34, %39, %44, %49, %54, %59, %64 in 1 : vector<2x1xf32>, vector<2x1xf32>, vector<2x1xf32>, vector<2x1xf32>, vector<2x1xf32>, vector<2x1xf32>, vector<2x1xf32>, vector<2x1xf32> -> vector<2x8xf32>
    %cst_33 = arith.constant 0.000000e+00 : f32
    %66 = vector.broadcast %cst_33 : f32 to vector<2x8xf32>
    %67 = arith.maximumf %65, %66 : vector<2x8xf32>
    %cst_34 = arith.constant 0.000000e+00 : f32
    %68 = vector.broadcast %cst_34 : f32 to vector<2x128xf32>
    %69 = vector.extract_strided_slice %67 {offsets = [0, 0], sizes = [2, 1], strides = [1, 1]} : vector<2x8xf32> to vector<2x1xf32>
    %c0_35 = arith.constant 0 : index
    %c0_36 = arith.constant 0 : index
    %70 = vector.load %arg3[%c0_35, %c0_36] : memref<8x128xf32, #tpu.memory_space<vmem>>, vector<1x128xf32>
    %71 = vector.broadcast %69 : vector<2x1xf32> to vector<2x128xf32>
    %72 = vector.broadcast %70 : vector<1x128xf32> to vector<2x128xf32>
    %73 = arith.mulf %71, %72 : vector<2x128xf32>
    %74 = arith.addf %68, %73 : vector<2x128xf32>
    %75 = vector.extract_strided_slice %67 {offsets = [0, 1], sizes = [2, 1], strides = [1, 1]} : vector<2x8xf32> to vector<2x1xf32>
    %c1_37 = arith.constant 1 : index
    %c0_38 = arith.constant 0 : index
    %76 = vector.load %arg3[%c1_37, %c0_38] : memref<8x128xf32, #tpu.memory_space<vmem>>, vector<1x128xf32>
    %77 = vector.broadcast %75 : vector<2x1xf32> to vector<2x128xf32>
    %78 = vector.broadcast %76 : vector<1x128xf32> to vector<2x128xf32>
    %79 = arith.mulf %77, %78 : vector<2x128xf32>
    %80 = arith.addf %74, %79 : vector<2x128xf32>
    %81 = vector.extract_strided_slice %67 {offsets = [0, 2], sizes = [2, 1], strides = [1, 1]} : vector<2x8xf32> to vector<2x1xf32>
    %c2_39 = arith.constant 2 : index
    %c0_40 = arith.constant 0 : index
    %82 = vector.load %arg3[%c2_39, %c0_40] : memref<8x128xf32, #tpu.memory_space<vmem>>, vector<1x128xf32>
    %83 = vector.broadcast %81 : vector<2x1xf32> to vector<2x128xf32>
    %84 = vector.broadcast %82 : vector<1x128xf32> to vector<2x128xf32>
    %85 = arith.mulf %83, %84 : vector<2x128xf32>
    %86 = arith.addf %80, %85 : vector<2x128xf32>
    %87 = vector.extract_strided_slice %67 {offsets = [0, 3], sizes = [2, 1], strides = [1, 1]} : vector<2x8xf32> to vector<2x1xf32>
    %c3_41 = arith.constant 3 : index
    %c0_42 = arith.constant 0 : index
    %88 = vector.load %arg3[%c3_41, %c0_42] : memref<8x128xf32, #tpu.memory_space<vmem>>, vector<1x128xf32>
    %89 = vector.broadcast %87 : vector<2x1xf32> to vector<2x128xf32>
    %90 = vector.broadcast %88 : vector<1x128xf32> to vector<2x128xf32>
    %91 = arith.mulf %89, %90 : vector<2x128xf32>
    %92 = arith.addf %86, %91 : vector<2x128xf32>
    %93 = vector.extract_strided_slice %67 {offsets = [0, 4], sizes = [2, 1], strides = [1, 1]} : vector<2x8xf32> to vector<2x1xf32>
    %c4_43 = arith.constant 4 : index
    %c0_44 = arith.constant 0 : index
    %94 = vector.load %arg3[%c4_43, %c0_44] : memref<8x128xf32, #tpu.memory_space<vmem>>, vector<1x128xf32>
    %95 = vector.broadcast %93 : vector<2x1xf32> to vector<2x128xf32>
    %96 = vector.broadcast %94 : vector<1x128xf32> to vector<2x128xf32>
    %97 = arith.mulf %95, %96 : vector<2x128xf32>
    %98 = arith.addf %92, %97 : vector<2x128xf32>
    %99 = vector.extract_strided_slice %67 {offsets = [0, 5], sizes = [2, 1], strides = [1, 1]} : vector<2x8xf32> to vector<2x1xf32>
    %c5_45 = arith.constant 5 : index
    %c0_46 = arith.constant 0 : index
    %100 = vector.load %arg3[%c5_45, %c0_46] : memref<8x128xf32, #tpu.memory_space<vmem>>, vector<1x128xf32>
    %101 = vector.broadcast %99 : vector<2x1xf32> to vector<2x128xf32>
    %102 = vector.broadcast %100 : vector<1x128xf32> to vector<2x128xf32>
    %103 = arith.mulf %101, %102 : vector<2x128xf32>
    %104 = arith.addf %98, %103 : vector<2x128xf32>
    %105 = vector.extract_strided_slice %67 {offsets = [0, 6], sizes = [2, 1], strides = [1, 1]} : vector<2x8xf32> to vector<2x1xf32>
    %c6_47 = arith.constant 6 : index
    %c0_48 = arith.constant 0 : index
    %106 = vector.load %arg3[%c6_47, %c0_48] : memref<8x128xf32, #tpu.memory_space<vmem>>, vector<1x128xf32>
    %107 = vector.broadcast %105 : vector<2x1xf32> to vector<2x128xf32>
    %108 = vector.broadcast %106 : vector<1x128xf32> to vector<2x128xf32>
    %109 = arith.mulf %107, %108 : vector<2x128xf32>
    %110 = arith.addf %104, %109 : vector<2x128xf32>
    %111 = vector.extract_strided_slice %67 {offsets = [0, 7], sizes = [2, 1], strides = [1, 1]} : vector<2x8xf32> to vector<2x1xf32>
    %c7_49 = arith.constant 7 : index
    %c0_50 = arith.constant 0 : index
    %112 = vector.load %arg3[%c7_49, %c0_50] : memref<8x128xf32, #tpu.memory_space<vmem>>, vector<1x128xf32>
    %113 = vector.broadcast %111 : vector<2x1xf32> to vector<2x128xf32>
    %114 = vector.broadcast %112 : vector<1x128xf32> to vector<2x128xf32>
    %115 = arith.mulf %113, %114 : vector<2x128xf32>
    %116 = arith.addf %110, %115 : vector<2x128xf32>
    %117 = vector.extract_strided_slice %116 {offsets = [0, 0], sizes = [1, 128], strides = [1, 1]} : vector<2x128xf32> to vector<1x128xf32>
    %118 = vector.extract_strided_slice %116 {offsets = [1, 0], sizes = [1, 128], strides = [1, 1]} : vector<2x128xf32> to vector<1x128xf32>
    %119 = arith.addf %117, %118 : vector<1x128xf32>
    %cst_51 = arith.constant 0.000000e+00 : f32
    %120 = vector.broadcast %cst_51 : f32 to vector<1x128xf32>
    %121 = arith.subf %120, %119 : vector<1x128xf32>
    %122 = math.exp %121 : vector<1x128xf32>
    %cst_52 = arith.constant 1.000000e+00 : f32
    %123 = vector.broadcast %cst_52 : f32 to vector<1x128xf32>
    %124 = arith.addf %123, %122 : vector<1x128xf32>
    %cst_53 = arith.constant 1.000000e+00 : f32
    %125 = vector.broadcast %cst_53 : f32 to vector<1x128xf32>
    %126 = arith.divf %125, %124 : vector<1x128xf32>
    %c0_54 = arith.constant 0 : index
    %c0_55 = arith.constant 0 : index
    %c0_56 = arith.constant 0 : index
    %c0_57 = arith.constant 0 : index
    %127 = vector.load %arg1[%c0_54, %c0_55, %c0_56, %c0_57] : memref<1x16x16x128xf32, #tpu.memory_space<vmem>>, vector<1x8x16x128xf32>
    %128 = vector.shape_cast %127 : vector<1x8x16x128xf32> to vector<8x16x128xf32>
    %129 = vector.shape_cast %126 : vector<1x128xf32> to vector<1x1x128xf32>
    %130 = vector.broadcast %129 : vector<1x1x128xf32> to vector<8x16x128xf32>
    %131 = arith.mulf %128, %130 : vector<8x16x128xf32>
    %cst_58 = arith.constant dense<0xFF800000> : vector<8x16xf32>
    %132 = vector.multi_reduction <maximumf>, %131, %cst_58 [2] : vector<8x16x128xf32> to vector<8x16xf32>
    %cst_59 = arith.constant dense<0.000000e+00> : vector<8x16xf32>
    %133 = vector.multi_reduction <add>, %131, %cst_59 [2] : vector<8x16x128xf32> to vector<8x16xf32>
    %cst_60 = arith.constant 7.812500e-03 : f32
    %134 = vector.broadcast %cst_60 : f32 to vector<8x16xf32>
    %135 = arith.mulf %133, %134 : vector<8x16xf32>
    %c0_61 = arith.constant 0 : index
    %c8_62 = arith.constant 8 : index
    %c0_63 = arith.constant 0 : index
    %c0_64 = arith.constant 0 : index
    %136 = vector.load %arg1[%c0_61, %c8_62, %c0_63, %c0_64] : memref<1x16x16x128xf32, #tpu.memory_space<vmem>>, vector<1x8x16x128xf32>
    %137 = vector.shape_cast %136 : vector<1x8x16x128xf32> to vector<8x16x128xf32>
    %138 = vector.shape_cast %126 : vector<1x128xf32> to vector<1x1x128xf32>
    %139 = vector.broadcast %138 : vector<1x1x128xf32> to vector<8x16x128xf32>
    %140 = arith.mulf %137, %139 : vector<8x16x128xf32>
    %cst_65 = arith.constant dense<0xFF800000> : vector<8x16xf32>
    %141 = vector.multi_reduction <maximumf>, %140, %cst_65 [2] : vector<8x16x128xf32> to vector<8x16xf32>
    %cst_66 = arith.constant dense<0.000000e+00> : vector<8x16xf32>
    %142 = vector.multi_reduction <add>, %140, %cst_66 [2] : vector<8x16x128xf32> to vector<8x16xf32>
    %cst_67 = arith.constant 7.812500e-03 : f32
    %143 = vector.broadcast %cst_67 : f32 to vector<8x16xf32>
    %144 = arith.mulf %142, %143 : vector<8x16xf32>
    %145 = tpu.concatenate %132, %141 in 0 : vector<8x16xf32>, vector<8x16xf32> -> vector<16x16xf32>
    %146 = tpu.concatenate %135, %144 in 0 : vector<8x16xf32>, vector<8x16xf32> -> vector<16x16xf32>
    %cst_68 = arith.constant 0.000000e+00 : f32
    %147 = vector.broadcast %cst_68 : f32 to vector<3x16xf32>
    %cst_69 = arith.constant 0.000000e+00 : f32
    %148 = vector.broadcast %cst_69 : f32 to vector<16x3xf32>
    %149 = vector.extract_strided_slice %145 {offsets = [0, 0], sizes = [16, 13], strides = [1, 1]} : vector<16x16xf32> to vector<16x13xf32>
    %150 = tpu.concatenate %148, %149 in 1 : vector<16x3xf32>, vector<16x13xf32> -> vector<16x16xf32>
    %151 = tpu.concatenate %147, %150, %147 in 0 : vector<3x16xf32>, vector<16x16xf32>, vector<3x16xf32> -> vector<22x16xf32>
    %c0_70 = arith.constant 0 : index
    %c0_71 = arith.constant 0 : index
    %c0_72 = arith.constant 0 : index
    %152 = vector.load %arg6[%c0_70, %c0_71, %c0_72] : memref<7x22x16xf32, #tpu.memory_space<vmem>>, vector<1x22x16xf32>
    %153 = vector.shape_cast %152 : vector<1x22x16xf32> to vector<22x16xf32>
    %154 = vector.shape_cast %151 : vector<22x16xf32> to vector<1x22x16xf32>
    tpu.vector_store %arg6[%c0_70, %c0_71, %c0_72], %154 {strides = array<i32>} : memref<7x22x16xf32, #tpu.memory_space<vmem>>, vector<1x22x16xf32>,
    %cst_73 = arith.constant 0.000000e+00 : f32
    %155 = vector.broadcast %cst_73 : f32 to vector<16x3xf32>
    %156 = vector.extract_strided_slice %146 {offsets = [0, 0], sizes = [16, 13], strides = [1, 1]} : vector<16x16xf32> to vector<16x13xf32>
    %157 = tpu.concatenate %155, %156 in 1 : vector<16x3xf32>, vector<16x13xf32> -> vector<16x16xf32>
    %158 = tpu.concatenate %147, %157, %147 in 0 : vector<3x16xf32>, vector<16x16xf32>, vector<3x16xf32> -> vector<22x16xf32>
    %c0_74 = arith.constant 0 : index
    %c0_75 = arith.constant 0 : index
    %c0_76 = arith.constant 0 : index
    %159 = vector.load %arg7[%c0_74, %c0_75, %c0_76] : memref<7x22x16xf32, #tpu.memory_space<vmem>>, vector<1x22x16xf32>
    %160 = vector.shape_cast %159 : vector<1x22x16xf32> to vector<22x16xf32>
    %161 = vector.shape_cast %158 : vector<22x16xf32> to vector<1x22x16xf32>
    tpu.vector_store %arg7[%c0_74, %c0_75, %c0_76], %161 {strides = array<i32>} : memref<7x22x16xf32, #tpu.memory_space<vmem>>, vector<1x22x16xf32>,
    %cst_77 = arith.constant 0.000000e+00 : f32
    %162 = vector.broadcast %cst_77 : f32 to vector<16x2xf32>
    %163 = vector.extract_strided_slice %145 {offsets = [0, 0], sizes = [16, 14], strides = [1, 1]} : vector<16x16xf32> to vector<16x14xf32>
    %164 = tpu.concatenate %162, %163 in 1 : vector<16x2xf32>, vector<16x14xf32> -> vector<16x16xf32>
    %165 = tpu.concatenate %147, %164, %147 in 0 : vector<3x16xf32>, vector<16x16xf32>, vector<3x16xf32> -> vector<22x16xf32>
    %c1_78 = arith.constant 1 : index
    %c0_79 = arith.constant 0 : index
    %c0_80 = arith.constant 0 : index
    %166 = vector.load %arg6[%c1_78, %c0_79, %c0_80] : memref<7x22x16xf32, #tpu.memory_space<vmem>>, vector<1x22x16xf32>
    %167 = vector.shape_cast %166 : vector<1x22x16xf32> to vector<22x16xf32>
    %168 = vector.shape_cast %165 : vector<22x16xf32> to vector<1x22x16xf32>
    tpu.vector_store %arg6[%c1_78, %c0_79, %c0_80], %168 {strides = array<i32>} : memref<7x22x16xf32, #tpu.memory_space<vmem>>, vector<1x22x16xf32>,
    %cst_81 = arith.constant 0.000000e+00 : f32
    %169 = vector.broadcast %cst_81 : f32 to vector<16x2xf32>
    %170 = vector.extract_strided_slice %146 {offsets = [0, 0], sizes = [16, 14], strides = [1, 1]} : vector<16x16xf32> to vector<16x14xf32>
    %171 = tpu.concatenate %169, %170 in 1 : vector<16x2xf32>, vector<16x14xf32> -> vector<16x16xf32>
    %172 = tpu.concatenate %147, %171, %147 in 0 : vector<3x16xf32>, vector<16x16xf32>, vector<3x16xf32> -> vector<22x16xf32>
    %c1_82 = arith.constant 1 : index
    %c0_83 = arith.constant 0 : index
    %c0_84 = arith.constant 0 : index
    %173 = vector.load %arg7[%c1_82, %c0_83, %c0_84] : memref<7x22x16xf32, #tpu.memory_space<vmem>>, vector<1x22x16xf32>
    %174 = vector.shape_cast %173 : vector<1x22x16xf32> to vector<22x16xf32>
    %175 = vector.shape_cast %172 : vector<22x16xf32> to vector<1x22x16xf32>
    tpu.vector_store %arg7[%c1_82, %c0_83, %c0_84], %175 {strides = array<i32>} : memref<7x22x16xf32, #tpu.memory_space<vmem>>, vector<1x22x16xf32>,
    %cst_85 = arith.constant 0.000000e+00 : f32
    %176 = vector.broadcast %cst_85 : f32 to vector<16x1xf32>
    %177 = vector.extract_strided_slice %145 {offsets = [0, 0], sizes = [16, 15], strides = [1, 1]} : vector<16x16xf32> to vector<16x15xf32>
    %178 = tpu.concatenate %176, %177 in 1 : vector<16x1xf32>, vector<16x15xf32> -> vector<16x16xf32>
    %179 = tpu.concatenate %147, %178, %147 in 0 : vector<3x16xf32>, vector<16x16xf32>, vector<3x16xf32> -> vector<22x16xf32>
    %c2_86 = arith.constant 2 : index
    %c0_87 = arith.constant 0 : index
    %c0_88 = arith.constant 0 : index
    %180 = vector.load %arg6[%c2_86, %c0_87, %c0_88] : memref<7x22x16xf32, #tpu.memory_space<vmem>>, vector<1x22x16xf32>
    %181 = vector.shape_cast %180 : vector<1x22x16xf32> to vector<22x16xf32>
    %182 = vector.shape_cast %179 : vector<22x16xf32> to vector<1x22x16xf32>
    tpu.vector_store %arg6[%c2_86, %c0_87, %c0_88], %182 {strides = array<i32>} : memref<7x22x16xf32, #tpu.memory_space<vmem>>, vector<1x22x16xf32>,
    %cst_89 = arith.constant 0.000000e+00 : f32
    %183 = vector.broadcast %cst_89 : f32 to vector<16x1xf32>
    %184 = vector.extract_strided_slice %146 {offsets = [0, 0], sizes = [16, 15], strides = [1, 1]} : vector<16x16xf32> to vector<16x15xf32>
    %185 = tpu.concatenate %183, %184 in 1 : vector<16x1xf32>, vector<16x15xf32> -> vector<16x16xf32>
    %186 = tpu.concatenate %147, %185, %147 in 0 : vector<3x16xf32>, vector<16x16xf32>, vector<3x16xf32> -> vector<22x16xf32>
    %c2_90 = arith.constant 2 : index
    %c0_91 = arith.constant 0 : index
    %c0_92 = arith.constant 0 : index
    %187 = vector.load %arg7[%c2_90, %c0_91, %c0_92] : memref<7x22x16xf32, #tpu.memory_space<vmem>>, vector<1x22x16xf32>
    %188 = vector.shape_cast %187 : vector<1x22x16xf32> to vector<22x16xf32>
    %189 = vector.shape_cast %186 : vector<22x16xf32> to vector<1x22x16xf32>
    tpu.vector_store %arg7[%c2_90, %c0_91, %c0_92], %189 {strides = array<i32>} : memref<7x22x16xf32, #tpu.memory_space<vmem>>, vector<1x22x16xf32>,
    %190 = tpu.concatenate %147, %145, %147 in 0 : vector<3x16xf32>, vector<16x16xf32>, vector<3x16xf32> -> vector<22x16xf32>
    %c3_93 = arith.constant 3 : index
    %c0_94 = arith.constant 0 : index
    %c0_95 = arith.constant 0 : index
    %191 = vector.load %arg6[%c3_93, %c0_94, %c0_95] : memref<7x22x16xf32, #tpu.memory_space<vmem>>, vector<1x22x16xf32>
    %192 = vector.shape_cast %191 : vector<1x22x16xf32> to vector<22x16xf32>
    %193 = vector.shape_cast %190 : vector<22x16xf32> to vector<1x22x16xf32>
    tpu.vector_store %arg6[%c3_93, %c0_94, %c0_95], %193 {strides = array<i32>} : memref<7x22x16xf32, #tpu.memory_space<vmem>>, vector<1x22x16xf32>,
    %194 = tpu.concatenate %147, %146, %147 in 0 : vector<3x16xf32>, vector<16x16xf32>, vector<3x16xf32> -> vector<22x16xf32>
    %c3_96 = arith.constant 3 : index
    %c0_97 = arith.constant 0 : index
    %c0_98 = arith.constant 0 : index
    %195 = vector.load %arg7[%c3_96, %c0_97, %c0_98] : memref<7x22x16xf32, #tpu.memory_space<vmem>>, vector<1x22x16xf32>
    %196 = vector.shape_cast %195 : vector<1x22x16xf32> to vector<22x16xf32>
    %197 = vector.shape_cast %194 : vector<22x16xf32> to vector<1x22x16xf32>
    tpu.vector_store %arg7[%c3_96, %c0_97, %c0_98], %197 {strides = array<i32>} : memref<7x22x16xf32, #tpu.memory_space<vmem>>, vector<1x22x16xf32>,
    %198 = vector.extract_strided_slice %145 {offsets = [0, 1], sizes = [16, 15], strides = [1, 1]} : vector<16x16xf32> to vector<16x15xf32>
    %cst_99 = arith.constant 0.000000e+00 : f32
    %199 = vector.broadcast %cst_99 : f32 to vector<16x1xf32>
    %200 = tpu.concatenate %198, %199 in 1 : vector<16x15xf32>, vector<16x1xf32> -> vector<16x16xf32>
    %201 = tpu.concatenate %147, %200, %147 in 0 : vector<3x16xf32>, vector<16x16xf32>, vector<3x16xf32> -> vector<22x16xf32>
    %c4_100 = arith.constant 4 : index
    %c0_101 = arith.constant 0 : index
    %c0_102 = arith.constant 0 : index
    %202 = vector.load %arg6[%c4_100, %c0_101, %c0_102] : memref<7x22x16xf32, #tpu.memory_space<vmem>>, vector<1x22x16xf32>
    %203 = vector.shape_cast %202 : vector<1x22x16xf32> to vector<22x16xf32>
    %204 = vector.shape_cast %201 : vector<22x16xf32> to vector<1x22x16xf32>
    tpu.vector_store %arg6[%c4_100, %c0_101, %c0_102], %204 {strides = array<i32>} : memref<7x22x16xf32, #tpu.memory_space<vmem>>, vector<1x22x16xf32>,
    %205 = vector.extract_strided_slice %146 {offsets = [0, 1], sizes = [16, 15], strides = [1, 1]} : vector<16x16xf32> to vector<16x15xf32>
    %cst_103 = arith.constant 0.000000e+00 : f32
    %206 = vector.broadcast %cst_103 : f32 to vector<16x1xf32>
    %207 = tpu.concatenate %205, %206 in 1 : vector<16x15xf32>, vector<16x1xf32> -> vector<16x16xf32>
    %208 = tpu.concatenate %147, %207, %147 in 0 : vector<3x16xf32>, vector<16x16xf32>, vector<3x16xf32> -> vector<22x16xf32>
    %c4_104 = arith.constant 4 : index
    %c0_105 = arith.constant 0 : index
    %c0_106 = arith.constant 0 : index
    %209 = vector.load %arg7[%c4_104, %c0_105, %c0_106] : memref<7x22x16xf32, #tpu.memory_space<vmem>>, vector<1x22x16xf32>
    %210 = vector.shape_cast %209 : vector<1x22x16xf32> to vector<22x16xf32>
    %211 = vector.shape_cast %208 : vector<22x16xf32> to vector<1x22x16xf32>
    tpu.vector_store %arg7[%c4_104, %c0_105, %c0_106], %211 {strides = array<i32>} : memref<7x22x16xf32, #tpu.memory_space<vmem>>, vector<1x22x16xf32>,
    %212 = vector.extract_strided_slice %145 {offsets = [0, 2], sizes = [16, 14], strides = [1, 1]} : vector<16x16xf32> to vector<16x14xf32>
    %cst_107 = arith.constant 0.000000e+00 : f32
    %213 = vector.broadcast %cst_107 : f32 to vector<16x2xf32>
    %214 = tpu.concatenate %212, %213 in 1 : vector<16x14xf32>, vector<16x2xf32> -> vector<16x16xf32>
    %215 = tpu.concatenate %147, %214, %147 in 0 : vector<3x16xf32>, vector<16x16xf32>, vector<3x16xf32> -> vector<22x16xf32>
    %c5_108 = arith.constant 5 : index
    %c0_109 = arith.constant 0 : index
    %c0_110 = arith.constant 0 : index
    %216 = vector.load %arg6[%c5_108, %c0_109, %c0_110] : memref<7x22x16xf32, #tpu.memory_space<vmem>>, vector<1x22x16xf32>
    %217 = vector.shape_cast %216 : vector<1x22x16xf32> to vector<22x16xf32>
    %218 = vector.shape_cast %215 : vector<22x16xf32> to vector<1x22x16xf32>
    tpu.vector_store %arg6[%c5_108, %c0_109, %c0_110], %218 {strides = array<i32>} : memref<7x22x16xf32, #tpu.memory_space<vmem>>, vector<1x22x16xf32>,
    %219 = vector.extract_strided_slice %146 {offsets = [0, 2], sizes = [16, 14], strides = [1, 1]} : vector<16x16xf32> to vector<16x14xf32>
    %cst_111 = arith.constant 0.000000e+00 : f32
    %220 = vector.broadcast %cst_111 : f32 to vector<16x2xf32>
    %221 = tpu.concatenate %219, %220 in 1 : vector<16x14xf32>, vector<16x2xf32> -> vector<16x16xf32>
    %222 = tpu.concatenate %147, %221, %147 in 0 : vector<3x16xf32>, vector<16x16xf32>, vector<3x16xf32> -> vector<22x16xf32>
    %c5_112 = arith.constant 5 : index
    %c0_113 = arith.constant 0 : index
    %c0_114 = arith.constant 0 : index
    %223 = vector.load %arg7[%c5_112, %c0_113, %c0_114] : memref<7x22x16xf32, #tpu.memory_space<vmem>>, vector<1x22x16xf32>
    %224 = vector.shape_cast %223 : vector<1x22x16xf32> to vector<22x16xf32>
    %225 = vector.shape_cast %222 : vector<22x16xf32> to vector<1x22x16xf32>
    tpu.vector_store %arg7[%c5_112, %c0_113, %c0_114], %225 {strides = array<i32>} : memref<7x22x16xf32, #tpu.memory_space<vmem>>, vector<1x22x16xf32>,
    %226 = vector.extract_strided_slice %145 {offsets = [0, 3], sizes = [16, 13], strides = [1, 1]} : vector<16x16xf32> to vector<16x13xf32>
    %cst_115 = arith.constant 0.000000e+00 : f32
    %227 = vector.broadcast %cst_115 : f32 to vector<16x3xf32>
    %228 = tpu.concatenate %226, %227 in 1 : vector<16x13xf32>, vector<16x3xf32> -> vector<16x16xf32>
    %229 = tpu.concatenate %147, %228, %147 in 0 : vector<3x16xf32>, vector<16x16xf32>, vector<3x16xf32> -> vector<22x16xf32>
    %c6_116 = arith.constant 6 : index
    %c0_117 = arith.constant 0 : index
    %c0_118 = arith.constant 0 : index
    %230 = vector.load %arg6[%c6_116, %c0_117, %c0_118] : memref<7x22x16xf32, #tpu.memory_space<vmem>>, vector<1x22x16xf32>
    %231 = vector.shape_cast %230 : vector<1x22x16xf32> to vector<22x16xf32>
    %232 = vector.shape_cast %229 : vector<22x16xf32> to vector<1x22x16xf32>
    tpu.vector_store %arg6[%c6_116, %c0_117, %c0_118], %232 {strides = array<i32>} : memref<7x22x16xf32, #tpu.memory_space<vmem>>, vector<1x22x16xf32>,
    %233 = vector.extract_strided_slice %146 {offsets = [0, 3], sizes = [16, 13], strides = [1, 1]} : vector<16x16xf32> to vector<16x13xf32>
    %cst_119 = arith.constant 0.000000e+00 : f32
    %234 = vector.broadcast %cst_119 : f32 to vector<16x3xf32>
    %235 = tpu.concatenate %233, %234 in 1 : vector<16x13xf32>, vector<16x3xf32> -> vector<16x16xf32>
    %236 = tpu.concatenate %147, %235, %147 in 0 : vector<3x16xf32>, vector<16x16xf32>, vector<3x16xf32> -> vector<22x16xf32>
    %c6_120 = arith.constant 6 : index
    %c0_121 = arith.constant 0 : index
    %c0_122 = arith.constant 0 : index
    %237 = vector.load %arg7[%c6_120, %c0_121, %c0_122] : memref<7x22x16xf32, #tpu.memory_space<vmem>>, vector<1x22x16xf32>
    %238 = vector.shape_cast %237 : vector<1x22x16xf32> to vector<22x16xf32>
    %239 = vector.shape_cast %236 : vector<22x16xf32> to vector<1x22x16xf32>
    tpu.vector_store %arg7[%c6_120, %c0_121, %c0_122], %239 {strides = array<i32>} : memref<7x22x16xf32, #tpu.memory_space<vmem>>, vector<1x22x16xf32>,
    %cst_123 = arith.constant 0.000000e+00 : f32
    %240 = vector.broadcast %cst_123 : f32 to vector<16x16xf32>
    %c0_124 = arith.constant 0 : index
    %241 = memref.load %arg4[%c0_124] : memref<98xf32, #tpu.memory_space<smem>>
    %c0_125 = arith.constant 0 : index
    %c0_126 = arith.constant 0 : index
    %c0_127 = arith.constant 0 : index
    %242 = vector.load %arg6[%c0_125, %c0_126, %c0_127] : memref<7x22x16xf32, #tpu.memory_space<vmem>>, vector<1x16x16xf32>
    %243 = vector.shape_cast %242 : vector<1x16x16xf32> to vector<16x16xf32>
    %244 = vector.broadcast %241 : f32 to vector<16x16xf32>
    %245 = arith.mulf %244, %243 : vector<16x16xf32>
    %246 = arith.addf %240, %245 : vector<16x16xf32>
    %c49 = arith.constant 49 : index
    %247 = memref.load %arg4[%c49] : memref<98xf32, #tpu.memory_space<smem>>
    %c0_128 = arith.constant 0 : index
    %c0_129 = arith.constant 0 : index
    %c0_130 = arith.constant 0 : index
    %248 = vector.load %arg7[%c0_128, %c0_129, %c0_130] : memref<7x22x16xf32, #tpu.memory_space<vmem>>, vector<1x16x16xf32>
    %249 = vector.shape_cast %248 : vector<1x16x16xf32> to vector<16x16xf32>
    %250 = vector.broadcast %247 : f32 to vector<16x16xf32>
    %251 = arith.mulf %250, %249 : vector<16x16xf32>
    %252 = arith.addf %246, %251 : vector<16x16xf32>
    %c1_131 = arith.constant 1 : index
    %253 = memref.load %arg4[%c1_131] : memref<98xf32, #tpu.memory_space<smem>>
    %c1_132 = arith.constant 1 : index
    %c0_133 = arith.constant 0 : index
    %c0_134 = arith.constant 0 : index
    %254 = vector.load %arg6[%c1_132, %c0_133, %c0_134] : memref<7x22x16xf32, #tpu.memory_space<vmem>>, vector<1x16x16xf32>
    %255 = vector.shape_cast %254 : vector<1x16x16xf32> to vector<16x16xf32>
    %256 = vector.broadcast %253 : f32 to vector<16x16xf32>
    %257 = arith.mulf %256, %255 : vector<16x16xf32>
    %258 = arith.addf %252, %257 : vector<16x16xf32>
    %c50 = arith.constant 50 : index
    %259 = memref.load %arg4[%c50] : memref<98xf32, #tpu.memory_space<smem>>
    %c1_135 = arith.constant 1 : index
    %c0_136 = arith.constant 0 : index
    %c0_137 = arith.constant 0 : index
    %260 = vector.load %arg7[%c1_135, %c0_136, %c0_137] : memref<7x22x16xf32, #tpu.memory_space<vmem>>, vector<1x16x16xf32>
    %261 = vector.shape_cast %260 : vector<1x16x16xf32> to vector<16x16xf32>
    %262 = vector.broadcast %259 : f32 to vector<16x16xf32>
    %263 = arith.mulf %262, %261 : vector<16x16xf32>
    %264 = arith.addf %258, %263 : vector<16x16xf32>
    %c2_138 = arith.constant 2 : index
    %265 = memref.load %arg4[%c2_138] : memref<98xf32, #tpu.memory_space<smem>>
    %c2_139 = arith.constant 2 : index
    %c0_140 = arith.constant 0 : index
    %c0_141 = arith.constant 0 : index
    %266 = vector.load %arg6[%c2_139, %c0_140, %c0_141] : memref<7x22x16xf32, #tpu.memory_space<vmem>>, vector<1x16x16xf32>
    %267 = vector.shape_cast %266 : vector<1x16x16xf32> to vector<16x16xf32>
    %268 = vector.broadcast %265 : f32 to vector<16x16xf32>
    %269 = arith.mulf %268, %267 : vector<16x16xf32>
    %270 = arith.addf %264, %269 : vector<16x16xf32>
    %c51 = arith.constant 51 : index
    %271 = memref.load %arg4[%c51] : memref<98xf32, #tpu.memory_space<smem>>
    %c2_142 = arith.constant 2 : index
    %c0_143 = arith.constant 0 : index
    %c0_144 = arith.constant 0 : index
    %272 = vector.load %arg7[%c2_142, %c0_143, %c0_144] : memref<7x22x16xf32, #tpu.memory_space<vmem>>, vector<1x16x16xf32>
    %273 = vector.shape_cast %272 : vector<1x16x16xf32> to vector<16x16xf32>
    %274 = vector.broadcast %271 : f32 to vector<16x16xf32>
    %275 = arith.mulf %274, %273 : vector<16x16xf32>
    %276 = arith.addf %270, %275 : vector<16x16xf32>
    %c3_145 = arith.constant 3 : index
    %277 = memref.load %arg4[%c3_145] : memref<98xf32, #tpu.memory_space<smem>>
    %c3_146 = arith.constant 3 : index
    %c0_147 = arith.constant 0 : index
    %c0_148 = arith.constant 0 : index
    %278 = vector.load %arg6[%c3_146, %c0_147, %c0_148] : memref<7x22x16xf32, #tpu.memory_space<vmem>>, vector<1x16x16xf32>
    %279 = vector.shape_cast %278 : vector<1x16x16xf32> to vector<16x16xf32>
    %280 = vector.broadcast %277 : f32 to vector<16x16xf32>
    %281 = arith.mulf %280, %279 : vector<16x16xf32>
    %282 = arith.addf %276, %281 : vector<16x16xf32>
    %c52 = arith.constant 52 : index
    %283 = memref.load %arg4[%c52] : memref<98xf32, #tpu.memory_space<smem>>
    %c3_149 = arith.constant 3 : index
    %c0_150 = arith.constant 0 : index
    %c0_151 = arith.constant 0 : index
    %284 = vector.load %arg7[%c3_149, %c0_150, %c0_151] : memref<7x22x16xf32, #tpu.memory_space<vmem>>, vector<1x16x16xf32>
    %285 = vector.shape_cast %284 : vector<1x16x16xf32> to vector<16x16xf32>
    %286 = vector.broadcast %283 : f32 to vector<16x16xf32>
    %287 = arith.mulf %286, %285 : vector<16x16xf32>
    %288 = arith.addf %282, %287 : vector<16x16xf32>
    %c4_152 = arith.constant 4 : index
    %289 = memref.load %arg4[%c4_152] : memref<98xf32, #tpu.memory_space<smem>>
    %c4_153 = arith.constant 4 : index
    %c0_154 = arith.constant 0 : index
    %c0_155 = arith.constant 0 : index
    %290 = vector.load %arg6[%c4_153, %c0_154, %c0_155] : memref<7x22x16xf32, #tpu.memory_space<vmem>>, vector<1x16x16xf32>
    %291 = vector.shape_cast %290 : vector<1x16x16xf32> to vector<16x16xf32>
    %292 = vector.broadcast %289 : f32 to vector<16x16xf32>
    %293 = arith.mulf %292, %291 : vector<16x16xf32>
    %294 = arith.addf %288, %293 : vector<16x16xf32>
    %c53 = arith.constant 53 : index
    %295 = memref.load %arg4[%c53] : memref<98xf32, #tpu.memory_space<smem>>
    %c4_156 = arith.constant 4 : index
    %c0_157 = arith.constant 0 : index
    %c0_158 = arith.constant 0 : index
    %296 = vector.load %arg7[%c4_156, %c0_157, %c0_158] : memref<7x22x16xf32, #tpu.memory_space<vmem>>, vector<1x16x16xf32>
    %297 = vector.shape_cast %296 : vector<1x16x16xf32> to vector<16x16xf32>
    %298 = vector.broadcast %295 : f32 to vector<16x16xf32>
    %299 = arith.mulf %298, %297 : vector<16x16xf32>
    %300 = arith.addf %294, %299 : vector<16x16xf32>
    %c5_159 = arith.constant 5 : index
    %301 = memref.load %arg4[%c5_159] : memref<98xf32, #tpu.memory_space<smem>>
    %c5_160 = arith.constant 5 : index
    %c0_161 = arith.constant 0 : index
    %c0_162 = arith.constant 0 : index
    %302 = vector.load %arg6[%c5_160, %c0_161, %c0_162] : memref<7x22x16xf32, #tpu.memory_space<vmem>>, vector<1x16x16xf32>
    %303 = vector.shape_cast %302 : vector<1x16x16xf32> to vector<16x16xf32>
    %304 = vector.broadcast %301 : f32 to vector<16x16xf32>
    %305 = arith.mulf %304, %303 : vector<16x16xf32>
    %306 = arith.addf %300, %305 : vector<16x16xf32>
    %c54 = arith.constant 54 : index
    %307 = memref.load %arg4[%c54] : memref<98xf32, #tpu.memory_space<smem>>
    %c5_163 = arith.constant 5 : index
    %c0_164 = arith.constant 0 : index
    %c0_165 = arith.constant 0 : index
    %308 = vector.load %arg7[%c5_163, %c0_164, %c0_165] : memref<7x22x16xf32, #tpu.memory_space<vmem>>, vector<1x16x16xf32>
    %309 = vector.shape_cast %308 : vector<1x16x16xf32> to vector<16x16xf32>
    %310 = vector.broadcast %307 : f32 to vector<16x16xf32>
    %311 = arith.mulf %310, %309 : vector<16x16xf32>
    %312 = arith.addf %306, %311 : vector<16x16xf32>
    %c6_166 = arith.constant 6 : index
    %313 = memref.load %arg4[%c6_166] : memref<98xf32, #tpu.memory_space<smem>>
    %c6_167 = arith.constant 6 : index
    %c0_168 = arith.constant 0 : index
    %c0_169 = arith.constant 0 : index
    %314 = vector.load %arg6[%c6_167, %c0_168, %c0_169] : memref<7x22x16xf32, #tpu.memory_space<vmem>>, vector<1x16x16xf32>
    %315 = vector.shape_cast %314 : vector<1x16x16xf32> to vector<16x16xf32>
    %316 = vector.broadcast %313 : f32 to vector<16x16xf32>
    %317 = arith.mulf %316, %315 : vector<16x16xf32>
    %318 = arith.addf %312, %317 : vector<16x16xf32>
    %c55 = arith.constant 55 : index
    %319 = memref.load %arg4[%c55] : memref<98xf32, #tpu.memory_space<smem>>
    %c6_170 = arith.constant 6 : index
    %c0_171 = arith.constant 0 : index
    %c0_172 = arith.constant 0 : index
    %320 = vector.load %arg7[%c6_170, %c0_171, %c0_172] : memref<7x22x16xf32, #tpu.memory_space<vmem>>, vector<1x16x16xf32>
    %321 = vector.shape_cast %320 : vector<1x16x16xf32> to vector<16x16xf32>
    %322 = vector.broadcast %319 : f32 to vector<16x16xf32>
    %323 = arith.mulf %322, %321 : vector<16x16xf32>
    %324 = arith.addf %318, %323 : vector<16x16xf32>
    %c7_173 = arith.constant 7 : index
    %325 = memref.load %arg4[%c7_173] : memref<98xf32, #tpu.memory_space<smem>>
    %c0_174 = arith.constant 0 : index
    %c1_175 = arith.constant 1 : index
    %c0_176 = arith.constant 0 : index
    %326 = vector.load %arg6[%c0_174, %c1_175, %c0_176] : memref<7x22x16xf32, #tpu.memory_space<vmem>>, vector<1x16x16xf32>
    %327 = vector.shape_cast %326 : vector<1x16x16xf32> to vector<16x16xf32>
    %328 = vector.broadcast %325 : f32 to vector<16x16xf32>
    %329 = arith.mulf %328, %327 : vector<16x16xf32>
    %330 = arith.addf %324, %329 : vector<16x16xf32>
    %c56 = arith.constant 56 : index
    %331 = memref.load %arg4[%c56] : memref<98xf32, #tpu.memory_space<smem>>
    %c0_177 = arith.constant 0 : index
    %c1_178 = arith.constant 1 : index
    %c0_179 = arith.constant 0 : index
    %332 = vector.load %arg7[%c0_177, %c1_178, %c0_179] : memref<7x22x16xf32, #tpu.memory_space<vmem>>, vector<1x16x16xf32>
    %333 = vector.shape_cast %332 : vector<1x16x16xf32> to vector<16x16xf32>
    %334 = vector.broadcast %331 : f32 to vector<16x16xf32>
    %335 = arith.mulf %334, %333 : vector<16x16xf32>
    %336 = arith.addf %330, %335 : vector<16x16xf32>
    %c8_180 = arith.constant 8 : index
    %337 = memref.load %arg4[%c8_180] : memref<98xf32, #tpu.memory_space<smem>>
    %c1_181 = arith.constant 1 : index
    %c1_182 = arith.constant 1 : index
    %c0_183 = arith.constant 0 : index
    %338 = vector.load %arg6[%c1_181, %c1_182, %c0_183] : memref<7x22x16xf32, #tpu.memory_space<vmem>>, vector<1x16x16xf32>
    %339 = vector.shape_cast %338 : vector<1x16x16xf32> to vector<16x16xf32>
    %340 = vector.broadcast %337 : f32 to vector<16x16xf32>
    %341 = arith.mulf %340, %339 : vector<16x16xf32>
    %342 = arith.addf %336, %341 : vector<16x16xf32>
    %c57 = arith.constant 57 : index
    %343 = memref.load %arg4[%c57] : memref<98xf32, #tpu.memory_space<smem>>
    %c1_184 = arith.constant 1 : index
    %c1_185 = arith.constant 1 : index
    %c0_186 = arith.constant 0 : index
    %344 = vector.load %arg7[%c1_184, %c1_185, %c0_186] : memref<7x22x16xf32, #tpu.memory_space<vmem>>, vector<1x16x16xf32>
    %345 = vector.shape_cast %344 : vector<1x16x16xf32> to vector<16x16xf32>
    %346 = vector.broadcast %343 : f32 to vector<16x16xf32>
    %347 = arith.mulf %346, %345 : vector<16x16xf32>
    %348 = arith.addf %342, %347 : vector<16x16xf32>
    %c9 = arith.constant 9 : index
    %349 = memref.load %arg4[%c9] : memref<98xf32, #tpu.memory_space<smem>>
    %c2_187 = arith.constant 2 : index
    %c1_188 = arith.constant 1 : index
    %c0_189 = arith.constant 0 : index
    %350 = vector.load %arg6[%c2_187, %c1_188, %c0_189] : memref<7x22x16xf32, #tpu.memory_space<vmem>>, vector<1x16x16xf32>
    %351 = vector.shape_cast %350 : vector<1x16x16xf32> to vector<16x16xf32>
    %352 = vector.broadcast %349 : f32 to vector<16x16xf32>
    %353 = arith.mulf %352, %351 : vector<16x16xf32>
    %354 = arith.addf %348, %353 : vector<16x16xf32>
    %c58 = arith.constant 58 : index
    %355 = memref.load %arg4[%c58] : memref<98xf32, #tpu.memory_space<smem>>
    %c2_190 = arith.constant 2 : index
    %c1_191 = arith.constant 1 : index
    %c0_192 = arith.constant 0 : index
    %356 = vector.load %arg7[%c2_190, %c1_191, %c0_192] : memref<7x22x16xf32, #tpu.memory_space<vmem>>, vector<1x16x16xf32>
    %357 = vector.shape_cast %356 : vector<1x16x16xf32> to vector<16x16xf32>
    %358 = vector.broadcast %355 : f32 to vector<16x16xf32>
    %359 = arith.mulf %358, %357 : vector<16x16xf32>
    %360 = arith.addf %354, %359 : vector<16x16xf32>
    %c10 = arith.constant 10 : index
    %361 = memref.load %arg4[%c10] : memref<98xf32, #tpu.memory_space<smem>>
    %c3_193 = arith.constant 3 : index
    %c1_194 = arith.constant 1 : index
    %c0_195 = arith.constant 0 : index
    %362 = vector.load %arg6[%c3_193, %c1_194, %c0_195] : memref<7x22x16xf32, #tpu.memory_space<vmem>>, vector<1x16x16xf32>
    %363 = vector.shape_cast %362 : vector<1x16x16xf32> to vector<16x16xf32>
    %364 = vector.broadcast %361 : f32 to vector<16x16xf32>
    %365 = arith.mulf %364, %363 : vector<16x16xf32>
    %366 = arith.addf %360, %365 : vector<16x16xf32>
    %c59 = arith.constant 59 : index
    %367 = memref.load %arg4[%c59] : memref<98xf32, #tpu.memory_space<smem>>
    %c3_196 = arith.constant 3 : index
    %c1_197 = arith.constant 1 : index
    %c0_198 = arith.constant 0 : index
    %368 = vector.load %arg7[%c3_196, %c1_197, %c0_198] : memref<7x22x16xf32, #tpu.memory_space<vmem>>, vector<1x16x16xf32>
    %369 = vector.shape_cast %368 : vector<1x16x16xf32> to vector<16x16xf32>
    %370 = vector.broadcast %367 : f32 to vector<16x16xf32>
    %371 = arith.mulf %370, %369 : vector<16x16xf32>
    %372 = arith.addf %366, %371 : vector<16x16xf32>
    %c11 = arith.constant 11 : index
    %373 = memref.load %arg4[%c11] : memref<98xf32, #tpu.memory_space<smem>>
    %c4_199 = arith.constant 4 : index
    %c1_200 = arith.constant 1 : index
    %c0_201 = arith.constant 0 : index
    %374 = vector.load %arg6[%c4_199, %c1_200, %c0_201] : memref<7x22x16xf32, #tpu.memory_space<vmem>>, vector<1x16x16xf32>
    %375 = vector.shape_cast %374 : vector<1x16x16xf32> to vector<16x16xf32>
    %376 = vector.broadcast %373 : f32 to vector<16x16xf32>
    %377 = arith.mulf %376, %375 : vector<16x16xf32>
    %378 = arith.addf %372, %377 : vector<16x16xf32>
    %c60 = arith.constant 60 : index
    %379 = memref.load %arg4[%c60] : memref<98xf32, #tpu.memory_space<smem>>
    %c4_202 = arith.constant 4 : index
    %c1_203 = arith.constant 1 : index
    %c0_204 = arith.constant 0 : index
    %380 = vector.load %arg7[%c4_202, %c1_203, %c0_204] : memref<7x22x16xf32, #tpu.memory_space<vmem>>, vector<1x16x16xf32>
    %381 = vector.shape_cast %380 : vector<1x16x16xf32> to vector<16x16xf32>
    %382 = vector.broadcast %379 : f32 to vector<16x16xf32>
    %383 = arith.mulf %382, %381 : vector<16x16xf32>
    %384 = arith.addf %378, %383 : vector<16x16xf32>
    %c12 = arith.constant 12 : index
    %385 = memref.load %arg4[%c12] : memref<98xf32, #tpu.memory_space<smem>>
    %c5_205 = arith.constant 5 : index
    %c1_206 = arith.constant 1 : index
    %c0_207 = arith.constant 0 : index
    %386 = vector.load %arg6[%c5_205, %c1_206, %c0_207] : memref<7x22x16xf32, #tpu.memory_space<vmem>>, vector<1x16x16xf32>
    %387 = vector.shape_cast %386 : vector<1x16x16xf32> to vector<16x16xf32>
    %388 = vector.broadcast %385 : f32 to vector<16x16xf32>
    %389 = arith.mulf %388, %387 : vector<16x16xf32>
    %390 = arith.addf %384, %389 : vector<16x16xf32>
    %c61 = arith.constant 61 : index
    %391 = memref.load %arg4[%c61] : memref<98xf32, #tpu.memory_space<smem>>
    %c5_208 = arith.constant 5 : index
    %c1_209 = arith.constant 1 : index
    %c0_210 = arith.constant 0 : index
    %392 = vector.load %arg7[%c5_208, %c1_209, %c0_210] : memref<7x22x16xf32, #tpu.memory_space<vmem>>, vector<1x16x16xf32>
    %393 = vector.shape_cast %392 : vector<1x16x16xf32> to vector<16x16xf32>
    %394 = vector.broadcast %391 : f32 to vector<16x16xf32>
    %395 = arith.mulf %394, %393 : vector<16x16xf32>
    %396 = arith.addf %390, %395 : vector<16x16xf32>
    %c13 = arith.constant 13 : index
    %397 = memref.load %arg4[%c13] : memref<98xf32, #tpu.memory_space<smem>>
    %c6_211 = arith.constant 6 : index
    %c1_212 = arith.constant 1 : index
    %c0_213 = arith.constant 0 : index
    %398 = vector.load %arg6[%c6_211, %c1_212, %c0_213] : memref<7x22x16xf32, #tpu.memory_space<vmem>>, vector<1x16x16xf32>
    %399 = vector.shape_cast %398 : vector<1x16x16xf32> to vector<16x16xf32>
    %400 = vector.broadcast %397 : f32 to vector<16x16xf32>
    %401 = arith.mulf %400, %399 : vector<16x16xf32>
    %402 = arith.addf %396, %401 : vector<16x16xf32>
    %c62 = arith.constant 62 : index
    %403 = memref.load %arg4[%c62] : memref<98xf32, #tpu.memory_space<smem>>
    %c6_214 = arith.constant 6 : index
    %c1_215 = arith.constant 1 : index
    %c0_216 = arith.constant 0 : index
    %404 = vector.load %arg7[%c6_214, %c1_215, %c0_216] : memref<7x22x16xf32, #tpu.memory_space<vmem>>, vector<1x16x16xf32>
    %405 = vector.shape_cast %404 : vector<1x16x16xf32> to vector<16x16xf32>
    %406 = vector.broadcast %403 : f32 to vector<16x16xf32>
    %407 = arith.mulf %406, %405 : vector<16x16xf32>
    %408 = arith.addf %402, %407 : vector<16x16xf32>
    %c14 = arith.constant 14 : index
    %409 = memref.load %arg4[%c14] : memref<98xf32, #tpu.memory_space<smem>>
    %c0_217 = arith.constant 0 : index
    %c2_218 = arith.constant 2 : index
    %c0_219 = arith.constant 0 : index
    %410 = vector.load %arg6[%c0_217, %c2_218, %c0_219] : memref<7x22x16xf32, #tpu.memory_space<vmem>>, vector<1x16x16xf32>
    %411 = vector.shape_cast %410 : vector<1x16x16xf32> to vector<16x16xf32>
    %412 = vector.broadcast %409 : f32 to vector<16x16xf32>
    %413 = arith.mulf %412, %411 : vector<16x16xf32>
    %414 = arith.addf %408, %413 : vector<16x16xf32>
    %c63 = arith.constant 63 : index
    %415 = memref.load %arg4[%c63] : memref<98xf32, #tpu.memory_space<smem>>
    %c0_220 = arith.constant 0 : index
    %c2_221 = arith.constant 2 : index
    %c0_222 = arith.constant 0 : index
    %416 = vector.load %arg7[%c0_220, %c2_221, %c0_222] : memref<7x22x16xf32, #tpu.memory_space<vmem>>, vector<1x16x16xf32>
    %417 = vector.shape_cast %416 : vector<1x16x16xf32> to vector<16x16xf32>
    %418 = vector.broadcast %415 : f32 to vector<16x16xf32>
    %419 = arith.mulf %418, %417 : vector<16x16xf32>
    %420 = arith.addf %414, %419 : vector<16x16xf32>
    %c15 = arith.constant 15 : index
    %421 = memref.load %arg4[%c15] : memref<98xf32, #tpu.memory_space<smem>>
    %c1_223 = arith.constant 1 : index
    %c2_224 = arith.constant 2 : index
    %c0_225 = arith.constant 0 : index
    %422 = vector.load %arg6[%c1_223, %c2_224, %c0_225] : memref<7x22x16xf32, #tpu.memory_space<vmem>>, vector<1x16x16xf32>
    %423 = vector.shape_cast %422 : vector<1x16x16xf32> to vector<16x16xf32>
    %424 = vector.broadcast %421 : f32 to vector<16x16xf32>
    %425 = arith.mulf %424, %423 : vector<16x16xf32>
    %426 = arith.addf %420, %425 : vector<16x16xf32>
    %c64 = arith.constant 64 : index
    %427 = memref.load %arg4[%c64] : memref<98xf32, #tpu.memory_space<smem>>
    %c1_226 = arith.constant 1 : index
    %c2_227 = arith.constant 2 : index
    %c0_228 = arith.constant 0 : index
    %428 = vector.load %arg7[%c1_226, %c2_227, %c0_228] : memref<7x22x16xf32, #tpu.memory_space<vmem>>, vector<1x16x16xf32>
    %429 = vector.shape_cast %428 : vector<1x16x16xf32> to vector<16x16xf32>
    %430 = vector.broadcast %427 : f32 to vector<16x16xf32>
    %431 = arith.mulf %430, %429 : vector<16x16xf32>
    %432 = arith.addf %426, %431 : vector<16x16xf32>
    %c16 = arith.constant 16 : index
    %433 = memref.load %arg4[%c16] : memref<98xf32, #tpu.memory_space<smem>>
    %c2_229 = arith.constant 2 : index
    %c2_230 = arith.constant 2 : index
    %c0_231 = arith.constant 0 : index
    %434 = vector.load %arg6[%c2_229, %c2_230, %c0_231] : memref<7x22x16xf32, #tpu.memory_space<vmem>>, vector<1x16x16xf32>
    %435 = vector.shape_cast %434 : vector<1x16x16xf32> to vector<16x16xf32>
    %436 = vector.broadcast %433 : f32 to vector<16x16xf32>
    %437 = arith.mulf %436, %435 : vector<16x16xf32>
    %438 = arith.addf %432, %437 : vector<16x16xf32>
    %c65 = arith.constant 65 : index
    %439 = memref.load %arg4[%c65] : memref<98xf32, #tpu.memory_space<smem>>
    %c2_232 = arith.constant 2 : index
    %c2_233 = arith.constant 2 : index
    %c0_234 = arith.constant 0 : index
    %440 = vector.load %arg7[%c2_232, %c2_233, %c0_234] : memref<7x22x16xf32, #tpu.memory_space<vmem>>, vector<1x16x16xf32>
    %441 = vector.shape_cast %440 : vector<1x16x16xf32> to vector<16x16xf32>
    %442 = vector.broadcast %439 : f32 to vector<16x16xf32>
    %443 = arith.mulf %442, %441 : vector<16x16xf32>
    %444 = arith.addf %438, %443 : vector<16x16xf32>
    %c17 = arith.constant 17 : index
    %445 = memref.load %arg4[%c17] : memref<98xf32, #tpu.memory_space<smem>>
    %c3_235 = arith.constant 3 : index
    %c2_236 = arith.constant 2 : index
    %c0_237 = arith.constant 0 : index
    %446 = vector.load %arg6[%c3_235, %c2_236, %c0_237] : memref<7x22x16xf32, #tpu.memory_space<vmem>>, vector<1x16x16xf32>
    %447 = vector.shape_cast %446 : vector<1x16x16xf32> to vector<16x16xf32>
    %448 = vector.broadcast %445 : f32 to vector<16x16xf32>
    %449 = arith.mulf %448, %447 : vector<16x16xf32>
    %450 = arith.addf %444, %449 : vector<16x16xf32>
    %c66 = arith.constant 66 : index
    %451 = memref.load %arg4[%c66] : memref<98xf32, #tpu.memory_space<smem>>
    %c3_238 = arith.constant 3 : index
    %c2_239 = arith.constant 2 : index
    %c0_240 = arith.constant 0 : index
    %452 = vector.load %arg7[%c3_238, %c2_239, %c0_240] : memref<7x22x16xf32, #tpu.memory_space<vmem>>, vector<1x16x16xf32>
    %453 = vector.shape_cast %452 : vector<1x16x16xf32> to vector<16x16xf32>
    %454 = vector.broadcast %451 : f32 to vector<16x16xf32>
    %455 = arith.mulf %454, %453 : vector<16x16xf32>
    %456 = arith.addf %450, %455 : vector<16x16xf32>
    %c18 = arith.constant 18 : index
    %457 = memref.load %arg4[%c18] : memref<98xf32, #tpu.memory_space<smem>>
    %c4_241 = arith.constant 4 : index
    %c2_242 = arith.constant 2 : index
    %c0_243 = arith.constant 0 : index
    %458 = vector.load %arg6[%c4_241, %c2_242, %c0_243] : memref<7x22x16xf32, #tpu.memory_space<vmem>>, vector<1x16x16xf32>
    %459 = vector.shape_cast %458 : vector<1x16x16xf32> to vector<16x16xf32>
    %460 = vector.broadcast %457 : f32 to vector<16x16xf32>
    %461 = arith.mulf %460, %459 : vector<16x16xf32>
    %462 = arith.addf %456, %461 : vector<16x16xf32>
    %c67 = arith.constant 67 : index
    %463 = memref.load %arg4[%c67] : memref<98xf32, #tpu.memory_space<smem>>
    %c4_244 = arith.constant 4 : index
    %c2_245 = arith.constant 2 : index
    %c0_246 = arith.constant 0 : index
    %464 = vector.load %arg7[%c4_244, %c2_245, %c0_246] : memref<7x22x16xf32, #tpu.memory_space<vmem>>, vector<1x16x16xf32>
    %465 = vector.shape_cast %464 : vector<1x16x16xf32> to vector<16x16xf32>
    %466 = vector.broadcast %463 : f32 to vector<16x16xf32>
    %467 = arith.mulf %466, %465 : vector<16x16xf32>
    %468 = arith.addf %462, %467 : vector<16x16xf32>
    %c19 = arith.constant 19 : index
    %469 = memref.load %arg4[%c19] : memref<98xf32, #tpu.memory_space<smem>>
    %c5_247 = arith.constant 5 : index
    %c2_248 = arith.constant 2 : index
    %c0_249 = arith.constant 0 : index
    %470 = vector.load %arg6[%c5_247, %c2_248, %c0_249] : memref<7x22x16xf32, #tpu.memory_space<vmem>>, vector<1x16x16xf32>
    %471 = vector.shape_cast %470 : vector<1x16x16xf32> to vector<16x16xf32>
    %472 = vector.broadcast %469 : f32 to vector<16x16xf32>
    %473 = arith.mulf %472, %471 : vector<16x16xf32>
    %474 = arith.addf %468, %473 : vector<16x16xf32>
    %c68 = arith.constant 68 : index
    %475 = memref.load %arg4[%c68] : memref<98xf32, #tpu.memory_space<smem>>
    %c5_250 = arith.constant 5 : index
    %c2_251 = arith.constant 2 : index
    %c0_252 = arith.constant 0 : index
    %476 = vector.load %arg7[%c5_250, %c2_251, %c0_252] : memref<7x22x16xf32, #tpu.memory_space<vmem>>, vector<1x16x16xf32>
    %477 = vector.shape_cast %476 : vector<1x16x16xf32> to vector<16x16xf32>
    %478 = vector.broadcast %475 : f32 to vector<16x16xf32>
    %479 = arith.mulf %478, %477 : vector<16x16xf32>
    %480 = arith.addf %474, %479 : vector<16x16xf32>
    %c20 = arith.constant 20 : index
    %481 = memref.load %arg4[%c20] : memref<98xf32, #tpu.memory_space<smem>>
    %c6_253 = arith.constant 6 : index
    %c2_254 = arith.constant 2 : index
    %c0_255 = arith.constant 0 : index
    %482 = vector.load %arg6[%c6_253, %c2_254, %c0_255] : memref<7x22x16xf32, #tpu.memory_space<vmem>>, vector<1x16x16xf32>
    %483 = vector.shape_cast %482 : vector<1x16x16xf32> to vector<16x16xf32>
    %484 = vector.broadcast %481 : f32 to vector<16x16xf32>
    %485 = arith.mulf %484, %483 : vector<16x16xf32>
    %486 = arith.addf %480, %485 : vector<16x16xf32>
    %c69 = arith.constant 69 : index
    %487 = memref.load %arg4[%c69] : memref<98xf32, #tpu.memory_space<smem>>
    %c6_256 = arith.constant 6 : index
    %c2_257 = arith.constant 2 : index
    %c0_258 = arith.constant 0 : index
    %488 = vector.load %arg7[%c6_256, %c2_257, %c0_258] : memref<7x22x16xf32, #tpu.memory_space<vmem>>, vector<1x16x16xf32>
    %489 = vector.shape_cast %488 : vector<1x16x16xf32> to vector<16x16xf32>
    %490 = vector.broadcast %487 : f32 to vector<16x16xf32>
    %491 = arith.mulf %490, %489 : vector<16x16xf32>
    %492 = arith.addf %486, %491 : vector<16x16xf32>
    %c21 = arith.constant 21 : index
    %493 = memref.load %arg4[%c21] : memref<98xf32, #tpu.memory_space<smem>>
    %c0_259 = arith.constant 0 : index
    %c3_260 = arith.constant 3 : index
    %c0_261 = arith.constant 0 : index
    %494 = vector.load %arg6[%c0_259, %c3_260, %c0_261] : memref<7x22x16xf32, #tpu.memory_space<vmem>>, vector<1x16x16xf32>
    %495 = vector.shape_cast %494 : vector<1x16x16xf32> to vector<16x16xf32>
    %496 = vector.broadcast %493 : f32 to vector<16x16xf32>
    %497 = arith.mulf %496, %495 : vector<16x16xf32>
    %498 = arith.addf %492, %497 : vector<16x16xf32>
    %c70 = arith.constant 70 : index
    %499 = memref.load %arg4[%c70] : memref<98xf32, #tpu.memory_space<smem>>
    %c0_262 = arith.constant 0 : index
    %c3_263 = arith.constant 3 : index
    %c0_264 = arith.constant 0 : index
    %500 = vector.load %arg7[%c0_262, %c3_263, %c0_264] : memref<7x22x16xf32, #tpu.memory_space<vmem>>, vector<1x16x16xf32>
    %501 = vector.shape_cast %500 : vector<1x16x16xf32> to vector<16x16xf32>
    %502 = vector.broadcast %499 : f32 to vector<16x16xf32>
    %503 = arith.mulf %502, %501 : vector<16x16xf32>
    %504 = arith.addf %498, %503 : vector<16x16xf32>
    %c22 = arith.constant 22 : index
    %505 = memref.load %arg4[%c22] : memref<98xf32, #tpu.memory_space<smem>>
    %c1_265 = arith.constant 1 : index
    %c3_266 = arith.constant 3 : index
    %c0_267 = arith.constant 0 : index
    %506 = vector.load %arg6[%c1_265, %c3_266, %c0_267] : memref<7x22x16xf32, #tpu.memory_space<vmem>>, vector<1x16x16xf32>
    %507 = vector.shape_cast %506 : vector<1x16x16xf32> to vector<16x16xf32>
    %508 = vector.broadcast %505 : f32 to vector<16x16xf32>
    %509 = arith.mulf %508, %507 : vector<16x16xf32>
    %510 = arith.addf %504, %509 : vector<16x16xf32>
    %c71 = arith.constant 71 : index
    %511 = memref.load %arg4[%c71] : memref<98xf32, #tpu.memory_space<smem>>
    %c1_268 = arith.constant 1 : index
    %c3_269 = arith.constant 3 : index
    %c0_270 = arith.constant 0 : index
    %512 = vector.load %arg7[%c1_268, %c3_269, %c0_270] : memref<7x22x16xf32, #tpu.memory_space<vmem>>, vector<1x16x16xf32>
    %513 = vector.shape_cast %512 : vector<1x16x16xf32> to vector<16x16xf32>
    %514 = vector.broadcast %511 : f32 to vector<16x16xf32>
    %515 = arith.mulf %514, %513 : vector<16x16xf32>
    %516 = arith.addf %510, %515 : vector<16x16xf32>
    %c23 = arith.constant 23 : index
    %517 = memref.load %arg4[%c23] : memref<98xf32, #tpu.memory_space<smem>>
    %c2_271 = arith.constant 2 : index
    %c3_272 = arith.constant 3 : index
    %c0_273 = arith.constant 0 : index
    %518 = vector.load %arg6[%c2_271, %c3_272, %c0_273] : memref<7x22x16xf32, #tpu.memory_space<vmem>>, vector<1x16x16xf32>
    %519 = vector.shape_cast %518 : vector<1x16x16xf32> to vector<16x16xf32>
    %520 = vector.broadcast %517 : f32 to vector<16x16xf32>
    %521 = arith.mulf %520, %519 : vector<16x16xf32>
    %522 = arith.addf %516, %521 : vector<16x16xf32>
    %c72 = arith.constant 72 : index
    %523 = memref.load %arg4[%c72] : memref<98xf32, #tpu.memory_space<smem>>
    %c2_274 = arith.constant 2 : index
    %c3_275 = arith.constant 3 : index
    %c0_276 = arith.constant 0 : index
    %524 = vector.load %arg7[%c2_274, %c3_275, %c0_276] : memref<7x22x16xf32, #tpu.memory_space<vmem>>, vector<1x16x16xf32>
    %525 = vector.shape_cast %524 : vector<1x16x16xf32> to vector<16x16xf32>
    %526 = vector.broadcast %523 : f32 to vector<16x16xf32>
    %527 = arith.mulf %526, %525 : vector<16x16xf32>
    %528 = arith.addf %522, %527 : vector<16x16xf32>
    %c24 = arith.constant 24 : index
    %529 = memref.load %arg4[%c24] : memref<98xf32, #tpu.memory_space<smem>>
    %c3_277 = arith.constant 3 : index
    %c3_278 = arith.constant 3 : index
    %c0_279 = arith.constant 0 : index
    %530 = vector.load %arg6[%c3_277, %c3_278, %c0_279] : memref<7x22x16xf32, #tpu.memory_space<vmem>>, vector<1x16x16xf32>
    %531 = vector.shape_cast %530 : vector<1x16x16xf32> to vector<16x16xf32>
    %532 = vector.broadcast %529 : f32 to vector<16x16xf32>
    %533 = arith.mulf %532, %531 : vector<16x16xf32>
    %534 = arith.addf %528, %533 : vector<16x16xf32>
    %c73 = arith.constant 73 : index
    %535 = memref.load %arg4[%c73] : memref<98xf32, #tpu.memory_space<smem>>
    %c3_280 = arith.constant 3 : index
    %c3_281 = arith.constant 3 : index
    %c0_282 = arith.constant 0 : index
    %536 = vector.load %arg7[%c3_280, %c3_281, %c0_282] : memref<7x22x16xf32, #tpu.memory_space<vmem>>, vector<1x16x16xf32>
    %537 = vector.shape_cast %536 : vector<1x16x16xf32> to vector<16x16xf32>
    %538 = vector.broadcast %535 : f32 to vector<16x16xf32>
    %539 = arith.mulf %538, %537 : vector<16x16xf32>
    %540 = arith.addf %534, %539 : vector<16x16xf32>
    %c25 = arith.constant 25 : index
    %541 = memref.load %arg4[%c25] : memref<98xf32, #tpu.memory_space<smem>>
    %c4_283 = arith.constant 4 : index
    %c3_284 = arith.constant 3 : index
    %c0_285 = arith.constant 0 : index
    %542 = vector.load %arg6[%c4_283, %c3_284, %c0_285] : memref<7x22x16xf32, #tpu.memory_space<vmem>>, vector<1x16x16xf32>
    %543 = vector.shape_cast %542 : vector<1x16x16xf32> to vector<16x16xf32>
    %544 = vector.broadcast %541 : f32 to vector<16x16xf32>
    %545 = arith.mulf %544, %543 : vector<16x16xf32>
    %546 = arith.addf %540, %545 : vector<16x16xf32>
    %c74 = arith.constant 74 : index
    %547 = memref.load %arg4[%c74] : memref<98xf32, #tpu.memory_space<smem>>
    %c4_286 = arith.constant 4 : index
    %c3_287 = arith.constant 3 : index
    %c0_288 = arith.constant 0 : index
    %548 = vector.load %arg7[%c4_286, %c3_287, %c0_288] : memref<7x22x16xf32, #tpu.memory_space<vmem>>, vector<1x16x16xf32>
    %549 = vector.shape_cast %548 : vector<1x16x16xf32> to vector<16x16xf32>
    %550 = vector.broadcast %547 : f32 to vector<16x16xf32>
    %551 = arith.mulf %550, %549 : vector<16x16xf32>
    %552 = arith.addf %546, %551 : vector<16x16xf32>
    %c26 = arith.constant 26 : index
    %553 = memref.load %arg4[%c26] : memref<98xf32, #tpu.memory_space<smem>>
    %c5_289 = arith.constant 5 : index
    %c3_290 = arith.constant 3 : index
    %c0_291 = arith.constant 0 : index
    %554 = vector.load %arg6[%c5_289, %c3_290, %c0_291] : memref<7x22x16xf32, #tpu.memory_space<vmem>>, vector<1x16x16xf32>
    %555 = vector.shape_cast %554 : vector<1x16x16xf32> to vector<16x16xf32>
    %556 = vector.broadcast %553 : f32 to vector<16x16xf32>
    %557 = arith.mulf %556, %555 : vector<16x16xf32>
    %558 = arith.addf %552, %557 : vector<16x16xf32>
    %c75 = arith.constant 75 : index
    %559 = memref.load %arg4[%c75] : memref<98xf32, #tpu.memory_space<smem>>
    %c5_292 = arith.constant 5 : index
    %c3_293 = arith.constant 3 : index
    %c0_294 = arith.constant 0 : index
    %560 = vector.load %arg7[%c5_292, %c3_293, %c0_294] : memref<7x22x16xf32, #tpu.memory_space<vmem>>, vector<1x16x16xf32>
    %561 = vector.shape_cast %560 : vector<1x16x16xf32> to vector<16x16xf32>
    %562 = vector.broadcast %559 : f32 to vector<16x16xf32>
    %563 = arith.mulf %562, %561 : vector<16x16xf32>
    %564 = arith.addf %558, %563 : vector<16x16xf32>
    %c27 = arith.constant 27 : index
    %565 = memref.load %arg4[%c27] : memref<98xf32, #tpu.memory_space<smem>>
    %c6_295 = arith.constant 6 : index
    %c3_296 = arith.constant 3 : index
    %c0_297 = arith.constant 0 : index
    %566 = vector.load %arg6[%c6_295, %c3_296, %c0_297] : memref<7x22x16xf32, #tpu.memory_space<vmem>>, vector<1x16x16xf32>
    %567 = vector.shape_cast %566 : vector<1x16x16xf32> to vector<16x16xf32>
    %568 = vector.broadcast %565 : f32 to vector<16x16xf32>
    %569 = arith.mulf %568, %567 : vector<16x16xf32>
    %570 = arith.addf %564, %569 : vector<16x16xf32>
    %c76 = arith.constant 76 : index
    %571 = memref.load %arg4[%c76] : memref<98xf32, #tpu.memory_space<smem>>
    %c6_298 = arith.constant 6 : index
    %c3_299 = arith.constant 3 : index
    %c0_300 = arith.constant 0 : index
    %572 = vector.load %arg7[%c6_298, %c3_299, %c0_300] : memref<7x22x16xf32, #tpu.memory_space<vmem>>, vector<1x16x16xf32>
    %573 = vector.shape_cast %572 : vector<1x16x16xf32> to vector<16x16xf32>
    %574 = vector.broadcast %571 : f32 to vector<16x16xf32>
    %575 = arith.mulf %574, %573 : vector<16x16xf32>
    %576 = arith.addf %570, %575 : vector<16x16xf32>
    %c28 = arith.constant 28 : index
    %577 = memref.load %arg4[%c28] : memref<98xf32, #tpu.memory_space<smem>>
    %c0_301 = arith.constant 0 : index
    %c4_302 = arith.constant 4 : index
    %c0_303 = arith.constant 0 : index
    %578 = vector.load %arg6[%c0_301, %c4_302, %c0_303] : memref<7x22x16xf32, #tpu.memory_space<vmem>>, vector<1x16x16xf32>
    %579 = vector.shape_cast %578 : vector<1x16x16xf32> to vector<16x16xf32>
    %580 = vector.broadcast %577 : f32 to vector<16x16xf32>
    %581 = arith.mulf %580, %579 : vector<16x16xf32>
    %582 = arith.addf %576, %581 : vector<16x16xf32>
    %c77 = arith.constant 77 : index
    %583 = memref.load %arg4[%c77] : memref<98xf32, #tpu.memory_space<smem>>
    %c0_304 = arith.constant 0 : index
    %c4_305 = arith.constant 4 : index
    %c0_306 = arith.constant 0 : index
    %584 = vector.load %arg7[%c0_304, %c4_305, %c0_306] : memref<7x22x16xf32, #tpu.memory_space<vmem>>, vector<1x16x16xf32>
    %585 = vector.shape_cast %584 : vector<1x16x16xf32> to vector<16x16xf32>
    %586 = vector.broadcast %583 : f32 to vector<16x16xf32>
    %587 = arith.mulf %586, %585 : vector<16x16xf32>
    %588 = arith.addf %582, %587 : vector<16x16xf32>
    %c29 = arith.constant 29 : index
    %589 = memref.load %arg4[%c29] : memref<98xf32, #tpu.memory_space<smem>>
    %c1_307 = arith.constant 1 : index
    %c4_308 = arith.constant 4 : index
    %c0_309 = arith.constant 0 : index
    %590 = vector.load %arg6[%c1_307, %c4_308, %c0_309] : memref<7x22x16xf32, #tpu.memory_space<vmem>>, vector<1x16x16xf32>
    %591 = vector.shape_cast %590 : vector<1x16x16xf32> to vector<16x16xf32>
    %592 = vector.broadcast %589 : f32 to vector<16x16xf32>
    %593 = arith.mulf %592, %591 : vector<16x16xf32>
    %594 = arith.addf %588, %593 : vector<16x16xf32>
    %c78 = arith.constant 78 : index
    %595 = memref.load %arg4[%c78] : memref<98xf32, #tpu.memory_space<smem>>
    %c1_310 = arith.constant 1 : index
    %c4_311 = arith.constant 4 : index
    %c0_312 = arith.constant 0 : index
    %596 = vector.load %arg7[%c1_310, %c4_311, %c0_312] : memref<7x22x16xf32, #tpu.memory_space<vmem>>, vector<1x16x16xf32>
    %597 = vector.shape_cast %596 : vector<1x16x16xf32> to vector<16x16xf32>
    %598 = vector.broadcast %595 : f32 to vector<16x16xf32>
    %599 = arith.mulf %598, %597 : vector<16x16xf32>
    %600 = arith.addf %594, %599 : vector<16x16xf32>
    %c30 = arith.constant 30 : index
    %601 = memref.load %arg4[%c30] : memref<98xf32, #tpu.memory_space<smem>>
    %c2_313 = arith.constant 2 : index
    %c4_314 = arith.constant 4 : index
    %c0_315 = arith.constant 0 : index
    %602 = vector.load %arg6[%c2_313, %c4_314, %c0_315] : memref<7x22x16xf32, #tpu.memory_space<vmem>>, vector<1x16x16xf32>
    %603 = vector.shape_cast %602 : vector<1x16x16xf32> to vector<16x16xf32>
    %604 = vector.broadcast %601 : f32 to vector<16x16xf32>
    %605 = arith.mulf %604, %603 : vector<16x16xf32>
    %606 = arith.addf %600, %605 : vector<16x16xf32>
    %c79 = arith.constant 79 : index
    %607 = memref.load %arg4[%c79] : memref<98xf32, #tpu.memory_space<smem>>
    %c2_316 = arith.constant 2 : index
    %c4_317 = arith.constant 4 : index
    %c0_318 = arith.constant 0 : index
    %608 = vector.load %arg7[%c2_316, %c4_317, %c0_318] : memref<7x22x16xf32, #tpu.memory_space<vmem>>, vector<1x16x16xf32>
    %609 = vector.shape_cast %608 : vector<1x16x16xf32> to vector<16x16xf32>
    %610 = vector.broadcast %607 : f32 to vector<16x16xf32>
    %611 = arith.mulf %610, %609 : vector<16x16xf32>
    %612 = arith.addf %606, %611 : vector<16x16xf32>
    %c31 = arith.constant 31 : index
    %613 = memref.load %arg4[%c31] : memref<98xf32, #tpu.memory_space<smem>>
    %c3_319 = arith.constant 3 : index
    %c4_320 = arith.constant 4 : index
    %c0_321 = arith.constant 0 : index
    %614 = vector.load %arg6[%c3_319, %c4_320, %c0_321] : memref<7x22x16xf32, #tpu.memory_space<vmem>>, vector<1x16x16xf32>
    %615 = vector.shape_cast %614 : vector<1x16x16xf32> to vector<16x16xf32>
    %616 = vector.broadcast %613 : f32 to vector<16x16xf32>
    %617 = arith.mulf %616, %615 : vector<16x16xf32>
    %618 = arith.addf %612, %617 : vector<16x16xf32>
    %c80 = arith.constant 80 : index
    %619 = memref.load %arg4[%c80] : memref<98xf32, #tpu.memory_space<smem>>
    %c3_322 = arith.constant 3 : index
    %c4_323 = arith.constant 4 : index
    %c0_324 = arith.constant 0 : index
    %620 = vector.load %arg7[%c3_322, %c4_323, %c0_324] : memref<7x22x16xf32, #tpu.memory_space<vmem>>, vector<1x16x16xf32>
    %621 = vector.shape_cast %620 : vector<1x16x16xf32> to vector<16x16xf32>
    %622 = vector.broadcast %619 : f32 to vector<16x16xf32>
    %623 = arith.mulf %622, %621 : vector<16x16xf32>
    %624 = arith.addf %618, %623 : vector<16x16xf32>
    %c32 = arith.constant 32 : index
    %625 = memref.load %arg4[%c32] : memref<98xf32, #tpu.memory_space<smem>>
    %c4_325 = arith.constant 4 : index
    %c4_326 = arith.constant 4 : index
    %c0_327 = arith.constant 0 : index
    %626 = vector.load %arg6[%c4_325, %c4_326, %c0_327] : memref<7x22x16xf32, #tpu.memory_space<vmem>>, vector<1x16x16xf32>
    %627 = vector.shape_cast %626 : vector<1x16x16xf32> to vector<16x16xf32>
    %628 = vector.broadcast %625 : f32 to vector<16x16xf32>
    %629 = arith.mulf %628, %627 : vector<16x16xf32>
    %630 = arith.addf %624, %629 : vector<16x16xf32>
    %c81 = arith.constant 81 : index
    %631 = memref.load %arg4[%c81] : memref<98xf32, #tpu.memory_space<smem>>
    %c4_328 = arith.constant 4 : index
    %c4_329 = arith.constant 4 : index
    %c0_330 = arith.constant 0 : index
    %632 = vector.load %arg7[%c4_328, %c4_329, %c0_330] : memref<7x22x16xf32, #tpu.memory_space<vmem>>, vector<1x16x16xf32>
    %633 = vector.shape_cast %632 : vector<1x16x16xf32> to vector<16x16xf32>
    %634 = vector.broadcast %631 : f32 to vector<16x16xf32>
    %635 = arith.mulf %634, %633 : vector<16x16xf32>
    %636 = arith.addf %630, %635 : vector<16x16xf32>
    %c33 = arith.constant 33 : index
    %637 = memref.load %arg4[%c33] : memref<98xf32, #tpu.memory_space<smem>>
    %c5_331 = arith.constant 5 : index
    %c4_332 = arith.constant 4 : index
    %c0_333 = arith.constant 0 : index
    %638 = vector.load %arg6[%c5_331, %c4_332, %c0_333] : memref<7x22x16xf32, #tpu.memory_space<vmem>>, vector<1x16x16xf32>
    %639 = vector.shape_cast %638 : vector<1x16x16xf32> to vector<16x16xf32>
    %640 = vector.broadcast %637 : f32 to vector<16x16xf32>
    %641 = arith.mulf %640, %639 : vector<16x16xf32>
    %642 = arith.addf %636, %641 : vector<16x16xf32>
    %c82 = arith.constant 82 : index
    %643 = memref.load %arg4[%c82] : memref<98xf32, #tpu.memory_space<smem>>
    %c5_334 = arith.constant 5 : index
    %c4_335 = arith.constant 4 : index
    %c0_336 = arith.constant 0 : index
    %644 = vector.load %arg7[%c5_334, %c4_335, %c0_336] : memref<7x22x16xf32, #tpu.memory_space<vmem>>, vector<1x16x16xf32>
    %645 = vector.shape_cast %644 : vector<1x16x16xf32> to vector<16x16xf32>
    %646 = vector.broadcast %643 : f32 to vector<16x16xf32>
    %647 = arith.mulf %646, %645 : vector<16x16xf32>
    %648 = arith.addf %642, %647 : vector<16x16xf32>
    %c34 = arith.constant 34 : index
    %649 = memref.load %arg4[%c34] : memref<98xf32, #tpu.memory_space<smem>>
    %c6_337 = arith.constant 6 : index
    %c4_338 = arith.constant 4 : index
    %c0_339 = arith.constant 0 : index
    %650 = vector.load %arg6[%c6_337, %c4_338, %c0_339] : memref<7x22x16xf32, #tpu.memory_space<vmem>>, vector<1x16x16xf32>
    %651 = vector.shape_cast %650 : vector<1x16x16xf32> to vector<16x16xf32>
    %652 = vector.broadcast %649 : f32 to vector<16x16xf32>
    %653 = arith.mulf %652, %651 : vector<16x16xf32>
    %654 = arith.addf %648, %653 : vector<16x16xf32>
    %c83 = arith.constant 83 : index
    %655 = memref.load %arg4[%c83] : memref<98xf32, #tpu.memory_space<smem>>
    %c6_340 = arith.constant 6 : index
    %c4_341 = arith.constant 4 : index
    %c0_342 = arith.constant 0 : index
    %656 = vector.load %arg7[%c6_340, %c4_341, %c0_342] : memref<7x22x16xf32, #tpu.memory_space<vmem>>, vector<1x16x16xf32>
    %657 = vector.shape_cast %656 : vector<1x16x16xf32> to vector<16x16xf32>
    %658 = vector.broadcast %655 : f32 to vector<16x16xf32>
    %659 = arith.mulf %658, %657 : vector<16x16xf32>
    %660 = arith.addf %654, %659 : vector<16x16xf32>
    %c35 = arith.constant 35 : index
    %661 = memref.load %arg4[%c35] : memref<98xf32, #tpu.memory_space<smem>>
    %c0_343 = arith.constant 0 : index
    %c5_344 = arith.constant 5 : index
    %c0_345 = arith.constant 0 : index
    %662 = vector.load %arg6[%c0_343, %c5_344, %c0_345] : memref<7x22x16xf32, #tpu.memory_space<vmem>>, vector<1x16x16xf32>
    %663 = vector.shape_cast %662 : vector<1x16x16xf32> to vector<16x16xf32>
    %664 = vector.broadcast %661 : f32 to vector<16x16xf32>
    %665 = arith.mulf %664, %663 : vector<16x16xf32>
    %666 = arith.addf %660, %665 : vector<16x16xf32>
    %c84 = arith.constant 84 : index
    %667 = memref.load %arg4[%c84] : memref<98xf32, #tpu.memory_space<smem>>
    %c0_346 = arith.constant 0 : index
    %c5_347 = arith.constant 5 : index
    %c0_348 = arith.constant 0 : index
    %668 = vector.load %arg7[%c0_346, %c5_347, %c0_348] : memref<7x22x16xf32, #tpu.memory_space<vmem>>, vector<1x16x16xf32>
    %669 = vector.shape_cast %668 : vector<1x16x16xf32> to vector<16x16xf32>
    %670 = vector.broadcast %667 : f32 to vector<16x16xf32>
    %671 = arith.mulf %670, %669 : vector<16x16xf32>
    %672 = arith.addf %666, %671 : vector<16x16xf32>
    %c36 = arith.constant 36 : index
    %673 = memref.load %arg4[%c36] : memref<98xf32, #tpu.memory_space<smem>>
    %c1_349 = arith.constant 1 : index
    %c5_350 = arith.constant 5 : index
    %c0_351 = arith.constant 0 : index
    %674 = vector.load %arg6[%c1_349, %c5_350, %c0_351] : memref<7x22x16xf32, #tpu.memory_space<vmem>>, vector<1x16x16xf32>
    %675 = vector.shape_cast %674 : vector<1x16x16xf32> to vector<16x16xf32>
    %676 = vector.broadcast %673 : f32 to vector<16x16xf32>
    %677 = arith.mulf %676, %675 : vector<16x16xf32>
    %678 = arith.addf %672, %677 : vector<16x16xf32>
    %c85 = arith.constant 85 : index
    %679 = memref.load %arg4[%c85] : memref<98xf32, #tpu.memory_space<smem>>
    %c1_352 = arith.constant 1 : index
    %c5_353 = arith.constant 5 : index
    %c0_354 = arith.constant 0 : index
    %680 = vector.load %arg7[%c1_352, %c5_353, %c0_354] : memref<7x22x16xf32, #tpu.memory_space<vmem>>, vector<1x16x16xf32>
    %681 = vector.shape_cast %680 : vector<1x16x16xf32> to vector<16x16xf32>
    %682 = vector.broadcast %679 : f32 to vector<16x16xf32>
    %683 = arith.mulf %682, %681 : vector<16x16xf32>
    %684 = arith.addf %678, %683 : vector<16x16xf32>
    %c37 = arith.constant 37 : index
    %685 = memref.load %arg4[%c37] : memref<98xf32, #tpu.memory_space<smem>>
    %c2_355 = arith.constant 2 : index
    %c5_356 = arith.constant 5 : index
    %c0_357 = arith.constant 0 : index
    %686 = vector.load %arg6[%c2_355, %c5_356, %c0_357] : memref<7x22x16xf32, #tpu.memory_space<vmem>>, vector<1x16x16xf32>
    %687 = vector.shape_cast %686 : vector<1x16x16xf32> to vector<16x16xf32>
    %688 = vector.broadcast %685 : f32 to vector<16x16xf32>
    %689 = arith.mulf %688, %687 : vector<16x16xf32>
    %690 = arith.addf %684, %689 : vector<16x16xf32>
    %c86 = arith.constant 86 : index
    %691 = memref.load %arg4[%c86] : memref<98xf32, #tpu.memory_space<smem>>
    %c2_358 = arith.constant 2 : index
    %c5_359 = arith.constant 5 : index
    %c0_360 = arith.constant 0 : index
    %692 = vector.load %arg7[%c2_358, %c5_359, %c0_360] : memref<7x22x16xf32, #tpu.memory_space<vmem>>, vector<1x16x16xf32>
    %693 = vector.shape_cast %692 : vector<1x16x16xf32> to vector<16x16xf32>
    %694 = vector.broadcast %691 : f32 to vector<16x16xf32>
    %695 = arith.mulf %694, %693 : vector<16x16xf32>
    %696 = arith.addf %690, %695 : vector<16x16xf32>
    %c38 = arith.constant 38 : index
    %697 = memref.load %arg4[%c38] : memref<98xf32, #tpu.memory_space<smem>>
    %c3_361 = arith.constant 3 : index
    %c5_362 = arith.constant 5 : index
    %c0_363 = arith.constant 0 : index
    %698 = vector.load %arg6[%c3_361, %c5_362, %c0_363] : memref<7x22x16xf32, #tpu.memory_space<vmem>>, vector<1x16x16xf32>
    %699 = vector.shape_cast %698 : vector<1x16x16xf32> to vector<16x16xf32>
    %700 = vector.broadcast %697 : f32 to vector<16x16xf32>
    %701 = arith.mulf %700, %699 : vector<16x16xf32>
    %702 = arith.addf %696, %701 : vector<16x16xf32>
    %c87 = arith.constant 87 : index
    %703 = memref.load %arg4[%c87] : memref<98xf32, #tpu.memory_space<smem>>
    %c3_364 = arith.constant 3 : index
    %c5_365 = arith.constant 5 : index
    %c0_366 = arith.constant 0 : index
    %704 = vector.load %arg7[%c3_364, %c5_365, %c0_366] : memref<7x22x16xf32, #tpu.memory_space<vmem>>, vector<1x16x16xf32>
    %705 = vector.shape_cast %704 : vector<1x16x16xf32> to vector<16x16xf32>
    %706 = vector.broadcast %703 : f32 to vector<16x16xf32>
    %707 = arith.mulf %706, %705 : vector<16x16xf32>
    %708 = arith.addf %702, %707 : vector<16x16xf32>
    %c39 = arith.constant 39 : index
    %709 = memref.load %arg4[%c39] : memref<98xf32, #tpu.memory_space<smem>>
    %c4_367 = arith.constant 4 : index
    %c5_368 = arith.constant 5 : index
    %c0_369 = arith.constant 0 : index
    %710 = vector.load %arg6[%c4_367, %c5_368, %c0_369] : memref<7x22x16xf32, #tpu.memory_space<vmem>>, vector<1x16x16xf32>
    %711 = vector.shape_cast %710 : vector<1x16x16xf32> to vector<16x16xf32>
    %712 = vector.broadcast %709 : f32 to vector<16x16xf32>
    %713 = arith.mulf %712, %711 : vector<16x16xf32>
    %714 = arith.addf %708, %713 : vector<16x16xf32>
    %c88 = arith.constant 88 : index
    %715 = memref.load %arg4[%c88] : memref<98xf32, #tpu.memory_space<smem>>
    %c4_370 = arith.constant 4 : index
    %c5_371 = arith.constant 5 : index
    %c0_372 = arith.constant 0 : index
    %716 = vector.load %arg7[%c4_370, %c5_371, %c0_372] : memref<7x22x16xf32, #tpu.memory_space<vmem>>, vector<1x16x16xf32>
    %717 = vector.shape_cast %716 : vector<1x16x16xf32> to vector<16x16xf32>
    %718 = vector.broadcast %715 : f32 to vector<16x16xf32>
    %719 = arith.mulf %718, %717 : vector<16x16xf32>
    %720 = arith.addf %714, %719 : vector<16x16xf32>
    %c40 = arith.constant 40 : index
    %721 = memref.load %arg4[%c40] : memref<98xf32, #tpu.memory_space<smem>>
    %c5_373 = arith.constant 5 : index
    %c5_374 = arith.constant 5 : index
    %c0_375 = arith.constant 0 : index
    %722 = vector.load %arg6[%c5_373, %c5_374, %c0_375] : memref<7x22x16xf32, #tpu.memory_space<vmem>>, vector<1x16x16xf32>
    %723 = vector.shape_cast %722 : vector<1x16x16xf32> to vector<16x16xf32>
    %724 = vector.broadcast %721 : f32 to vector<16x16xf32>
    %725 = arith.mulf %724, %723 : vector<16x16xf32>
    %726 = arith.addf %720, %725 : vector<16x16xf32>
    %c89 = arith.constant 89 : index
    %727 = memref.load %arg4[%c89] : memref<98xf32, #tpu.memory_space<smem>>
    %c5_376 = arith.constant 5 : index
    %c5_377 = arith.constant 5 : index
    %c0_378 = arith.constant 0 : index
    %728 = vector.load %arg7[%c5_376, %c5_377, %c0_378] : memref<7x22x16xf32, #tpu.memory_space<vmem>>, vector<1x16x16xf32>
    %729 = vector.shape_cast %728 : vector<1x16x16xf32> to vector<16x16xf32>
    %730 = vector.broadcast %727 : f32 to vector<16x16xf32>
    %731 = arith.mulf %730, %729 : vector<16x16xf32>
    %732 = arith.addf %726, %731 : vector<16x16xf32>
    %c41 = arith.constant 41 : index
    %733 = memref.load %arg4[%c41] : memref<98xf32, #tpu.memory_space<smem>>
    %c6_379 = arith.constant 6 : index
    %c5_380 = arith.constant 5 : index
    %c0_381 = arith.constant 0 : index
    %734 = vector.load %arg6[%c6_379, %c5_380, %c0_381] : memref<7x22x16xf32, #tpu.memory_space<vmem>>, vector<1x16x16xf32>
    %735 = vector.shape_cast %734 : vector<1x16x16xf32> to vector<16x16xf32>
    %736 = vector.broadcast %733 : f32 to vector<16x16xf32>
    %737 = arith.mulf %736, %735 : vector<16x16xf32>
    %738 = arith.addf %732, %737 : vector<16x16xf32>
    %c90 = arith.constant 90 : index
    %739 = memref.load %arg4[%c90] : memref<98xf32, #tpu.memory_space<smem>>
    %c6_382 = arith.constant 6 : index
    %c5_383 = arith.constant 5 : index
    %c0_384 = arith.constant 0 : index
    %740 = vector.load %arg7[%c6_382, %c5_383, %c0_384] : memref<7x22x16xf32, #tpu.memory_space<vmem>>, vector<1x16x16xf32>
    %741 = vector.shape_cast %740 : vector<1x16x16xf32> to vector<16x16xf32>
    %742 = vector.broadcast %739 : f32 to vector<16x16xf32>
    %743 = arith.mulf %742, %741 : vector<16x16xf32>
    %744 = arith.addf %738, %743 : vector<16x16xf32>
    %c42 = arith.constant 42 : index
    %745 = memref.load %arg4[%c42] : memref<98xf32, #tpu.memory_space<smem>>
    %c0_385 = arith.constant 0 : index
    %c6_386 = arith.constant 6 : index
    %c0_387 = arith.constant 0 : index
    %746 = vector.load %arg6[%c0_385, %c6_386, %c0_387] : memref<7x22x16xf32, #tpu.memory_space<vmem>>, vector<1x16x16xf32>
    %747 = vector.shape_cast %746 : vector<1x16x16xf32> to vector<16x16xf32>
    %748 = vector.broadcast %745 : f32 to vector<16x16xf32>
    %749 = arith.mulf %748, %747 : vector<16x16xf32>
    %750 = arith.addf %744, %749 : vector<16x16xf32>
    %c91 = arith.constant 91 : index
    %751 = memref.load %arg4[%c91] : memref<98xf32, #tpu.memory_space<smem>>
    %c0_388 = arith.constant 0 : index
    %c6_389 = arith.constant 6 : index
    %c0_390 = arith.constant 0 : index
    %752 = vector.load %arg7[%c0_388, %c6_389, %c0_390] : memref<7x22x16xf32, #tpu.memory_space<vmem>>, vector<1x16x16xf32>
    %753 = vector.shape_cast %752 : vector<1x16x16xf32> to vector<16x16xf32>
    %754 = vector.broadcast %751 : f32 to vector<16x16xf32>
    %755 = arith.mulf %754, %753 : vector<16x16xf32>
    %756 = arith.addf %750, %755 : vector<16x16xf32>
    %c43 = arith.constant 43 : index
    %757 = memref.load %arg4[%c43] : memref<98xf32, #tpu.memory_space<smem>>
    %c1_391 = arith.constant 1 : index
    %c6_392 = arith.constant 6 : index
    %c0_393 = arith.constant 0 : index
    %758 = vector.load %arg6[%c1_391, %c6_392, %c0_393] : memref<7x22x16xf32, #tpu.memory_space<vmem>>, vector<1x16x16xf32>
    %759 = vector.shape_cast %758 : vector<1x16x16xf32> to vector<16x16xf32>
    %760 = vector.broadcast %757 : f32 to vector<16x16xf32>
    %761 = arith.mulf %760, %759 : vector<16x16xf32>
    %762 = arith.addf %756, %761 : vector<16x16xf32>
    %c92 = arith.constant 92 : index
    %763 = memref.load %arg4[%c92] : memref<98xf32, #tpu.memory_space<smem>>
    %c1_394 = arith.constant 1 : index
    %c6_395 = arith.constant 6 : index
    %c0_396 = arith.constant 0 : index
    %764 = vector.load %arg7[%c1_394, %c6_395, %c0_396] : memref<7x22x16xf32, #tpu.memory_space<vmem>>, vector<1x16x16xf32>
    %765 = vector.shape_cast %764 : vector<1x16x16xf32> to vector<16x16xf32>
    %766 = vector.broadcast %763 : f32 to vector<16x16xf32>
    %767 = arith.mulf %766, %765 : vector<16x16xf32>
    %768 = arith.addf %762, %767 : vector<16x16xf32>
    %c44 = arith.constant 44 : index
    %769 = memref.load %arg4[%c44] : memref<98xf32, #tpu.memory_space<smem>>
    %c2_397 = arith.constant 2 : index
    %c6_398 = arith.constant 6 : index
    %c0_399 = arith.constant 0 : index
    %770 = vector.load %arg6[%c2_397, %c6_398, %c0_399] : memref<7x22x16xf32, #tpu.memory_space<vmem>>, vector<1x16x16xf32>
    %771 = vector.shape_cast %770 : vector<1x16x16xf32> to vector<16x16xf32>
    %772 = vector.broadcast %769 : f32 to vector<16x16xf32>
    %773 = arith.mulf %772, %771 : vector<16x16xf32>
    %774 = arith.addf %768, %773 : vector<16x16xf32>
    %c93 = arith.constant 93 : index
    %775 = memref.load %arg4[%c93] : memref<98xf32, #tpu.memory_space<smem>>
    %c2_400 = arith.constant 2 : index
    %c6_401 = arith.constant 6 : index
    %c0_402 = arith.constant 0 : index
    %776 = vector.load %arg7[%c2_400, %c6_401, %c0_402] : memref<7x22x16xf32, #tpu.memory_space<vmem>>, vector<1x16x16xf32>
    %777 = vector.shape_cast %776 : vector<1x16x16xf32> to vector<16x16xf32>
    %778 = vector.broadcast %775 : f32 to vector<16x16xf32>
    %779 = arith.mulf %778, %777 : vector<16x16xf32>
    %780 = arith.addf %774, %779 : vector<16x16xf32>
    %c45 = arith.constant 45 : index
    %781 = memref.load %arg4[%c45] : memref<98xf32, #tpu.memory_space<smem>>
    %c3_403 = arith.constant 3 : index
    %c6_404 = arith.constant 6 : index
    %c0_405 = arith.constant 0 : index
    %782 = vector.load %arg6[%c3_403, %c6_404, %c0_405] : memref<7x22x16xf32, #tpu.memory_space<vmem>>, vector<1x16x16xf32>
    %783 = vector.shape_cast %782 : vector<1x16x16xf32> to vector<16x16xf32>
    %784 = vector.broadcast %781 : f32 to vector<16x16xf32>
    %785 = arith.mulf %784, %783 : vector<16x16xf32>
    %786 = arith.addf %780, %785 : vector<16x16xf32>
    %c94 = arith.constant 94 : index
    %787 = memref.load %arg4[%c94] : memref<98xf32, #tpu.memory_space<smem>>
    %c3_406 = arith.constant 3 : index
    %c6_407 = arith.constant 6 : index
    %c0_408 = arith.constant 0 : index
    %788 = vector.load %arg7[%c3_406, %c6_407, %c0_408] : memref<7x22x16xf32, #tpu.memory_space<vmem>>, vector<1x16x16xf32>
    %789 = vector.shape_cast %788 : vector<1x16x16xf32> to vector<16x16xf32>
    %790 = vector.broadcast %787 : f32 to vector<16x16xf32>
    %791 = arith.mulf %790, %789 : vector<16x16xf32>
    %792 = arith.addf %786, %791 : vector<16x16xf32>
    %c46 = arith.constant 46 : index
    %793 = memref.load %arg4[%c46] : memref<98xf32, #tpu.memory_space<smem>>
    %c4_409 = arith.constant 4 : index
    %c6_410 = arith.constant 6 : index
    %c0_411 = arith.constant 0 : index
    %794 = vector.load %arg6[%c4_409, %c6_410, %c0_411] : memref<7x22x16xf32, #tpu.memory_space<vmem>>, vector<1x16x16xf32>
    %795 = vector.shape_cast %794 : vector<1x16x16xf32> to vector<16x16xf32>
    %796 = vector.broadcast %793 : f32 to vector<16x16xf32>
    %797 = arith.mulf %796, %795 : vector<16x16xf32>
    %798 = arith.addf %792, %797 : vector<16x16xf32>
    %c95 = arith.constant 95 : index
    %799 = memref.load %arg4[%c95] : memref<98xf32, #tpu.memory_space<smem>>
    %c4_412 = arith.constant 4 : index
    %c6_413 = arith.constant 6 : index
    %c0_414 = arith.constant 0 : index
    %800 = vector.load %arg7[%c4_412, %c6_413, %c0_414] : memref<7x22x16xf32, #tpu.memory_space<vmem>>, vector<1x16x16xf32>
    %801 = vector.shape_cast %800 : vector<1x16x16xf32> to vector<16x16xf32>
    %802 = vector.broadcast %799 : f32 to vector<16x16xf32>
    %803 = arith.mulf %802, %801 : vector<16x16xf32>
    %804 = arith.addf %798, %803 : vector<16x16xf32>
    %c47 = arith.constant 47 : index
    %805 = memref.load %arg4[%c47] : memref<98xf32, #tpu.memory_space<smem>>
    %c5_415 = arith.constant 5 : index
    %c6_416 = arith.constant 6 : index
    %c0_417 = arith.constant 0 : index
    %806 = vector.load %arg6[%c5_415, %c6_416, %c0_417] : memref<7x22x16xf32, #tpu.memory_space<vmem>>, vector<1x16x16xf32>
    %807 = vector.shape_cast %806 : vector<1x16x16xf32> to vector<16x16xf32>
    %808 = vector.broadcast %805 : f32 to vector<16x16xf32>
    %809 = arith.mulf %808, %807 : vector<16x16xf32>
    %810 = arith.addf %804, %809 : vector<16x16xf32>
    %c96 = arith.constant 96 : index
    %811 = memref.load %arg4[%c96] : memref<98xf32, #tpu.memory_space<smem>>
    %c5_418 = arith.constant 5 : index
    %c6_419 = arith.constant 6 : index
    %c0_420 = arith.constant 0 : index
    %812 = vector.load %arg7[%c5_418, %c6_419, %c0_420] : memref<7x22x16xf32, #tpu.memory_space<vmem>>, vector<1x16x16xf32>
    %813 = vector.shape_cast %812 : vector<1x16x16xf32> to vector<16x16xf32>
    %814 = vector.broadcast %811 : f32 to vector<16x16xf32>
    %815 = arith.mulf %814, %813 : vector<16x16xf32>
    %816 = arith.addf %810, %815 : vector<16x16xf32>
    %c48 = arith.constant 48 : index
    %817 = memref.load %arg4[%c48] : memref<98xf32, #tpu.memory_space<smem>>
    %c6_421 = arith.constant 6 : index
    %c6_422 = arith.constant 6 : index
    %c0_423 = arith.constant 0 : index
    %818 = vector.load %arg6[%c6_421, %c6_422, %c0_423] : memref<7x22x16xf32, #tpu.memory_space<vmem>>, vector<1x16x16xf32>
    %819 = vector.shape_cast %818 : vector<1x16x16xf32> to vector<16x16xf32>
    %820 = vector.broadcast %817 : f32 to vector<16x16xf32>
    %821 = arith.mulf %820, %819 : vector<16x16xf32>
    %822 = arith.addf %816, %821 : vector<16x16xf32>
    %c97 = arith.constant 97 : index
    %823 = memref.load %arg4[%c97] : memref<98xf32, #tpu.memory_space<smem>>
    %c6_424 = arith.constant 6 : index
    %c6_425 = arith.constant 6 : index
    %c0_426 = arith.constant 0 : index
    %824 = vector.load %arg7[%c6_424, %c6_425, %c0_426] : memref<7x22x16xf32, #tpu.memory_space<vmem>>, vector<1x16x16xf32>
    %825 = vector.shape_cast %824 : vector<1x16x16xf32> to vector<16x16xf32>
    %826 = vector.broadcast %823 : f32 to vector<16x16xf32>
    %827 = arith.mulf %826, %825 : vector<16x16xf32>
    %828 = arith.addf %822, %827 : vector<16x16xf32>
    %cst_427 = arith.constant 0.000000e+00 : f32
    %829 = vector.broadcast %cst_427 : f32 to vector<16x16xf32>
    %830 = arith.subf %829, %828 : vector<16x16xf32>
    %831 = math.exp %830 : vector<16x16xf32>
    %cst_428 = arith.constant 1.000000e+00 : f32
    %832 = vector.broadcast %cst_428 : f32 to vector<16x16xf32>
    %833 = arith.addf %832, %831 : vector<16x16xf32>
    %cst_429 = arith.constant 1.000000e+00 : f32
    %834 = vector.broadcast %cst_429 : f32 to vector<16x16xf32>
    %835 = arith.divf %834, %833 : vector<16x16xf32>
    %c0_430 = arith.constant 0 : index
    %c0_431 = arith.constant 0 : index
    %c0_432 = arith.constant 0 : index
    %c0_433 = arith.constant 0 : index
    %836 = vector.load %arg1[%c0_430, %c0_431, %c0_432, %c0_433] : memref<1x16x16x128xf32, #tpu.memory_space<vmem>>, vector<1x8x16x128xf32>
    %837 = vector.shape_cast %836 : vector<1x8x16x128xf32> to vector<8x16x128xf32>
    %838 = vector.shape_cast %126 : vector<1x128xf32> to vector<1x1x128xf32>
    %839 = vector.broadcast %838 : vector<1x1x128xf32> to vector<8x16x128xf32>
    %840 = arith.mulf %837, %839 : vector<8x16x128xf32>
    %841 = vector.extract_strided_slice %835 {offsets = [0, 0], sizes = [8, 16], strides = [1, 1]} : vector<16x16xf32> to vector<8x16xf32>
    %842 = vector.shape_cast %841 : vector<8x16xf32> to vector<8x16x1xf32>
    %843 = vector.broadcast %842 : vector<8x16x1xf32> to vector<8x16x128xf32>
    %844 = arith.mulf %840, %843 : vector<8x16x128xf32>
    %c0_434 = arith.constant 0 : index
    %c0_435 = arith.constant 0 : index
    %c0_436 = arith.constant 0 : index
    %c0_437 = arith.constant 0 : index
    %845 = vector.load %arg5[%c0_434, %c0_435, %c0_436, %c0_437] : memref<1x16x16x128xf32, #tpu.memory_space<vmem>>, vector<1x8x16x128xf32>
    %846 = vector.shape_cast %845 : vector<1x8x16x128xf32> to vector<8x16x128xf32>
    %847 = vector.shape_cast %844 : vector<8x16x128xf32> to vector<1x8x16x128xf32>
    tpu.vector_store %arg5[%c0_434, %c0_435, %c0_436, %c0_437], %847 {strides = array<i32>} : memref<1x16x16x128xf32, #tpu.memory_space<vmem>>, vector<1x8x16x128xf32>,
    %c0_438 = arith.constant 0 : index
    %c8_439 = arith.constant 8 : index
    %c0_440 = arith.constant 0 : index
    %c0_441 = arith.constant 0 : index
    %848 = vector.load %arg1[%c0_438, %c8_439, %c0_440, %c0_441] : memref<1x16x16x128xf32, #tpu.memory_space<vmem>>, vector<1x8x16x128xf32>
    %849 = vector.shape_cast %848 : vector<1x8x16x128xf32> to vector<8x16x128xf32>
    %850 = vector.shape_cast %126 : vector<1x128xf32> to vector<1x1x128xf32>
    %851 = vector.broadcast %850 : vector<1x1x128xf32> to vector<8x16x128xf32>
    %852 = arith.mulf %849, %851 : vector<8x16x128xf32>
    %853 = vector.extract_strided_slice %835 {offsets = [8, 0], sizes = [8, 16], strides = [1, 1]} : vector<16x16xf32> to vector<8x16xf32>
    %854 = vector.shape_cast %853 : vector<8x16xf32> to vector<8x16x1xf32>
    %855 = vector.broadcast %854 : vector<8x16x1xf32> to vector<8x16x128xf32>
    %856 = arith.mulf %852, %855 : vector<8x16x128xf32>
    %c0_442 = arith.constant 0 : index
    %c8_443 = arith.constant 8 : index
    %c0_444 = arith.constant 0 : index
    %c0_445 = arith.constant 0 : index
    %857 = vector.load %arg5[%c0_442, %c8_443, %c0_444, %c0_445] : memref<1x16x16x128xf32, #tpu.memory_space<vmem>>, vector<1x8x16x128xf32>
    %858 = vector.shape_cast %857 : vector<1x8x16x128xf32> to vector<8x16x128xf32>
    %859 = vector.shape_cast %856 : vector<8x16x128xf32> to vector<1x8x16x128xf32>
    tpu.vector_store %arg5[%c0_442, %c8_443, %c0_444, %c0_445], %859 {strides = array<i32>} : memref<1x16x16x128xf32, #tpu.memory_space<vmem>>, vector<1x8x16x128xf32>,
    return
  }
  func.func @transform_0(%arg0: i32) -> (i32, i32, i32, i32) {
    %c0_i32 = arith.constant 0 : i32
    %c0_i32_0 = arith.constant 0 : i32
    %c0_i32_1 = arith.constant 0 : i32
    %c0_i32_2 = arith.constant 0 : i32
    return %arg0, %c0_i32, %c0_i32_0, %c0_i32_1 : i32, i32, i32, i32
  }
  func.func @transform_1(%arg0: i32) -> (i32, i32) {
    %c0_i32 = arith.constant 0 : i32
    %c0_i32_0 = arith.constant 0 : i32
    %c0_i32_1 = arith.constant 0 : i32
    return %c0_i32, %c0_i32_0 : i32, i32
  }
  func.func @transform_2(%arg0: i32) -> (i32, i32) {
    %c0_i32 = arith.constant 0 : i32
    %c0_i32_0 = arith.constant 0 : i32
    %c0_i32_1 = arith.constant 0 : i32
    return %c0_i32, %c0_i32_0 : i32, i32
  }
  func.func @transform_3(%arg0: i32) -> i32 {
    %c0_i32 = arith.constant 0 : i32
    %c0_i32_0 = arith.constant 0 : i32
    return %c0_i32 : i32
  }
  func.func @transform_4(%arg0: i32) -> (i32, i32, i32, i32) {
    %c0_i32 = arith.constant 0 : i32
    %c0_i32_0 = arith.constant 0 : i32
    %c0_i32_1 = arith.constant 0 : i32
    %c0_i32_2 = arith.constant 0 : i32
    return %arg0, %c0_i32, %c0_i32_0, %c0_i32_1 : i32, i32, i32, i32
  }
}

</mosaic_0001>

<bundles_post_ra>
// kernel: cbam_forward.1
= control target key start
LH: loop header
LB: loop body
LE: loop exit
PB: predicated region body
PF: predicated region fallthrough
CT: control target
= control target key end

     0   :  { %9 = vsyncpa [#allocation5], 0  ;;  %s4300_s0 = inlined_call_operand.hbm [shape: f32[2,16,16,128], index: 0, kind: input, shape index: {}]   ;;  %s4301_s1 = inlined_call_operand.vmem [shape: f32[8,128], index: 1, kind: input, shape index: {}]   ;;  %s4302_s2 = inlined_call_operand.vmem [shape: f32[8,128], index: 2, kind: input, shape index: {}]   ;;  %s4303_s3 = inlined_call_operand.vmem [shape: f32[98], index: 3, kind: input, shape index: {}]   ;;  %s4304_s4 = inlined_call_operand.hbm [shape: f32[2,16,16,128], index: 4, kind: output, shape index: {}]  }
   0x1   :  { %11 = vsyncpa [#allocation5 + $0x1], 0 }
   0x2   :  { %12 = vsyncpa [#allocation7], 0 }
   0x3   :  { %13 = vsyncpa [#allocation6], 0 }
   0x4   :  { %15 = vsyncpa [#allocation6 + $0x1], 0  ;;  %s3053_s15 = smov 0   ;;  %s3055_s16 = smov 0  }
   0x5   :  { %s3057_s17 = smov 0   ;;  %s3059_s18 = smov 0  }
   0x6 LB: > { %s3074_s19 = sadd.s32 4294967295, %s3005_s18   ;;  %s2619_s20 = sadd.s32 4294967294, %s3005_s18   ;;  %s3005_s18 = sphi %s3059_s18, %s4326_s18   ;;  %s3001_s17 = sphi %s3057_s17, %s4325_s17   ;;  %s2997_s16 = sphi %s3055_s16, %s4324_s16   ;;  %s2993_s15 = sphi %s3053_s15, %s4323_s15  }
   0x7   : > { %s3078_s21 = sadd.s32 1, %s3005_s18   ;;  %s28_s22 = sadd.s32 1, %s3001_s17 }
   0x8   : > { %s25_s23 = ssub.s32 %s3005_s18, %s3078_s21  ;;  %p35_p0 = scmp.ne.s32.totalorder %s3001_s17, %s2997_s16 }
   0x9   : > { %p26_p1 = scmp.eq.s32.totalorder %s25_s23, 0  ;;  %p36_p2 = scmp.eq.s32.totalorder %s3005_s18, 0 }
   0xa   : > { %p41_p3 = scmp.ne.s32.totalorder %s2997_s16, %s2993_s15  ;;  %p4306_p4 = scmp.eq.s32.totalorder %s3074_s19, 0 }
   0xb   : > { %s3090_s24 = scalar_select %p26_p1, %s3001_s17, %s28_s22  }
   0xc   : > { %p3092_p5 = por %p36_p2, %p35_p0  ;;  %p3098_p6 = por %p4306_p4, %p41_p3 }
   0xd   : > { %p128_p7 = scmp.eq.s32.totalorder %s3074_s19, 1  ;;  %p134_p8 = scmp.eq.s32.totalorder %s2619_s20, 1 }
   0xe   : > { %s4310_s26 = scalar_select %p3098_p6, 1, 0 }
   0xf   : > { %p2620_p9 = scmp.ge.s32.totalorder %s3005_s18, 1  ;;  %p141_p10 = scmp.lt.s32.totalorder %s3005_s18, 3 }
  0x10   : > { %p3105_p11 = por %p128_p7, %p35_p0  ;;  %p3109_p12 = por %p134_p8, %p41_p3 }
  0x11   : > { %p3113_p13 = pnand %p2620_p9, %p141_p10  ;;  %s160_s6 = sshll.u32 %s4303_s3, 4  ;;  %s161_s6 = int_to_ptr.vmem [resolvable:$true] %s160_s6 }
  0x12   : > { %s4311_s27 = scalar_select %p3105_p11, 1, 0 }
  0x13   : > { %s4312_s28 = scalar_select %p3109_p12, 1, 0 }
  0x14   : > { %s4313_s29 = scalar_select %p3113_p13, 1, 0 }
  0x15   : > { %p2806_p1 = pneg %p3113_p13  ;;  %p2819_p2 = scmp.lt.s32.totalorder %s3005_s18, 2 }
  0x16   : > { %s171_s8 = sand.u32 1, %s3001_s17   ;;  %s2894_s11 = scalar_lea.vmem %s161_s6, 16 }
  0x17   : > { %p3126_p7 = pnand %p2806_p1, %p4306_p4  ;;  %p3133_p3 = pnand %p2819_p2, %p3092_p5 }
  0x18   : > { %s2623_s10 = sshll.u32 %s171_s8, 8  ;;  %p2895_p8 = scmp.ne.s32.totalorder %s161_s6, %s2894_s11 }
  0x19   : > { %p2896_p9 = pneg %p3126_p7  ;;  %p2902_p12 = scmp.lt.s32.totalorder %s161_s6, %s161_s6 }
  0x1a   : > { %p2903_p11 = scmp.lt.s32.totalorder %s2894_s11, %s2894_s11 }
  0x1b   : > { %p2897_p10 = pnand %p2896_p9, %p2895_p8 }
  0x1c   : > { %p2904_p1 = por %p2903_p11, %p2902_p12 }
  0x1d   : > { %p2898_p0 = pneg %p2897_p10 }
  0x1f   : > { %p2905_p4 = pnand %p2904_p1, %p2898_p0 }
  0x21   : > { %2908 = shalt.err (!%p2905_p4)
}
  0x22   : > { %s3007_s12 = smov [#allocation8]   ;;  %s2796_s13 = sshll.u32 %s3005_s18, 12 }
  0x23   : > { %2809 = dma.vmem_to_smem (!%p3126_p7), %s161_s6, 16, %s3007_s12, [#allocation7]  }
  0x24   : > { %s175_s14 = scalar_lea.vmem [#allocation4], %s2623_s10  ;;  %s3145_s25 = scalar_lea.hbm %s4300_s0, %s2796_s13 }
  0x25   : > { %s182_s20 = sshll.u32 %s175_s14, 4  ;;  %s3149_s30 = scalar_lea.sflag [#allocation5], %s171_s8  ;;  %s3147_s20 = int_to_ptr.vmem [resolvable:$true] %s182_s20 }
  0x26   : > { %s2909_s5 = scalar_lea.hbm %s3145_s25, 4096  ;;  %p2911_p5 = pneg %p3133_p3 }
  0x27   : > { %p2910_p4 = scmp.ne.s32.totalorder %s3145_s25, %s2909_s5  ;;  %s2914_s10 = scalar_lea.hbm %s4300_s0, 8192 }
  0x28   : > { %p2915_p0 = scmp.lt.s32.totalorder %s3145_s25, %s4300_s0  ;;  %p2916_p2 = scmp.lt.s32.totalorder %s2914_s10, %s2909_s5 }
  0x29   : > { %p2912_p11 = pnand %p2911_p5, %p2910_p4 }
  0x2a   : > { %p2917_p7 = por %p2916_p2, %p2915_p0 }
  0x2b   : > { %p2913_p12 = pneg %p2912_p11 }
  0x2d   : > { %p2918_p8 = pnand %p2917_p7, %p2913_p12 }
  0x2f   : > { %2921 = shalt.err (!%p2918_p8)
}
  0x30   : > { %s2922_s8 = scalar_lea.vmem %s3147_s20, 4096  ;;  %s3008_s13 = smov [#allocation4]  }
  0x31   : > { %p2923_p9 = scmp.ne.s32.totalorder %s3147_s20, %s2922_s8  ;;  %s2927_s14 = sshll.u32 %s3008_s13, 4  ;;  %s2928_s14 = int_to_ptr.vmem [resolvable:$false] %s2927_s14 }
  0x32   : > { %s2929_s22 = scalar_lea.vmem %s2928_s14, 8192  ;;  %p2930_p4 = scmp.lt.s32.totalorder %s3147_s20, %s2928_s14 }
  0x33   : > { %p2925_p10 = pnand %p2923_p9, %p2911_p5  ;;  %p2931_p11 = scmp.lt.s32.totalorder %s2929_s22, %s2922_s8 }
  0x35   : > { %p2926_p1 = pneg %p2925_p10  ;;  %p2932_p6 = por %p2931_p11, %p2930_p4 }
  0x37   : > { %p2933_p13 = pnand %p2932_p6, %p2926_p1 }
  0x39   : > { %2936 = shalt.err (!%p2933_p13)
}
  0x3a   : > { %s3009_s23 = smov 128   ;;  %s3010_s5 = smov 8  }
  0x3b   : > { %2813 = dma.hbm_to_vmem [thread:$0]  (!%p3133_p3), %s3145_s25, 4096, %s3147_s20, %s3149_s30, %s3009_s23, %s3009_s23, %s3010_s5  }
  0x3c   : > { %p4316_p5 = scmp.ne.s32.totalorder %s4313_s29, 0 }
  0x3d   : > { %s3173_s6 = sand.u32 (!%p4316_p5), 1, %s2997_s16   ;;  %p4317_p6 = scmp.ne.s32.totalorder (!%p4316_p5), %s4310_s26, 0 }
  0x3e   : > { %194 = sbr.rel (%p4316_p5) target bundleno = 1316 (0x524), region = 36  ;;  %s2627_s7 = sshll.u32 (!%p4316_p5), %s3173_s6, 8 }
  0x3f   : > { %s197_s10 = scalar_lea.sflag (!%p4316_p5), [#allocation5], %s3173_s6  ;;  %s3179_s11 = scalar_lea.vmem (!%p4316_p5), [#allocation4], %s2627_s7 }
  0x43   : > { %2980 = dma.done.wait (%p4317_p6), %s197_s10, 4096  }
  0x44   : > { %2982 = vsyncadd (%p4317_p6), %s197_s10, 4294963200  ;;  %p4318_p13 = scmp.eq.s32.totalorder %s3074_s19, 0 }
  0x46   : > { %2984 = dma.done.wait (%p4318_p13), [#allocation7], 16   ;;  %p4319_p3 = pmov %p4318_p13 }
  0x48   : > { %2986 = vsyncadd (%p4319_p3), [#allocation7], 4294967280 }
  0x49   : > { %209 = sfence }
  0x4a   : > { %v3190_v0 = vld [vmem:[%s3179_s11] sm:$0xff]  ;;  %v3193_v1 = vld [vmem:[%s3179_s11 + $0x8] sm:$0xff]  ;;  %v3196_v2 = vld [vmem:[%s3179_s11 + $0x10] sm:$0xff]  ;;  %vm351_vm0 = vcmask 1040384   ;;  %vm359_vm1 = vcmask 1041408   ;;  %vm426_vm2 = vcmask 7168  }
  0x4b   : > { %v3199_v3 = vld [vmem:[%s3179_s11 + $0x18] sm:$0xff]  ;;  %v3202_v4 = vld [vmem:[%s3179_s11 + $0x20] sm:$0xff]  ;;  %v3205_v5 = vld [vmem:[%s3179_s11 + $0x28] sm:$0xff]  ;;  %v267_v6 = vadd.f32 %v3196_v2, %v3190_v0  ;;  %vm428_vm3 = vcmask 15360   ;;  %vm430_vm4 = vcmask 23552   ;;  %vm432_vm5 = vcmask 31744  }
  0x4c   : > { %v3210_v7 = vld [vmem:[%s3179_s11 + $0x30] sm:$0xff]  ;;  %v3213_v8 = vld [vmem:[%s3179_s11 + $0x38] sm:$0xff]  ;;  %v3216_v9 = vld [vmem:[%s3179_s11 + $0x40] sm:$0xff]  ;;  %v246_v10 = vmax.f32 %v3190_v0, %v3202_v4  ;;  %v253_v11 = vmax.f32 %v3193_v1, %v3205_v5  ;;  %v274_v12 = vadd.f32 %v3199_v3, %v3193_v1  ;;  %vm434_vm6 = vcmask 39936   ;;  %s3019_s25 = smov 3   ;;  %s3020_s30 = smov 2  }
  0x4d   : > { %v3225_v13 = vld [vmem:[%s3179_s11 + $0x48] sm:$0xff]  ;;  %v3228_v14 = vld [vmem:[%s3179_s11 + $0x50] sm:$0xff]  ;;  %v3231_v15 = vld [vmem:[%s3179_s11 + $0x58] sm:$0xff]  ;;  %v247_v16 = vmax.f32 %v3196_v2, %v3210_v7  ;;  %v254_v17 = vmax.f32 %v3199_v3, %v3213_v8  ;;  %v268_v18 = vadd.f32 %v267_v6, %v3202_v4  ;;  %vm436_vm7 = vcmask 48128   ;;  %s3021_s12 = smov 1   ;;  %s3022_s8 = smov 127  }
  0x4e   : > { %v3239_v19 = vld [vmem:[%s3179_s11 + $0x60] sm:$0xff]  ;;  %v3242_v20 = vld [vmem:[%s3179_s11 + $0x68] sm:$0xff]  ;;  %v3245_v21 = vld [vmem:[%s3179_s11 + $0x70] sm:$0xff]  ;;  %v248_v22 = vmax.f32 %v246_v10, %v3216_v9  ;;  %v255_v23 = vmax.f32 %v253_v11, %v3225_v13  ;;  %v275_v24 = vadd.f32 %v274_v12, %v3205_v5  ;;  %vm438_vm8 = vcmask 56320   ;;  %s3023_s13 = smov 126   ;;  %s3024_s14 = smov 125  }
  0x4f   : > { %v3251_v25 = vld [vmem:[%s3179_s11 + $0x78] sm:$0xff]  ;;  %v249_v26 = vmax.f32 %v247_v16, %v3228_v14  ;;  %v256_v27 = vmax.f32 %v254_v17, %v3231_v15  ;;  %v269_v28 = vadd.f32 %v268_v18, %v3210_v7  ;;  %v3257_v29 = vld [vmem:[%s3179_s11 + $0x80] sm:$0xff]  ;;  %v3260_v30 = vld [vmem:[%s3179_s11 + $0x88] sm:$0xff]  ;;  %vm763_vm9 = vcmask 130112   ;;  %s3786_s22 = sld [smem:[#allocation8 + $0x31]]  ;;  %p4320_p0 = scmp.ne.s32.totalorder %s4311_s27, 0 }
  0x50   : > { %v250_v31 = vmax.f32 %v248_v22, %v3239_v19  ;;  %v257_v32 = vmax.f32 %v255_v23, %v3242_v20  ;;  %v276_v33 = vadd.f32 %v275_v24, %v3213_v8  ;;  %v3266_v34 = vld [vmem:[%s3179_s11 + $0x90] sm:$0xff]  ;;  %v3269_v35 = vld [vmem:[%s3179_s11 + $0x98] sm:$0xff]  ;;  %v3272_v36 = vld [vmem:[%s3179_s11 + $0xa0] sm:$0xff]  ;;  %vm828_vm10 = vcmask 1041409   ;;  %s3788_s23 = sld [smem:[#allocation8]] }
  0x51   : > { %v251_v37 = vmax.f32 %v249_v26, %v3245_v21  ;;  %v258_v38 = vmax.f32 %v256_v27, %v3251_v25  ;;  %v270_v39 = vadd.f32 %v269_v28, %v3216_v9  ;;  %v3278_v40 = vld [vmem:[%s3179_s11 + $0xa8] sm:$0xff]  ;;  %v3281_v41 = vld [vmem:[%s3179_s11 + $0xb0] sm:$0xff]  ;;  %v3284_v42 = vld [vmem:[%s3179_s11 + $0xb8] sm:$0xff]  ;;  %v306_v43 = vmax.f32 %v3257_v29, %v3272_v36  ;;  %s3792_s5 = sld [smem:[#allocation8 + $0x1]] }
  0x52   : > { %v277_v44 = vadd.f32 %v276_v33, %v3225_v13  ;;  %v3290_v45 = vld [vmem:[%s3179_s11 + $0xc0] sm:$0xff]  ;;  %v307_v46 = vmax.f32 %v3266_v34, %v3281_v41  ;;  %v313_v47 = vmax.f32 %v3260_v30, %v3278_v40  ;;  %v314_v48 = vmax.f32 %v3269_v35, %v3284_v42  ;;  %v3300_v52 = vld [vmem:[%s3179_s11 + $0xc8] sm:$0xff]  ;;  %v3303_v53 = vld [vmem:[%s3179_s11 + $0xd0] sm:$0xff]  ;;  %s3800_s10 = sld [smem:[#allocation8 + $0x32]] }
  0x53   : > { %v252_v49 = vmax.f32 %v250_v31, %v251_v37  ;;  %v259_v50 = vmax.f32 %v257_v32, %v258_v38  ;;  %v271_v51 = vadd.f32 %v270_v39, %v3228_v14  ;;  %v3306_v54 = vld [vmem:[%s3179_s11 + $0xd8] sm:$0xff]  ;;  %v308_v55 = vmax.f32 %v306_v43, %v3290_v45  ;;  %v3311_v57 = vld [vmem:[%s3179_s11 + $0xe0] sm:$0xff]  ;;  %v3314_v58 = vld [vmem:[%s3179_s11 + $0xf0] sm:$0xff]  ;;  %s3814_s26 = sld [smem:[#allocation8 + $0x2]] }
  0x54   : > { %v278_v56 = vadd.f32 %v277_v44, %v3231_v15  ;;  %v3317_v59 = vld [vmem:[%s3179_s11 + $0xf8] sm:$0xff]  ;;  %v309_v60 = vmax.f32 %v307_v46, %v3303_v53  ;;  %v315_v61 = vmax.f32 %v313_v47, %v3300_v52  ;;  %v316_v62 = vmax.f32 %v314_v48, %v3306_v54  ;;  %v3324_v10 = vld [vmem:[%s3179_s11 + $0xe8] sm:$0xff]  ;;  %s3828_s29 = sld [smem:[#allocation8 + $0x33]] }
  0x55   : > { %v260_v63 = vmax.f32 %v252_v49, %v259_v50  ;;  %v272_v6 = vadd.f32 %v271_v51, %v3239_v19  ;;  %v310_v11 = vmax.f32 %v308_v55, %v3311_v57  ;;  %v328_v12 = vadd.f32 %v3266_v34, %v3257_v29  ;;  %s3833_s9 = sld [smem:[#allocation8 + $0x34]] }
  0x56   : > { %v279_v16 = vadd.f32 %v278_v56, %v3242_v20  ;;  %v311_v17 = vmax.f32 %v309_v60, %v3314_v58  ;;  %v317_v18 = vmax.f32 %v315_v61, %v3324_v10  ;;  %v318_v22 = vmax.f32 %v316_v62, %v3317_v59  ;;  %s3836_s20 = sld [smem:[#allocation8 + $0x3]] }
  0x57   : > { %v273_v23 = vadd.f32 %v272_v6, %v3245_v21  ;;  %v329_v24 = vadd.f32 %v3272_v36, %v328_v12  ;;  %v335_v26 = vadd.f32 %v3269_v35, %v3260_v30  ;;  %v261_v37 = vrot.slane %v260_v63, 4 }
  0x58   : > { %v280_v27 = vadd.f32 %v279_v16, %v3251_v25  ;;  %v312_v28 = vmax.f32 %v310_v11, %v311_v17  ;;  %v319_v31 = vmax.f32 %v317_v18, %v318_v22  ;;  %vm830_vm11 = vcmask 1042434  }
  0x59   : > { %v330_v32 = vadd.f32 %v3281_v41, %v329_v24  ;;  %v336_v33 = vadd.f32 %v3278_v40, %v335_v26  ;;  %v262_v50 = vmax.f32 %v260_v63, %v261_v37  ;;  %vm832_vm12 = vcmask 1043459  }
  0x5a   : > { %v281_v38 = vadd.f32 %v280_v27, %v273_v23  ;;  %v320_v39 = vmax.f32 %v312_v28, %v319_v31  ;;  %vm834_vm13 = vcmask 1044484   ;;  %vm836_vm14 = vcmask 1045509  }
  0x5b   : > { %v331_v43 = vadd.f32 %v3290_v45, %v330_v32  ;;  %v337_v44 = vadd.f32 %v3284_v42, %v336_v33  ;;  %v263_v6 = vrot.slane %v262_v50, 2  ;;  %vm838_vm15 = vcmask 1046534  }
  0x5c   : > { %v282_v46 = vrot.slane %v281_v38, 4  ;;  %v321_v47 = vrot.slane %v320_v39, 4 }
  0x5d   : > { %v332_v48 = vadd.f32 %v3303_v53, %v331_v43  ;;  %v338_v49 = vadd.f32 %v3300_v52, %v337_v44  ;;  %v264_v18 = vmax.f32 %v262_v50, %v263_v6  ;;  %v2647_v50 = vld [vmem:[%s4301_s1 + $0x1] ss:$0 sm:$0xff]  ;;  %v2650_v6 = vld [vmem:[%s4301_s1 + $0x4] ss:$0 sm:$0xff] }
  0x5e   : > { %v283_v51 = vadd.f32 %v282_v46, %v281_v38  ;;  %v322_v55 = vmax.f32 %v320_v39, %v321_v47  ;;  %v2646_v47 = vld [vmem:[%s4301_s1] ss:$0 sm:$0xff] }
  0x5f   : > { %v333_v56 = vadd.f32 %v3311_v57, %v332_v48  ;;  %v339_v60 = vadd.f32 %v3306_v54, %v338_v49  ;;  %v265_v26 = vrot.slane %v264_v18, 1  ;;  %v2648_v48 = vld [vmem:[%s4301_s1 + $0x2] ss:$0 sm:$0xff] }
  0x60   : > { %v284_v11 = vrot.slane %v283_v51, 2  ;;  %v323_v12 = vrot.slane %v322_v55, 2 }
  0x61   : > { %v334_v61 = vadd.f32 %v3314_v58, %v333_v56  ;;  %v340_v62 = vadd.f32 %v3324_v10, %v339_v60  ;;  %v266_v33 = vmax.f32 %v264_v18, %v265_v26 }
  0x62   : > { %v285_v22 = vadd.f32 %v284_v11, %v283_v51  ;;  %v324_v23 = vmax.f32 %v322_v55, %v323_v12  ;;  %v2649_v51 = vld [vmem:[%s4301_s1 + $0x3] ss:$0 sm:$0xff]  ;;  %v2651_v11 = vld [vmem:[%s4301_s1 + $0x5] ss:$0 sm:$0xff] }
  0x63   : > { %v341_v16 = vadd.f32 %v3317_v59, %v340_v62 }
  0x64   : > { %v286_v27 = vrot.slane %v285_v22, 1  ;;  %v325_v28 = vrot.slane %v324_v23, 1 }
  0x65   : > { %v342_v17 = vadd.f32 %v341_v16, %v334_v61 }
  0x66   : > { %v287_v37 = vadd.f32 %v286_v27, %v285_v22  ;;  %v326_v38 = vmax.f32 %v324_v23, %v325_v28 }
  0x67   : > { %v343_v63 = vrot.slane %v342_v17, 4 }
  0x68   : > { %v327_v44 = vmax.f32 %v266_v33, %v326_v38  ;;  %v3012_v38 = vmov 0  }
  0x69   : > { %v344_v24 = vadd.f32 %v343_v63, %v342_v17  ;;  %v2652_v63 = vld [vmem:[%s4301_s1 + $0x6] ss:$0 sm:$0xff]  ;;  %2873 = vset.pattern.permute.xlu0 %v3012_v38 }
  0x6b   : > { %v345_v31 = vrot.slane %v344_v24, 2 }
  0x6d   : > { %v346_v32 = vadd.f32 %v345_v31, %v344_v24  ;;  %v2653_v24 = vld [vmem:[%s4301_s1 + $0x7] ss:$0 sm:$0xff] }
  0x6f   : > { %v347_v39 = vrot.slane %v346_v32, 1 }
  0x71   : > { %v348_v43 = vadd.f32 %v347_v39, %v346_v32 }
  0x73   : > { %v349_v46 = vadd.f32 %v348_v43, %v287_v37  ;;  %v3011_v37 = vmov 1  }
  0x74   : > { %2874 = vset.pattern.permute.xlu1 %v3011_v37 }
  0x75   : > { %v350_v49 = vmul.f32 0.00390625, %v349_v46 }
  0x77   : > { %v352_v55 = vsel %vm351_vm0, %v327_v44, %v350_v49  ;;  %vm840_vm0 = vcmask 1047559  }
  0x78   : > { %v358_v56 = vmul.f32 %v2646_v47, %v352_v55  ;;  %v377_v60 = vmul.f32 %v2648_v48, %v352_v55  ;;  %v368_v61 = vmul.f32 %v2647_v50, %v352_v55  ;;  %v386_v62 = vmul.f32 %v2649_v51, %v352_v55 }
  0x79   : > { %v395_v22 = vmul.f32 %v2650_v6, %v352_v55  ;;  %v404_v23 = vmul.f32 %v2651_v11, %v352_v55  ;;  %v413_v28 = vmul.f32 %v2652_v63, %v352_v55  ;;  %v422_v31 = vmul.f32 %v2653_v24, %v352_v55 }
  0x7a   : > { %v360_v12 = vsel %vm359_vm1, %v358_v56, 0.0  ;;  %v378_v16 = vsel %vm359_vm1, %v377_v60, 0.0  ;;  %v369_v17 = vsel %vm359_vm1, %v368_v61, 0.0  ;;  %v387_v18 = vsel %vm359_vm1, %v386_v62, 0.0 }
  0x7b   : > { %361 = vadd.xlane.f32.xlu0 %v360_v12  ;;  %379 = vadd.xlane.f32.xlu1 %v378_v16  ;;  %v396_v26 = vsel %vm359_vm1, %v395_v22, 0.0  ;;  %v405_v27 = vsel %vm359_vm1, %v404_v23, 0.0  ;;  %v414_v32 = vsel %vm359_vm1, %v413_v28, 0.0  ;;  %v423_v33 = vsel %vm359_vm1, %v422_v31, 0.0  ;;  %v2654_v28 = vld [vmem:[%s4302_s2] ss:$0 sm:$0xff] }
  0x7c   : > { %v3013_v12 = vmov 2   ;;  %v3014_v16 = vmov 7   ;;  %v3017_v22 = vmov 5   ;;  %v3018_v23 = vmov 6  }
  0x7d   : > { %vm1137_vm1 = vcmask 1042432  }
  0x7f   : > { %370 = vadd.xlane.f32.xlu0 %v369_v17  ;;  %388 = vadd.xlane.f32.xlu1 %v387_v18  ;;  %v3015_v17 = vmov 3   ;;  %v3016_v18 = vmov 4  }
  0x83   : > { %397 = vadd.xlane.f32.xlu0 %v396_v26  ;;  %406 = vadd.xlane.f32.xlu1 %v405_v27  ;;  %v2655_v27 = vld [vmem:[%s4302_s2 + $0x1] ss:$0 sm:$0xff] }
  0x87   : > { %415 = vadd.xlane.f32.xlu0 %v414_v32  ;;  %424 = vadd.xlane.f32.xlu1 %v423_v33  ;;  %v2656_v33 = vld [vmem:[%s4302_s2 + $0x2] ss:$0 sm:$0xff] }
 0x104   : > { %v362_v39 = vpop.xlane.xlu0 %361  ;;  %v380_v43 = vpop.xlane.xlu1 %379 }
 0x108   : > { %v371_v44 = vpop.xlane.xlu0 %370  ;;  %v389_v46 = vpop.xlane.xlu1 %388 }
 0x109   : > { %v427_v47 = vsel %vm426_vm2, %v362_v39, %v371_v44  ;;  %v2657_v39 = vld [vmem:[%s4302_s2 + $0x3] ss:$0 sm:$0xff]  ;;  %v2658_v44 = vld [vmem:[%s4302_s2 + $0x4] ss:$0 sm:$0xff] }
 0x10a   : > { %v429_v48 = vsel %vm428_vm3, %v427_v47, %v380_v43 }
 0x10b   : > { %v431_v49 = vsel %vm430_vm4, %v429_v48, %v389_v46 }
 0x10c   : > { %v398_v50 = vpop.xlane.xlu0 %397  ;;  %v407_v51 = vpop.xlane.xlu1 %406 }
 0x10d   : > { %v433_v55 = vsel %vm432_vm5, %v431_v49, %v398_v50  ;;  %v2659_v49 = vld [vmem:[%s4302_s2 + $0x5] ss:$0 sm:$0xff]  ;;  %vm1146_vm5 = vcmask 130048  }
 0x10e   : > { %v435_v56 = vsel %vm434_vm6, %v433_v55, %v407_v51  ;;  %v2660_v55 = vld [vmem:[%s4302_s2 + $0x6] ss:$0 sm:$0xff]  ;;  %vm1149_vm6 = vcmask 128000  }
 0x110   : > { %v416_v60 = vpop.xlane.xlu0 %415  ;;  %v425_v61 = vpop.xlane.xlu1 %424 }
 0x111   : > { %v437_v62 = vsel %vm436_vm7, %v435_v56, %v416_v60  ;;  %vm1290_vm7 = vcmask 121856  }
 0x112   : > { %v439_v6 = vsel %vm438_vm8, %v437_v62, %v425_v61  ;;  %vm1335_vm8 = vcmask 113664  }
 0x113   : > { %v440_v11 = vmax.f32 %v439_v6, 0.0 }
 0x115   : > { %455 = vperm.xlu1 %2874, %v440_v11   ;;  %444 = vperm.xlu0 %2873, %v440_v11  }
 0x119   : > { %2875 = vset.pattern.permute.xlu1 %v3013_v12  ;;  %2881 = vset.pattern.permute.xlu0 %v3014_v16 }
 0x11a   : > { %466 = vperm.xlu1 %2875, %v440_v11  }
 0x11e   : > { %2876 = vset.pattern.permute.xlu1 %v3015_v17 }
 0x11f   : > { %477 = vperm.xlu1 %2876, %v440_v11  }
 0x123   : > { %2877 = vset.pattern.permute.xlu1 %v3016_v18 }
 0x124   : > { %488 = vperm.xlu1 %2877, %v440_v11  }
 0x128   : > { %2878 = vset.pattern.permute.xlu1 %v3017_v22 }
 0x129   : > { %499 = vperm.xlu1 %2878, %v440_v11  }
 0x12d   : > { %2879 = vset.pattern.permute.xlu1 %v3018_v23 }
 0x12e   : > { %510 = vperm.xlu1 %2879, %v440_v11  }
 0x132   : > { %2880 = vset.pattern.permute.xlu1 %v3014_v16 }
 0x133   : > { %521 = vperm.xlu1 %2880, %v440_v11   ;;  %v2661_v11 = vld [vmem:[%s4302_s2 + $0x7] ss:$0 sm:$0xff] }
 0x190   : > { %v456_v63 = vpop.permute.xlu1 %455  ;;  %v445_v31 = vpop.permute.xlu0 %444 }
 0x191   : > { %v462_v37 = vmul.f32 %v2655_v27, %v456_v63  ;;  %v451_v38 = vmul.f32 %v2654_v28, %v445_v31  ;;  %v540_v31 = vlaneseq }
 0x193   : > { %v463_v47 = vadd.f32 %v462_v37, %v451_v38 }
 0x195   : > { %v467_v24 = vpop.permute.xlu1 %466 }
 0x196   : > { %v473_v43 = vmul.f32 %v2656_v33, %v467_v24 }
 0x198   : > { %v474_v50 = vadd.f32 %v473_v43, %v463_v47 }
 0x19a   : > { %v478_v26 = vpop.permute.xlu1 %477 }
 0x19b   : > { %v484_v48 = vmul.f32 %v2657_v39, %v478_v26 }
 0x19d   : > { %v485_v56 = vadd.f32 %v484_v48, %v474_v50 }
 0x19f   : > { %v489_v32 = vpop.permute.xlu1 %488 }
 0x1a0   : > { %v495_v51 = vmul.f32 %v2658_v44, %v489_v32  ;;  %v3409_v32 = vshrl.u32 %v540_v31, 7 }
 0x1a2   : > { %v496_v62 = vadd.f32 %v495_v51, %v485_v56  ;;  %v3412_v33 = vsub.s32 0, %v3409_v32 }
 0x1a4   : > { %v500_v46 = vpop.permute.xlu1 %499 }
 0x1a5   : > { %v506_v60 = vmul.f32 %v2659_v49, %v500_v46 }
 0x1a7   : > { %v507_v12 = vadd.f32 %v506_v60, %v496_v62 }
 0x1a9   : > { %v511_v61 = vpop.permute.xlu1 %510 }
 0x1aa   : > { %v517_v6 = vmul.f32 %v2660_v55, %v511_v61 }
 0x1ac   : > { %v518_v17 = vadd.f32 %v517_v6, %v507_v12 }
 0x1ae   : > { %v522_v16 = vpop.permute.xlu1 %521 }
 0x1af   : > { %v528_v18 = vmul.f32 %v2661_v11, %v522_v16 }
 0x1b1   : > { %v529_v22 = vadd.f32 %v528_v18, %v518_v17 }
 0x1b3   : > { %v531_v23 = vrot.slane %v529_v22, 1 }
 0x1b5   : > { %v533_v63 = vadd.f32 %v531_v23, %v529_v22  ;;  %v753_v22 = vand.u32 127, %v540_v31 }
 0x1b7   : > { %v534_v24 = vsub.f32 0.0, %v533_v63 }
 0x1b9   : > { %v535_v26 = vmul.f32 1.442695, %v534_v24  ;;  %v758_v24 = vadd.s32 4294967288, %v753_v22 }
 0x1bb   : > { %2882 = vpow2.f32 %v535_v26 }
 0x1c8   : > { %v2883_v27 = vpop.eup %2882 }
 0x1c9   : > { %v537_v28 = vadd.f32 1.0, %v2883_v27 }
 0x1cb   : > { %2884 = vrcp.f32 %v537_v28  ;;  %v3511_v28 = vsub.s32 %v758_v24, %v3409_v32 }
 0x1d8   : > { %v2885_v37 = vpop.eup %2884 }
 0x1d9   : > { %v3415_v38 = vrot.slane %v2885_v37, %v3412_v33  ;;  %v3514_v37 = vsub.s32 %v753_v22, %v3409_v32 }
 0x1db   : > { %v545_v39 = vmul.f32 %v3415_v38, %v3193_v1  ;;  %v544_v43 = vmul.f32 %v3415_v38, %v3190_v0  ;;  %v546_v44 = vmul.f32 %v3415_v38, %v3196_v2  ;;  %v547_v46 = vmul.f32 %v3415_v38, %v3199_v3 }
 0x1dc   : > { %v640_v47 = vmul.f32 %v3257_v29, %v3415_v38  ;;  %v641_v48 = vmul.f32 %v3260_v30, %v3415_v38  ;;  %v642_v0 = vmul.f32 %v3266_v34, %v3415_v38  ;;  %v643_v1 = vmul.f32 %v3269_v35, %v3415_v38 }
 0x1dd   : > { %594 = vadd.xlane.f32.xlu0 %v545_v39  ;;  %592 = vadd.xlane.f32.xlu1 %v544_v43  ;;  %v548_v2 = vmul.f32 %v3415_v38, %v3202_v4  ;;  %v549_v3 = vmul.f32 %v3415_v38, %v3205_v5  ;;  %v644_v29 = vmul.f32 %v3272_v36, %v3415_v38 }
 0x1de   : > { %v645_v30 = vmul.f32 %v3278_v40, %v3415_v38  ;;  %v550_v4 = vmul.f32 %v3415_v38, %v3210_v7  ;;  %v551_v5 = vmul.f32 %v3415_v38, %v3213_v8  ;;  %v646_v34 = vmul.f32 %v3281_v41, %v3415_v38 }
 0x1df   : > { %v647_v35 = vmul.f32 %v3284_v42, %v3415_v38  ;;  %v552_v7 = vmul.f32 %v3415_v38, %v3216_v9  ;;  %v553_v8 = vmul.f32 %v3415_v38, %v3225_v13  ;;  %v648_v36 = vmul.f32 %v3290_v45, %v3415_v38 }
 0x1e0   : > { %v649_v40 = vmul.f32 %v3300_v52, %v3415_v38  ;;  %v554_v9 = vmul.f32 %v3415_v38, %v3228_v14  ;;  %v555_v13 = vmul.f32 %v3415_v38, %v3231_v15  ;;  %v650_v41 = vmul.f32 %v3303_v53, %v3415_v38 }
 0x1e1   : > { %596 = vadd.xlane.f32.xlu0 %v546_v44  ;;  %598 = vadd.xlane.f32.xlu1 %v547_v46  ;;  %v651_v42 = vmul.f32 %v3306_v54, %v3415_v38  ;;  %v556_v14 = vmul.f32 %v3415_v38, %v3239_v19  ;;  %v557_v15 = vmul.f32 %v3415_v38, %v3242_v20 }
 0x1e2   : > { %v652_v45 = vmul.f32 %v3311_v57, %v3415_v38  ;;  %v653_v52 = vmul.f32 %v3324_v10, %v3415_v38  ;;  %v558_v19 = vmul.f32 %v3415_v38, %v3245_v21  ;;  %v559_v20 = vmul.f32 %v3415_v38, %v3251_v25 }
 0x1e3   : > { %v654_v53 = vmul.f32 %v3314_v58, %v3415_v38  ;;  %v655_v54 = vmul.f32 %v3317_v59, %v3415_v38 }
 0x1e5   : > { %688 = vadd.xlane.f32.xlu0 %v640_v47  ;;  %690 = vadd.xlane.f32.xlu1 %v641_v48 }
 0x1e9   : > { %692 = vadd.xlane.f32.xlu0 %v642_v0  ;;  %694 = vadd.xlane.f32.xlu1 %v643_v1 }
 0x1ed   : > { %600 = vadd.xlane.f32.xlu0 %v548_v2  ;;  %602 = vadd.xlane.f32.xlu1 %v549_v3 }
 0x1f1   : > { %696 = vadd.xlane.f32.xlu0 %v644_v29  ;;  %698 = vadd.xlane.f32.xlu1 %v645_v30 }
 0x1f5   : > { %560 = vmax.xlane.f32.xlu0 %v544_v43  ;;  %562 = vmax.xlane.f32.xlu1 %v545_v39 }
 0x1f9   : > { %564 = vmax.xlane.f32.xlu0 %v546_v44  ;;  %566 = vmax.xlane.f32.xlu1 %v547_v46 }
 0x1fd   : > { %604 = vadd.xlane.f32.xlu0 %v550_v4  ;;  %606 = vadd.xlane.f32.xlu1 %v551_v5 }
 0x201   : > { %656 = vmax.xlane.f32.xlu0 %v640_v47  ;;  %658 = vmax.xlane.f32.xlu1 %v641_v48 }
 0x205   : > { %660 = vmax.xlane.f32.xlu0 %v642_v0  ;;  %662 = vmax.xlane.f32.xlu1 %v643_v1 }
 0x209   : > { %700 = vadd.xlane.f32.xlu0 %v646_v34  ;;  %702 = vadd.xlane.f32.xlu1 %v647_v35 }
 0x20d   : > { %568 = vmax.xlane.f32.xlu0 %v548_v2  ;;  %570 = vmax.xlane.f32.xlu1 %v549_v3 }
 0x211   : > { %608 = vadd.xlane.f32.xlu0 %v552_v7  ;;  %610 = vadd.xlane.f32.xlu1 %v553_v8 }
 0x215   : > { %664 = vmax.xlane.f32.xlu0 %v644_v29  ;;  %666 = vmax.xlane.f32.xlu1 %v645_v30 }
 0x219   : > { %704 = vadd.xlane.f32.xlu0 %v648_v36  ;;  %706 = vadd.xlane.f32.xlu1 %v649_v40 }
 0x21d   : > { %572 = vmax.xlane.f32.xlu0 %v550_v4  ;;  %574 = vmax.xlane.f32.xlu1 %v551_v5 }
 0x221   : > { %612 = vadd.xlane.f32.xlu0 %v554_v9  ;;  %614 = vadd.xlane.f32.xlu1 %v555_v13 }
 0x225   : > { %668 = vmax.xlane.f32.xlu0 %v646_v34  ;;  %670 = vmax.xlane.f32.xlu1 %v647_v35 }
 0x229   : > { %708 = vadd.xlane.f32.xlu0 %v650_v41  ;;  %710 = vadd.xlane.f32.xlu1 %v651_v42 }
 0x22d   : > { %576 = vmax.xlane.f32.xlu0 %v552_v7  ;;  %578 = vmax.xlane.f32.xlu1 %v553_v8 }
 0x231   : > { %616 = vadd.xlane.f32.xlu0 %v556_v14  ;;  %618 = vadd.xlane.f32.xlu1 %v557_v15 }
 0x235   : > { %672 = vmax.xlane.f32.xlu0 %v648_v36  ;;  %674 = vmax.xlane.f32.xlu1 %v649_v40 }
 0x239   : > { %712 = vadd.xlane.f32.xlu0 %v652_v45  ;;  %714 = vadd.xlane.f32.xlu1 %v653_v52 }
 0x23d   : > { %580 = vmax.xlane.f32.xlu0 %v554_v9  ;;  %582 = vmax.xlane.f32.xlu1 %v555_v13 }
 0x241   : > { %620 = vadd.xlane.f32.xlu0 %v558_v19  ;;  %622 = vadd.xlane.f32.xlu1 %v559_v20 }
 0x245   : > { %676 = vmax.xlane.f32.xlu0 %v650_v41  ;;  %678 = vmax.xlane.f32.xlu1 %v651_v42 }
 0x249   : > { %716 = vadd.xlane.f32.xlu0 %v654_v53  ;;  %718 = vadd.xlane.f32.xlu1 %v655_v54 }
 0x24d   : > { %584 = vmax.xlane.f32.xlu0 %v556_v14  ;;  %586 = vmax.xlane.f32.xlu1 %v557_v15 }
 0x251   : > { %680 = vmax.xlane.f32.xlu0 %v652_v45  ;;  %682 = vmax.xlane.f32.xlu1 %v653_v52 }
 0x255   : > { %588 = vmax.xlane.f32.xlu0 %v558_v19  ;;  %590 = vmax.xlane.f32.xlu1 %v559_v20 }
 0x259   : > { %684 = vmax.xlane.f32.xlu0 %v654_v53  ;;  %686 = vmax.xlane.f32.xlu1 %v655_v54 }
 0x266   : > { %v595_v21 = vpop.xlane.xlu0 %594  ;;  %v593_v25 = vpop.xlane.xlu1 %592 }
 0x267   : > { %v625_v9 = vmul.f32 0.0078125, %v595_v21  ;;  %v624_v13 = vmul.f32 0.0078125, %v593_v25 }
 0x269   : > { %v960_v19 = vrot.slane %v625_v9, %v3511_v28  ;;  %v956_v20 = vrot.slane %v624_v13, %v3514_v37 }
 0x26a   : > { %v597_v57 = vpop.xlane.xlu0 %596  ;;  %v599_v10 = vpop.xlane.xlu1 %598 }
 0x26b   : > { %v626_v41 = vmul.f32 0.0078125, %v597_v57  ;;  %v627_v42 = vmul.f32 0.0078125, %v599_v10 }
 0x26d   : > { %v965_v53 = vrot.slane %v626_v41, %v3514_v37  ;;  %v969_v54 = vrot.slane %v627_v42, %v3511_v28 }
 0x26e   : > { %v689_v49 = vpop.xlane.xlu0 %688  ;;  %v691_v50 = vpop.xlane.xlu1 %690 }
 0x26f   : > { %v720_v22 = vmul.f32 0.0078125, %v689_v49  ;;  %v721_v21 = vmul.f32 0.0078125, %v691_v50  ;;  %v970_v50 = vsel %vm763_vm9, %v969_v54, %v965_v53 }
 0x272   : > { %v3481_v58 = vpop.xlane.xlu0 %692  ;;  %v3483_v51 = vpop.xlane.xlu1 %694 }
 0x273   : > { %v722_v10 = vmul.f32 0.0078125, %v3481_v58 }
 0x276   : > { %v601_v59 = vpop.xlane.xlu0 %600  ;;  %v603_v55 = vpop.xlane.xlu1 %602 }
 0x277   : > { %v628_v45 = vmul.f32 0.0078125, %v601_v59  ;;  %v629_v52 = vmul.f32 0.0078125, %v603_v55  ;;  %v723_v59 = vmul.f32 0.0078125, %v3483_v51 }
 0x279   : > { %v974_v55 = vrot.slane %v628_v45, %v3514_v37 }
 0x27a   : > { %v3485_v56 = vpop.xlane.xlu0 %696  ;;  %v3487_v60 = vpop.xlane.xlu1 %698 }
 0x27b   : > { %v724_v49 = vmul.f32 0.0078125, %v3485_v56  ;;  %v1055_v56 = vrot.slane %v721_v21, %v3511_v28 }
 0x27e   : > { %v3489_v61 = vpop.xlane.xlu0 %560  ;;  %v3491_v62 = vpop.xlane.xlu1 %562 }
 0x282   : > { %v3493_v6 = vpop.xlane.xlu0 %564  ;;  %v3495_v11 = vpop.xlane.xlu1 %566 }
 0x286   : > { %v605_v12 = vpop.xlane.xlu0 %604  ;;  %v607_v16 = vpop.xlane.xlu1 %606 }
 0x287   : > { %v630_v24 = vmul.f32 0.0078125, %v605_v12  ;;  %v725_v12 = vmul.f32 0.0078125, %v3487_v60  ;;  %v1060_v60 = vrot.slane %v722_v10, %v3514_v37 }
 0x289   : > { %v1073_v53 = vrot.slane %v725_v12, %v3511_v28  ;;  %v757_v12 = vrot.slane %v3489_v61, %v3514_v37 }
 0x28a   : > { %v3497_v17 = vpop.xlane.xlu0 %656  ;;  %v3499_v18 = vpop.xlane.xlu1 %658 }
 0x28e   : > { %v3502_v23 = vpop.xlane.xlu0 %660  ;;  %v3504_v63 = vpop.xlane.xlu1 %662 }
 0x292   : > { %v3506_v26 = vpop.xlane.xlu0 %700  ;;  %v3508_v27 = vpop.xlane.xlu1 %702 }
 0x296   : > { %v569_v39 = vpop.xlane.xlu0 %568  ;;  %v571_v43 = vpop.xlane.xlu1 %570 }
 0x297   : > { %v777_v44 = vrot.slane %v569_v39, %v3514_v37  ;;  %v781_v31 = vrot.slane %v571_v43, %v3511_v28  ;;  %v631_v39 = vmul.f32 0.0078125, %v607_v16  ;;  %v978_v43 = vrot.slane %v629_v52, %v3511_v28 }
 0x298   : > { %v1051_v16 = vrot.slane %v720_v22, %v3514_v37  ;;  %v1064_v52 = vrot.slane %v723_v59, %v3511_v28 }
 0x299   : > { %v3519_v46 = vsel %vm763_vm9, %v781_v31, %v777_v44  ;;  %v961_v44 = vsel %vm763_vm9, %v960_v19, %v956_v20  ;;  %v983_v31 = vrot.slane %v630_v24, %v3514_v37  ;;  %v987_v58 = vrot.slane %v631_v39, %v3511_v28 }
 0x29a   : > { %v609_v47 = vpop.xlane.xlu0 %608  ;;  %v611_v48 = vpop.xlane.xlu1 %610  ;;  %v979_v19 = vsel %vm763_vm9, %v978_v43, %v974_v55  ;;  %v1069_v20 = vrot.slane %v724_v49, %v3514_v37  ;;  %v726_v43 = vmul.f32 0.0078125, %v3506_v26 }
 0x29b   : > { %v632_v51 = vmul.f32 0.0078125, %v609_v47  ;;  %v633_v9 = vmul.f32 0.0078125, %v611_v48  ;;  %v1025_v48 = vsel %vm828_vm10, %v970_v50, %v961_v44  ;;  %v762_v50 = vrot.slane %v3491_v62, %v3511_v28 }
 0x29c   : > { %v1026_v59 = vsel %vm830_vm11, %v979_v19, %v1025_v48  ;;  %v1074_v55 = vsel %vm763_vm9, %v1073_v53, %v1069_v20 }
 0x29d   : > { %v996_v22 = vrot.slane %v633_v9, %v3511_v28 }
 0x29e   : > { %v3521_v0 = vpop.xlane.xlu0 %664  ;;  %v3523_v1 = vpop.xlane.xlu1 %666 }
 0x2a2   : > { %v3525_v2 = vpop.xlane.xlu0 %704  ;;  %v3527_v3 = vpop.xlane.xlu1 %706 }
 0x2a3   : > { %v728_v26 = vmul.f32 0.0078125, %v3525_v2 }
 0x2a6   : > { %v3529_v29 = vpop.xlane.xlu0 %572  ;;  %v3531_v30 = vpop.xlane.xlu1 %574 }
 0x2aa   : > { %v613_v4 = vpop.xlane.xlu0 %612  ;;  %v615_v5 = vpop.xlane.xlu1 %614 }
 0x2ab   : > { %v634_v13 = vmul.f32 0.0078125, %v613_v4  ;;  %v635_v41 = vmul.f32 0.0078125, %v615_v5  ;;  %v988_v4 = vsel %vm763_vm9, %v987_v58, %v983_v31  ;;  %v992_v5 = vrot.slane %v632_v51, %v3514_v37 }
 0x2ac   : > { %v727_v31 = vmul.f32 0.0078125, %v3508_v27  ;;  %v729_v51 = vmul.f32 0.0078125, %v3527_v3 }
 0x2ad   : > { %v1001_v24 = vrot.slane %v634_v13, %v3514_v37  ;;  %v1005_v39 = vrot.slane %v635_v41, %v3511_v28  ;;  %v997_v58 = vsel %vm763_vm9, %v996_v22, %v992_v5 }
 0x2ae   : > { %v3533_v34 = vpop.xlane.xlu0 %668  ;;  %v3535_v35 = vpop.xlane.xlu1 %670  ;;  %v1082_v2 = vrot.slane %v727_v31, %v3511_v28 }
 0x2af   : > { %v1006_v9 = vsel %vm763_vm9, %v1005_v39, %v1001_v24 }
 0x2b2   : > { %v3537_v7 = vpop.xlane.xlu0 %708  ;;  %v3539_v8 = vpop.xlane.xlu1 %710 }
 0x2b3   : > { %v730_v61 = vmul.f32 0.0078125, %v3537_v7  ;;  %v768_v7 = vrot.slane %v3493_v6, %v3514_v37  ;;  %v772_v6 = vrot.slane %v3495_v11, %v3511_v28  ;;  %v865_v11 = vrot.slane %v3499_v18, %v3511_v28 }
 0x2b4   : > { %v870_v18 = vrot.slane %v3502_v23, %v3514_v37 }
 0x2b6   : > { %v3541_v36 = vpop.xlane.xlu0 %576  ;;  %v3543_v40 = vpop.xlane.xlu1 %578 }
 0x2ba   : > { %v617_v14 = vpop.xlane.xlu0 %616  ;;  %v619_v15 = vpop.xlane.xlu1 %618 }
 0x2bb   : > { %v636_v54 = vmul.f32 0.0078125, %v617_v14  ;;  %v637_v47 = vmul.f32 0.0078125, %v619_v15  ;;  %v1056_v14 = vsel %vm763_vm9, %v1055_v56, %v1051_v16  ;;  %v1065_v15 = vsel %vm763_vm9, %v1064_v52, %v1060_v60 }
 0x2bc   : > { %v1027_v16 = vsel %vm832_vm12, %v988_v4, %v1026_v59  ;;  %v731_v56 = vmul.f32 0.0078125, %v3539_v8  ;;  %v1078_v52 = vrot.slane %v726_v43, %v3514_v37  ;;  %v1087_v8 = vrot.slane %v728_v26, %v3514_v37 }
 0x2bd   : > { %v1010_v44 = vrot.slane %v636_v54, %v3514_v37  ;;  %v1014_v49 = vrot.slane %v637_v47, %v3511_v28  ;;  %v1028_v3 = vsel %vm834_vm13, %v997_v58, %v1027_v16  ;;  %v1091_v47 = vrot.slane %v729_v51, %v3511_v28 }
 0x2be   : > { %v3549_v25 = vpop.xlane.xlu0 %672  ;;  %v3551_v57 = vpop.xlane.xlu1 %674  ;;  %v1029_v48 = vsel %vm836_vm14, %v1006_v9, %v1028_v3  ;;  %v1100_v5 = vrot.slane %v731_v56, %v3511_v28  ;;  %v861_v58 = vrot.slane %v3497_v17, %v3514_v37 }
 0x2bf   : > { %v1015_v27 = vsel %vm763_vm9, %v1014_v49, %v1010_v44  ;;  %v1120_v44 = vsel %vm828_vm10, %v1065_v15, %v1056_v14  ;;  %v1083_v49 = vsel %vm763_vm9, %v1082_v2, %v1078_v52  ;;  %v1092_v26 = vsel %vm763_vm9, %v1091_v47, %v1087_v8 }
 0x2c0   : > { %v1030_v22 = vsel %vm838_vm15, %v1015_v27, %v1029_v48  ;;  %v1121_v31 = vsel %vm830_vm11, %v1074_v55, %v1120_v44  ;;  %v773_v55 = vsel %vm763_vm9, %v772_v6, %v768_v7  ;;  %v790_v27 = vrot.slane %v3531_v30, %v3511_v28 }
 0x2c1   : > { %v1122_v56 = vsel %vm832_vm12, %v1083_v49, %v1121_v31  ;;  %v866_v3 = vsel %vm763_vm9, %v865_v11, %v861_v58  ;;  %v799_v30 = vrot.slane %v3543_v40, %v3511_v28  ;;  %v883_v8 = vrot.slane %v3523_v1, %v3511_v28 }
 0x2c2   : > { %v713_v42 = vpop.xlane.xlu0 %712  ;;  %v715_v45 = vpop.xlane.xlu1 %714  ;;  %v888_v1 = vrot.slane %v3533_v34, %v3514_v37  ;;  %v897_v44 = vrot.slane %v3549_v25, %v3514_v37  ;;  %v901_v49 = vrot.slane %v3551_v57, %v3511_v28 }
 0x2c3   : > { %v732_v19 = vmul.f32 0.0078125, %v713_v42  ;;  %v733_v20 = vmul.f32 0.0078125, %v715_v45  ;;  %v1096_v45 = vrot.slane %v730_v61, %v3514_v37  ;;  %v764_v61 = vsel %vm763_vm9, %v762_v50, %v757_v12 }
 0x2c4   : > { %v874_v12 = vrot.slane %v3504_v63, %v3511_v28  ;;  %v786_v50 = vrot.slane %v3529_v29, %v3514_v37  ;;  %v829_v23 = vsel %vm828_vm10, %v773_v55, %v764_v61  ;;  %v879_v63 = vrot.slane %v3521_v0, %v3514_v37 }
 0x2c5   : > { %v1105_v39 = vrot.slane %v732_v19, %v3514_v37  ;;  %v1109_v59 = vrot.slane %v733_v20, %v3511_v28  ;;  %v795_v29 = vrot.slane %v3541_v36, %v3514_v37 }
 0x2c6   : > { %v3576_v21 = vpop.xlane.xlu0 %580  ;;  %v3578_v10 = vpop.xlane.xlu1 %582  ;;  %v791_v36 = vsel %vm763_vm9, %v790_v27, %v786_v50  ;;  %v884_v34 = vsel %vm763_vm9, %v883_v8, %v879_v63 }
 0x2c7   : > { %v1110_v17 = vsel %vm763_vm9, %v1109_v59, %v1105_v39  ;;  %v804_v47 = vrot.slane %v3576_v21, %v3514_v37  ;;  %v808_v48 = vrot.slane %v3578_v10, %v3511_v28  ;;  %v892_v21 = vrot.slane %v3535_v35, %v3511_v28 }
 0x2c8   : > { %v831_v39 = vsel %vm830_vm11, %v3519_v46, %v829_v23  ;;  %v800_v59 = vsel %vm763_vm9, %v799_v30, %v795_v29 }
 0x2c9   : > { %v809_v35 = vsel %vm763_vm9, %v808_v48, %v804_v47  ;;  %v833_v31 = vsel %vm832_vm12, %v791_v36, %v831_v39 }
 0x2ca   : > { %v621_v13 = vpop.xlane.xlu0 %620  ;;  %v623_v41 = vpop.xlane.xlu1 %622 }
 0x2cb   : > { %v638_v62 = vmul.f32 0.0078125, %v621_v13  ;;  %v639_v60 = vmul.f32 0.0078125, %v623_v41  ;;  %v1101_v13 = vsel %vm763_vm9, %v1100_v5, %v1096_v45  ;;  %v875_v45 = vsel %vm763_vm9, %v874_v12, %v870_v18 }
 0x2cd   : > { %v1019_v53 = vrot.slane %v638_v62, %v3514_v37  ;;  %v1023_v54 = vrot.slane %v639_v60, %v3511_v28  ;;  %v1123_v62 = vsel %vm834_vm13, %v1092_v26, %v1122_v56 }
 0x2ce   : > { %v3610_v4 = vpop.xlane.xlu0 %676  ;;  %v3612_v42 = vpop.xlane.xlu1 %678  ;;  %v1124_v19 = vsel %vm836_vm14, %v1101_v13, %v1123_v62 }
 0x2cf   : > { %v1024_v24 = vsel %vm763_vm9, %v1023_v54, %v1019_v53  ;;  %v1125_v53 = vsel %vm838_vm15, %v1110_v17, %v1124_v19  ;;  %v910_v46 = vrot.slane %v3612_v42, %v3511_v28  ;;  %v930_v42 = vsel %vm828_vm10, %v875_v45, %v866_v3 }
 0x2d0   : > { %v3623_v43 = vsel %vm840_vm0, %v1024_v24, %v1030_v22 }
 0x2d1   : > { %v1272_v16 = vrot.slane %v3623_v43, 5 }
 0x2d2   : > { %v717_v51 = vpop.xlane.xlu0 %716  ;;  %v719_v9 = vpop.xlane.xlu1 %718 }
 0x2d3   : > { %v1278_v14 = vsel %vm1137_vm1, 0.0, %v1272_v16  ;;  %v734_v15 = vmul.f32 0.0078125, %v717_v51  ;;  %v735_v41 = vmul.f32 0.0078125, %v719_v9  ;;  %v893_v51 = vsel %vm763_vm9, %v892_v21, %v888_v1 }
 0x2d4   : > { %1281 = vst.msk [vmem:[#allocation3 + $0x48] sm:$0xff] %vm1146_vm5, %v1278_v14  ;;  %v835_v9 = vsel %vm834_vm13, %v800_v59, %v833_v31  ;;  %v902_v14 = vsel %vm763_vm9, %v901_v49, %v897_v44 }
 0x2d5   : > { %v1114_v60 = vrot.slane %v734_v15, %v3514_v37  ;;  %v1118_v52 = vrot.slane %v735_v41, %v3511_v28  ;;  %v837_v15 = vsel %vm836_vm14, %v809_v35, %v835_v9  ;;  %v931_v41 = vsel %vm830_vm11, %v884_v34, %v930_v42 }
 0x2d6   : > { %v585_v20 = vpop.xlane.xlu0 %584  ;;  %v587_v2 = vpop.xlane.xlu1 %586  ;;  %v932_v17 = vsel %vm832_vm12, %v893_v51, %v931_v41 }
 0x2d7   : > { %v1119_v54 = vsel %vm763_vm9, %v1118_v52, %v1114_v60  ;;  %v813_v40 = vrot.slane %v585_v20, %v3514_v37  ;;  %v817_v5 = vrot.slane %v587_v2, %v3511_v28  ;;  %v933_v12 = vsel %vm834_vm13, %v902_v14, %v932_v17 }
 0x2d8   : > { %v3664_v7 = vsel %vm840_vm0, %v1119_v54, %v1125_v53 }
 0x2d9   : > { %v1273_v0 = vrot.slane %v3664_v7, 5  ;;  %v818_v25 = vsel %vm763_vm9, %v817_v5, %v813_v40 }
 0x2da   : > { %v681_v22 = vpop.xlane.xlu0 %680  ;;  %v683_v24 = vpop.xlane.xlu1 %682  ;;  %v839_v55 = vsel %vm838_vm15, %v818_v25, %v837_v15 }
 0x2db   : > { %v1274_v10 = vsel %vm1137_vm1, %v1272_v16, %v1273_v0  ;;  %v1279_v6 = vsel %vm1137_vm1, %v1273_v0, 0.0  ;;  %v906_v16 = vrot.slane %v3610_v4, %v3514_v37  ;;  %v915_v57 = vrot.slane %v681_v22, %v3514_v37 }
 0x2dc   : > { %1282 = vst.msk [vmem:[#allocation3 + $0x50] sm:$0xff] %vm1146_vm5, %v1274_v10  ;;  %v919_v58 = vrot.slane %v683_v24, %v3511_v28 }
 0x2dd   : > { %1283 = vst.msk [vmem:[#allocation3 + $0x58] sm:$0x3f] %vm1149_vm6, %v1279_v6  ;;  %v911_v61 = vsel %vm763_vm9, %v910_v46, %v906_v16 }
 0x2de   : > { %v589_v11 = vpop.xlane.xlu0 %588  ;;  %v591_v26 = vpop.xlane.xlu1 %590  ;;  %v920_v18 = vsel %vm763_vm9, %v919_v58, %v915_v57  ;;  %v934_v20 = vsel %vm836_vm14, %v911_v61, %v933_v12 }
 0x2df   : > { %v822_v13 = vrot.slane %v589_v11, %v3514_v37  ;;  %v826_v4 = vrot.slane %v591_v26, %v3511_v28  ;;  %v935_v2 = vsel %vm838_vm15, %v920_v18, %v934_v20 }
 0x2e1   : > { %v827_v56 = vsel %vm763_vm9, %v826_v4, %v822_v13 }
 0x2e2   : > { %v841_v62 = vsel %vm840_vm0, %v827_v56, %v839_v55  ;;  %v685_v60 = vpop.xlane.xlu0 %684  ;;  %v687_v52 = vpop.xlane.xlu1 %686 }
 0x2e3   : > { %v1260_v50 = vrot.slane %v841_v62, 5  ;;  %v924_v27 = vrot.slane %v685_v60, %v3514_v37  ;;  %v928_v19 = vrot.slane %v687_v52, %v3511_v28  ;;  %1127 = vrot.lane.b32.xlu0 %v841_v62, %s3019_s25 }
 0x2e5   : > { %v1266_v23 = vsel %vm1137_vm1, 0.0, %v1260_v50  ;;  %v929_v3 = vsel %vm763_vm9, %v928_v19, %v924_v27  ;;  %vm1380_vm9 = vcmask 105472  }
 0x2e6   : > { %1269 = vst.msk [vmem:[#allocation2 + $0x48] sm:$0xff] %vm1146_vm5, %v1266_v23  ;;  %v936_v53 = vsel %vm840_vm0, %v929_v3, %v935_v2 }
 0x2e7   : > { %v1261_v54 = vrot.slane %v936_v53, 5  ;;  %1174 = vrot.lane.b32.xlu0 %v936_v53, %s3020_s30  ;;  %1129 = vrot.lane.b32.xlu1 %v936_v53, %s3019_s25 }
 0x2e9   : > { %v1262_v28 = vsel %vm1137_vm1, %v1260_v50, %v1261_v54  ;;  %v1267_v37 = vsel %vm1137_vm1, %v1261_v54, 0.0 }
 0x2ea   : > { %1270 = vst.msk [vmem:[#allocation2 + $0x50] sm:$0xff] %vm1146_vm5, %v1262_v28 }
 0x2eb   : > { %1271 = vst.msk [vmem:[#allocation2 + $0x58] sm:$0x3f] %vm1149_vm6, %v1267_v37  ;;  %1218 = vrot.lane.b32.xlu0 %v936_v53, %s3021_s12  ;;  %1172 = vrot.lane.b32.xlu1 %v841_v62, %s3020_s30 }
 0x2ef   : > { %1286 = vrot.lane.b32.xlu0 %v936_v53, %s3022_s8  ;;  %1216 = vrot.lane.b32.xlu1 %v841_v62, %s3021_s12 }
 0x2f3   : > { %1331 = vrot.lane.b32.xlu0 %v936_v53, %s3023_s13  ;;  %1284 = vrot.lane.b32.xlu1 %v841_v62, %s3022_s8 }
 0x2f7   : > { %1153 = vrot.lane.b32.xlu0 %v3664_v7, %s3019_s25  ;;  %1329 = vrot.lane.b32.xlu1 %v841_v62, %s3023_s13 }
 0x2fb   : > { %1196 = vrot.lane.b32.xlu0 %v3664_v7, %s3020_s30  ;;  %1151 = vrot.lane.b32.xlu1 %v3623_v43, %s3019_s25  ;;  %s3844_s25 = sld [smem:[#allocation8 + $0x4]] }
 0x2ff   : > { %1240 = vrot.lane.b32.xlu0 %v3664_v7, %s3021_s12  ;;  %1194 = vrot.lane.b32.xlu1 %v3623_v43, %s3020_s30  ;;  %s3860_s30 = sld [smem:[#allocation8 + $0x35]] }
 0x303   : > { %1376 = vrot.lane.b32.xlu0 %v936_v53, %s3024_s14  ;;  %1238 = vrot.lane.b32.xlu1 %v3623_v43, %s3021_s12  ;;  %s3867_s12 = sld [smem:[#allocation8 + $0x5]] }
 0x307   : > { %1309 = vrot.lane.b32.xlu0 %v3664_v7, %s3022_s8  ;;  %1374 = vrot.lane.b32.xlu1 %v841_v62, %s3024_s14 }
 0x30b   : > { %1354 = vrot.lane.b32.xlu0 %v3664_v7, %s3023_s13  ;;  %1307 = vrot.lane.b32.xlu1 %v3623_v43, %s3022_s8  ;;  %s3878_s8 = sld [smem:[#allocation8 + $0x36]] }
 0x30f   : > { %1399 = vrot.lane.b32.xlu0 %v3664_v7, %s3024_s14  ;;  %1352 = vrot.lane.b32.xlu1 %v3623_v43, %s3023_s13  ;;  %s3880_s13 = sld [smem:[#allocation8 + $0x6]] }
 0x313   : > { %1397 = vrot.lane.b32.xlu1 %v3623_v43, %s3024_s14  ;;  %s3884_s14 = sld [smem:[#allocation8 + $0x37]] }
 0x355   : > { %v1128_v63 = vpop.permute.xlu0 %1127 }
 0x356   : > { %v1133_v29 = vsel %vm430_vm4, 0.0, %v1128_v63 }
 0x357   : > { %v1138_v30 = vrot.slane %v1133_v29, 5 }
 0x359   : > { %v1144_v8 = vsel %vm1137_vm1, 0.0, %v1138_v30  ;;  %v1175_v47 = vpop.permute.xlu0 %1174  ;;  %v1130_v48 = vpop.permute.xlu1 %1129 }
 0x35a   : > { %1147 = vst.msk [vmem:[#allocation2] sm:$0xff] %vm1146_vm5, %v1144_v8  ;;  %v1179_v0 = vsel %vm428_vm3, 0.0, %v1175_v47  ;;  %v1134_v45 = vsel %vm430_vm4, 0.0, %v1130_v48 }
 0x35b   : > { %v1183_v36 = vrot.slane %v1179_v0, 5  ;;  %v1139_v7 = vrot.slane %v1134_v45, 5 }
 0x35d   : > { %v1189_v40 = vsel %vm1137_vm1, %v1183_v36, 0.0  ;;  %v1140_v43 = vsel %vm1137_vm1, %v1138_v30, %v1139_v7  ;;  %v1145_v5 = vsel %vm1137_vm1, %v1139_v7, 0.0  ;;  %v1219_v22 = vpop.permute.xlu0 %1218  ;;  %v1173_v24 = vpop.permute.xlu1 %1172 }
 0x35e   : > { %1193 = vst.msk [vmem:[#allocation2 + $0x28] sm:$0x3f] %vm1149_vm6, %v1189_v40  ;;  %1150 = vst.msk [vmem:[#allocation2 + $0x10] sm:$0x3f] %vm1149_vm6, %v1145_v5  ;;  %v1223_v1 = vsel %vm426_vm2, 0.0, %v1219_v22  ;;  %v1178_v21 = vsel %vm428_vm3, 0.0, %v1173_v24  ;;  %v1430_v22 = vstv %s3786_s22 }
 0x35f   : > { %1148 = vst.msk [vmem:[#allocation2 + $0x8] sm:$0xff] %vm1146_vm5, %v1140_v43  ;;  %v1227_v10 = vrot.slane %v1223_v1, 5  ;;  %v1182_v6 = vrot.slane %v1178_v21, 5  ;;  %v1422_v1 = vstv %s3788_s23  ;;  %s3886_s22 = sld [smem:[#allocation8 + $0x7]] }
 0x360   : > { %s3889_s23 = sld [smem:[#allocation8 + $0x38]] }
 0x361   : > { %v1233_v39 = vsel %vm1137_vm1, %v1227_v10, 0.0  ;;  %v1184_v59 = vsel %vm1137_vm1, %v1182_v6, %v1183_v36  ;;  %v1188_v44 = vsel %vm1137_vm1, 0.0, %v1182_v6  ;;  %v1287_v49 = vpop.permute.xlu0 %1286  ;;  %v1217_v34 = vpop.permute.xlu1 %1216  ;;  %v1420_v21 = vld [vmem:[#allocation2] sm:$0xff] }
 0x362   : > { %1237 = vst.msk [vmem:[#allocation2 + $0x40] sm:$0x3f] %vm1149_vm6, %v1233_v39  ;;  %v1292_v35 = vsel %vm1290_vm7, %v1287_v49, 0.0  ;;  %v1222_v16 = vsel %vm426_vm2, 0.0, %v1217_v34  ;;  %v1438_v39 = vstv %s3792_s5  ;;  %s3892_s5 = sld [smem:[#allocation8 + $0x8]] }
 0x363   : > { %1191 = vst.msk [vmem:[#allocation2 + $0x18] sm:$0xff] %vm1146_vm5, %v1188_v44  ;;  %1192 = vst.msk [vmem:[#allocation2 + $0x20] sm:$0xff] %vm1146_vm5, %v1184_v59  ;;  %v1296_v46 = vrot.slane %v1292_v35, 5  ;;  %v1226_v31 = vrot.slane %v1222_v16, 5 }
 0x365   : > { %v1302_v25 = vsel %vm1137_vm1, %v1296_v46, 0.0  ;;  %v1228_v57 = vsel %vm1137_vm1, %v1226_v31, %v1227_v10  ;;  %v1232_v58 = vsel %vm1137_vm1, 0.0, %v1226_v31  ;;  %v1332_v11 = vpop.permute.xlu0 %1331  ;;  %v1285_v26 = vpop.permute.xlu1 %1284 }
 0x366   : > { %1306 = vst.msk [vmem:[#allocation2 + $0x70] sm:$0x3f] %vm1149_vm6, %v1302_v25  ;;  %v1337_v51 = vsel %vm1335_vm8, %v1332_v11, 0.0  ;;  %v1291_v13 = vsel %vm1290_vm7, %v1285_v26, 0.0  ;;  %v1421_v5 = vld [vmem:[#allocation2 + $0x8] sm:$0xff] }
 0x367   : > { %1235 = vst.msk [vmem:[#allocation2 + $0x30] sm:$0xff] %vm1146_vm5, %v1232_v58  ;;  %1236 = vst.msk [vmem:[#allocation2 + $0x38] sm:$0xff] %vm1146_vm5, %v1228_v57  ;;  %v1341_v9 = vrot.slane %v1337_v51, 5  ;;  %v1295_v15 = vrot.slane %v1291_v13, 5  ;;  %v1424_v35 = vmul.f32 %v1422_v1, %v1421_v5  ;;  %v1423_v57 = vmul.f32 %v1422_v1, %v1420_v21 }
 0x368   : > { %v1446_v51 = vstv %s3800_s10  ;;  %s3894_s10 = sld [smem:[#allocation8 + $0x39]] }
 0x369   : > { %v1347_v4 = vsel %vm1137_vm1, %v1341_v9, 0.0  ;;  %v1154_v42 = vpop.permute.xlu0 %1153  ;;  %v1330_v14 = vpop.permute.xlu1 %1329  ;;  %v1297_v61 = vsel %vm1137_vm1, %v1295_v15, %v1296_v46  ;;  %v1301_v55 = vsel %vm1137_vm1, 0.0, %v1295_v15 }
 0x36a   : > { %1351 = vst.msk [vmem:[#allocation2 + $0x88] sm:$0x3f] %vm1149_vm6, %v1347_v4  ;;  %v1158_v41 = vsel %vm430_vm4, 0.0, %v1154_v42  ;;  %v1336_v62 = vsel %vm1335_vm8, %v1330_v14, 0.0  ;;  %v1437_v59 = vld [vmem:[#allocation2 + $0x20] sm:$0xff]  ;;  %v1436_v16 = vld [vmem:[#allocation2 + $0x18] sm:$0xff] }
 0x36b   : > { %1305 = vst.msk [vmem:[#allocation2 + $0x68] sm:$0xff] %vm1146_vm5, %v1297_v61  ;;  %1304 = vst.msk [vmem:[#allocation2 + $0x60] sm:$0xff] %vm1146_vm5, %v1301_v55  ;;  %v1162_v18 = vrot.slane %v1158_v41, 5  ;;  %v1340_v52 = vrot.slane %v1336_v62, 5  ;;  %v1440_v11 = vmul.f32 %v1438_v39, %v1437_v59  ;;  %v1439_v13 = vmul.f32 %v1438_v39, %v1436_v16 }
 0x36d   : > { %v1197_v56 = vpop.permute.xlu0 %1196  ;;  %v1152_v17 = vpop.permute.xlu1 %1151  ;;  %v1168_v60 = vsel %vm1137_vm1, %v1162_v18, 0.0  ;;  %v1342_v19 = vsel %vm1137_vm1, %v1340_v52, %v1341_v9  ;;  %v1346_v20 = vsel %vm1137_vm1, 0.0, %v1340_v52 }
 0x36e   : > { %1171 = vst.msk [vmem:[#allocation3 + $0x10] sm:$0x3f] %vm1149_vm6, %v1168_v60  ;;  %v1201_v27 = vsel %vm428_vm3, 0.0, %v1197_v56  ;;  %v1157_v23 = vsel %vm430_vm4, 0.0, %v1152_v17  ;;  %v1454_v56 = vstv %s3814_s26  ;;  %v1453_v17 = vld [vmem:[#allocation2 + $0x38] sm:$0xff]  ;;  %v1452_v52 = vld [vmem:[#allocation2 + $0x30] sm:$0xff] }
 0x36f   : > { %1349 = vst.msk [vmem:[#allocation2 + $0x78] sm:$0xff] %vm1146_vm5, %v1346_v20  ;;  %1350 = vst.msk [vmem:[#allocation2 + $0x80] sm:$0xff] %vm1146_vm5, %v1342_v19  ;;  %v1205_v2 = vrot.slane %v1201_v27, 5  ;;  %v1161_v3 = vrot.slane %v1157_v23, 5  ;;  %v1456_v27 = vmul.f32 %v1454_v56, %v1453_v17  ;;  %v1462_v19 = vstv %s3828_s29  ;;  %s3898_s26 = sld [smem:[#allocation8 + $0x9]] }
 0x370   : > { %v1455_v23 = vmul.f32 %v1454_v56, %v1452_v52  ;;  %s3901_s29 = sld [smem:[#allocation8 + $0x3a]] }
 0x371   : > { %v1241_v12 = vpop.permute.xlu0 %1240  ;;  %v1195_v50 = vpop.permute.xlu1 %1194  ;;  %v1211_v53 = vsel %vm1137_vm1, %v1205_v2, 0.0  ;;  %v1163_v37 = vsel %vm1137_vm1, %v1161_v3, %v1162_v18  ;;  %v1167_v29 = vsel %vm1137_vm1, 0.0, %v1161_v3 }
 0x372   : > { %v1245_v54 = vsel %vm426_vm2, 0.0, %v1241_v12  ;;  %1215 = vst.msk [vmem:[#allocation3 + $0x28] sm:$0x3f] %vm1149_vm6, %v1211_v53  ;;  %v1200_v8 = vsel %vm428_vm3, 0.0, %v1195_v50 }
 0x373   : > { %1170 = vst.msk [vmem:[#allocation3 + $0x8] sm:$0xff] %vm1146_vm5, %v1163_v37  ;;  %1169 = vst.msk [vmem:[#allocation3] sm:$0xff] %vm1146_vm5, %v1167_v29  ;;  %v1249_v30 = vrot.slane %v1245_v54, 5  ;;  %v1204_v47 = vrot.slane %v1200_v8, 5  ;;  %v1470_v8 = vstv %s3836_s20  ;;  %s3907_s20 = sld [smem:[#allocation8 + $0x3b]] }
 0x375   : > { %v1377_v28 = vpop.permute.xlu0 %1376  ;;  %v1239_v63 = vpop.permute.xlu1 %1238  ;;  %v1255_v45 = vsel %vm1137_vm1, %v1249_v30, 0.0  ;;  %v1206_v40 = vsel %vm1137_vm1, %v1204_v47, %v1205_v2  ;;  %v1210_v24 = vsel %vm1137_vm1, 0.0, %v1204_v47  ;;  %v1478_v47 = vstv %s3833_s9  ;;  %s3903_s9 = sld [smem:[#allocation8 + $0xa]] }
 0x376   : > { %v3803_v48 = vsel %vm1380_vm9, %v1377_v28, 0.0  ;;  %v1244_v0 = vsel %vm426_vm2, 0.0, %v1239_v63  ;;  %1259 = vst.msk [vmem:[#allocation3 + $0x40] sm:$0x3f] %vm1149_vm6, %v1255_v45  ;;  %v1500_v52 = vld [vmem:[#allocation2 + $0x78] sm:$0xff] }
 0x377   : > { %v1386_v36 = vrot.slane %v3803_v48, 5  ;;  %v1248_v7 = vrot.slane %v1244_v0, 5  ;;  %1214 = vst.msk [vmem:[#allocation3 + $0x20] sm:$0xff] %vm1146_vm5, %v1206_v40  ;;  %1213 = vst.msk [vmem:[#allocation3 + $0x18] sm:$0xff] %vm1146_vm5, %v1210_v24  ;;  %v1476_v48 = vld [vmem:[#allocation3 + $0x48] sm:$0xff] }
 0x379   : > { %v1310_v43 = vpop.permute.xlu0 %1309  ;;  %v1392_v10 = vsel %vm1137_vm1, %v1386_v36, 0.0  ;;  %v1375_v6 = vpop.permute.xlu1 %1374  ;;  %v1250_v49 = vsel %vm1137_vm1, %v1248_v7, %v1249_v30  ;;  %v1254_v25 = vsel %vm1137_vm1, 0.0, %v1248_v7  ;;  %v1468_v30 = vld [vmem:[#allocation2 + $0x48] sm:$0xff] }
 0x37a   : > { %v1429_v44 = vld [vmem:[#allocation3 + $0x8] sm:$0xff]  ;;  %1396 = vst.msk [vmem:[#allocation2 + $0xa0] sm:$0x3f] %vm1149_vm6, %v1392_v10  ;;  %v3824_v34 = vsel %vm1290_vm7, %v1310_v43, 0.0  ;;  %v1428_v46 = vld [vmem:[#allocation3] sm:$0xff]  ;;  %v1381_v63 = vsel %vm1380_vm9, %v1375_v6, 0.0 }
 0x37b   : > { %v1432_v31 = vmul.f32 %v1430_v22, %v1429_v44  ;;  %1258 = vst.msk [vmem:[#allocation3 + $0x38] sm:$0xff] %vm1146_vm5, %v1250_v49  ;;  %v1431_v58 = vmul.f32 %v1430_v22, %v1428_v46  ;;  %1257 = vst.msk [vmem:[#allocation3 + $0x30] sm:$0xff] %vm1146_vm5, %v1254_v25  ;;  %v1318_v9 = vrot.slane %v3824_v34, 5  ;;  %v1385_v0 = vrot.slane %v1381_v63, 5  ;;  %v1469_v22 = vld [vmem:[#allocation2 + $0x50] sm:$0xff] }
 0x37c   : > { %v1471_v44 = vmul.f32 %v1470_v8, %v1468_v30  ;;  %v1472_v16 = vmul.f32 %v1470_v8, %v1469_v22  ;;  %v1526_v22 = vstv %s3884_s14  ;;  %s3925_s14 = sld [smem:[#allocation8 + $0x3e]] }
 0x37d   : > { %v1434_v26 = vadd.f32 %v1432_v31, %v1424_v35  ;;  %v1433_v4 = vadd.f32 %v1431_v58, %v1423_v57  ;;  %v1308_v15 = vpop.permute.xlu1 %1307  ;;  %v1324_v62 = vsel %vm1137_vm1, %v1318_v9, 0.0  ;;  %v1355_v60 = vpop.permute.xlu0 %1354  ;;  %v1387_v10 = vsel %vm1137_vm1, %v1385_v0, %v1386_v36  ;;  %v1477_v57 = vld [vmem:[#allocation3 + $0x50] sm:$0xff] }
 0x37e   : > { %v1445_v14 = vld [vmem:[#allocation3 + $0x20] sm:$0xff]  ;;  %v1444_v61 = vld [vmem:[#allocation3 + $0x18] sm:$0xff]  ;;  %1328 = vst.msk [vmem:[#allocation3 + $0x70] sm:$0x3f] %vm1149_vm6, %v1324_v62  ;;  %v1359_v45 = vsel %vm1335_vm8, %v1355_v60, 0.0  ;;  %v1313_v7 = vsel %vm1290_vm7, %v1308_v15, 0.0  ;;  %v1480_v15 = vmul.f32 %v1478_v47, %v1477_v57  ;;  %v1502_v60 = vstv %s3867_s12 }
 0x37f   : > { %v1442_v42 = vadd.f32 %v1440_v11, %v1434_v26  ;;  %v1441_v41 = vadd.f32 %v1439_v13, %v1433_v4  ;;  %v1448_v55 = vmul.f32 %v1446_v51, %v1445_v14  ;;  %v1447_v18 = vmul.f32 %v1446_v51, %v1444_v61  ;;  %1395 = vst.msk [vmem:[#allocation2 + $0x98] sm:$0xff] %vm1146_vm5, %v1387_v10  ;;  %v1484_v14 = vld [vmem:[#allocation2 + $0x60] sm:$0xff]  ;;  %v1533_v10 = vld [vmem:[#allocation2 + $0x9] sm:$0xff]  ;;  %s3916_s12 = sld [smem:[#allocation8 + $0xc]] }
 0x380   : > { %v1363_v24 = vrot.slane %v1359_v45, 5  ;;  %v1317_v1 = vrot.slane %v1313_v7, 5  ;;  %v1391_v6 = vsel %vm1137_vm1, 0.0, %v1385_v0  ;;  %v1550_v57 = vstv %s3892_s5  ;;  %s3933_s5 = sld [smem:[#allocation8 + $0xf]] }
 0x381   : > { %v1450_v12 = vadd.f32 %v1448_v55, %v1442_v42  ;;  %v1449_v50 = vadd.f32 %v1447_v18, %v1441_v41  ;;  %v1353_v3 = vpop.permute.xlu1 %1352  ;;  %v1400_v29 = vpop.permute.xlu0 %1399  ;;  %1394 = vst.msk [vmem:[#allocation2 + $0x90] sm:$0xff] %vm1146_vm5, %v1391_v6  ;;  %v1486_v42 = vstv %s3844_s25  ;;  %v1485_v41 = vld [vmem:[#allocation2 + $0x68] sm:$0xff]  ;;  %v1494_v18 = vstv %s3860_s30  ;;  %s3910_s25 = sld [smem:[#allocation8 + $0xb]] }
 0x382   : > { %v1460_v20 = vld [vmem:[#allocation3 + $0x30] sm:$0xff]  ;;  %v1461_v2 = vld [vmem:[#allocation3 + $0x38] sm:$0xff]  ;;  %v1404_v40 = vsel %vm1380_vm9, %v1400_v29, 0.0  ;;  %v1358_v59 = vsel %vm1335_vm8, %v1353_v3, 0.0  ;;  %v1369_v49 = vsel %vm1137_vm1, %v1363_v24, 0.0  ;;  %v1319_v34 = vsel %vm1137_vm1, %v1317_v1, %v1318_v9  ;;  %s3913_s30 = sld [smem:[#allocation8 + $0x3c]] }
 0x383   : > { %v1458_v53 = vadd.f32 %v1456_v27, %v1450_v12  ;;  %v1457_v54 = vadd.f32 %v1455_v23, %v1449_v50  ;;  %v1463_v28 = vmul.f32 %v1462_v19, %v1460_v20  ;;  %v1464_v37 = vmul.f32 %v1462_v19, %v1461_v2  ;;  %1373 = vst.msk [vmem:[#allocation3 + $0x88] sm:$0x3f] %vm1149_vm6, %v1369_v49  ;;  %v1501_v27 = vld [vmem:[#allocation2 + $0x80] sm:$0xff] }
 0x384   : > { %v1408_v39 = vrot.slane %v1404_v40, 5  ;;  %v1323_v35 = vsel %vm1137_vm1, 0.0, %v1317_v1  ;;  %1327 = vst.msk [vmem:[#allocation3 + $0x68] sm:$0xff] %vm1146_vm5, %v1319_v34  ;;  %v1362_v46 = vrot.slane %v1358_v59, 5  ;;  %v1479_v9 = vmul.f32 %v1478_v47, %v1476_v48  ;;  %v1541_v48 = vld [vmem:[#allocation3 + $0x9] sm:$0xff] }
 0x385   : > { %v1465_v43 = vadd.f32 %v1463_v28, %v1457_v54  ;;  %v1466_v5 = vadd.f32 %v1464_v37, %v1458_v53  ;;  %v1398_v21 = vpop.permute.xlu1 %1397  ;;  %1326 = vst.msk [vmem:[#allocation3 + $0x60] sm:$0xff] %vm1146_vm5, %v1323_v35  ;;  %v1487_v56 = vmul.f32 %v1486_v42, %v1484_v14  ;;  %v1488_v17 = vmul.f32 %v1486_v42, %v1485_v41  ;;  %v1556_v42 = vld [vmem:[#allocation3 + $0x19] sm:$0xff]  ;;  %v1557_v14 = vld [vmem:[#allocation3 + $0x21] sm:$0xff] }
 0x386   : > { %v1414_v36 = vsel %vm1137_vm1, %v1408_v39, 0.0  ;;  %v1403_v31 = vsel %vm1380_vm9, %v1398_v21, 0.0  ;;  %v1364_v26 = vsel %vm1137_vm1, %v1362_v46, %v1363_v24  ;;  %v1368_v51 = vsel %vm1137_vm1, 0.0, %v1362_v46  ;;  %v1517_v47 = vld [vmem:[#allocation2 + $0x98] sm:$0xff]  ;;  %v1532_v24 = vld [vmem:[#allocation2 + $0x1] sm:$0xff] }
 0x387   : > { %v1473_v25 = vadd.f32 %v1471_v44, %v1465_v43  ;;  %1418 = vst.msk [vmem:[#allocation3 + $0xa0] sm:$0x3f] %vm1149_vm6, %v1414_v36  ;;  %v1407_v58 = vrot.slane %v1403_v31, 5  ;;  %v1474_v11 = vadd.f32 %v1472_v16, %v1466_v5  ;;  %v1503_v23 = vmul.f32 %v1502_v60, %v1500_v52  ;;  %v1540_v16 = vld [vmem:[#allocation3 + $0x1] sm:$0xff] }
 0x388   : > { %1371 = vst.msk [vmem:[#allocation3 + $0x78] sm:$0xff] %vm1146_vm5, %v1368_v51  ;;  %1372 = vst.msk [vmem:[#allocation3 + $0x80] sm:$0xff] %vm1146_vm5, %v1364_v26  ;;  %v1510_v53 = vstv %s3878_s8  ;;  %v1504_v54 = vmul.f32 %v1502_v60, %v1501_v27  ;;  %v1518_v37 = vstv %s3880_s13  ;;  %v1516_v63 = vld [vmem:[#allocation2 + $0x90] sm:$0xff]  ;;  %v1534_v21 = vstv %s3886_s22  ;;  %v1572_v27 = vld [vmem:[#allocation3 + $0x31] sm:$0xff]  ;;  %s3918_s8 = sld [smem:[#allocation8 + $0x3d]] }
 0x389   : > { %v1409_v13 = vsel %vm1137_vm1, %v1407_v58, %v1408_v39  ;;  %v1413_v4 = vsel %vm1137_vm1, 0.0, %v1407_v58  ;;  %v1481_v61 = vadd.f32 %v1479_v9, %v1473_v25  ;;  %v1482_v55 = vadd.f32 %v1480_v15, %v1474_v11  ;;  %v1548_v58 = vld [vmem:[#allocation2 + $0x19] sm:$0xff]  ;;  %v1549_v11 = vld [vmem:[#allocation2 + $0x21] sm:$0xff]  ;;  %s3922_s13 = sld [smem:[#allocation8 + $0xd]] }
 0x38a   : > { %1416 = vst.msk [vmem:[#allocation3 + $0x90] sm:$0xff] %vm1146_vm5, %v1413_v4  ;;  %1417 = vst.msk [vmem:[#allocation3 + $0x98] sm:$0xff] %vm1146_vm5, %v1409_v13  ;;  %v1519_v40 = vmul.f32 %v1518_v37, %v1516_v63  ;;  %v1520_v1 = vmul.f32 %v1518_v37, %v1517_v47  ;;  %v1542_v35 = vstv %s3889_s23  ;;  %v1535_v36 = vmul.f32 %v1534_v21, %v1532_v24  ;;  %v1589_v47 = vld [vmem:[#allocation3 + $0x51] sm:$0xff]  ;;  %v1597_v24 = vld [vmem:[#allocation2 + $0x69] sm:$0xff]  ;;  %s3927_s22 = sld [smem:[#allocation8 + $0xe]] }
 0x38b   : > { %v1489_v62 = vadd.f32 %v1487_v56, %v1481_v61  ;;  %v1490_v12 = vadd.f32 %v1488_v17, %v1482_v55  ;;  %v1493_v19 = vld [vmem:[#allocation3 + $0x68] sm:$0xff]  ;;  %v1536_v46 = vmul.f32 %v1534_v21, %v1533_v10  ;;  %v1543_v26 = vmul.f32 %v1542_v35, %v1540_v16  ;;  %s3930_s23 = sld [smem:[#allocation8 + $0x3f]] }
 0x38c   : > { %v1492_v50 = vld [vmem:[#allocation3 + $0x60] sm:$0xff]  ;;  %v1496_v2 = vmul.f32 %v1494_v18, %v1493_v19  ;;  %v1544_v51 = vmul.f32 %v1542_v35, %v1541_v48  ;;  %v1558_v4 = vstv %s3894_s10  ;;  %v1551_v15 = vmul.f32 %v1550_v57, %v1548_v58  ;;  %v1564_v17 = vld [vmem:[#allocation2 + $0x31] sm:$0xff]  ;;  %s3936_s10 = sld [smem:[#allocation8 + $0x40]] }
 0x38d   : > { %v1495_v20 = vmul.f32 %v1494_v18, %v1492_v50  ;;  %v1552_v41 = vmul.f32 %v1550_v57, %v1549_v11  ;;  %v1566_v56 = vstv %s3898_s26  ;;  %v1565_v18 = vld [vmem:[#allocation2 + $0x39] sm:$0xff]  ;;  %v1560_v60 = vmul.f32 %v1558_v4, %v1557_v14  ;;  %v1573_v19 = vld [vmem:[#allocation3 + $0x39] sm:$0xff]  ;;  %s3940_s26 = sld [smem:[#allocation8 + $0x10]] }
 0x38e   : > { %v1498_v28 = vadd.f32 %v1496_v2, %v1490_v12  ;;  %v1574_v50 = vstv %s3901_s29  ;;  %v1568_v2 = vmul.f32 %v1566_v56, %v1565_v18  ;;  %v1614_v48 = vstv %s3916_s12  ;;  %s3943_s29 = sld [smem:[#allocation8 + $0x41]] }
 0x38f   : > { %v1497_v3 = vadd.f32 %v1495_v20, %v1489_v62  ;;  %v1508_v30 = vld [vmem:[#allocation3 + $0x78] sm:$0xff]  ;;  %v1509_v8 = vld [vmem:[#allocation3 + $0x80] sm:$0xff]  ;;  %v1559_v62 = vmul.f32 %v1558_v4, %v1556_v42  ;;  %v1567_v20 = vmul.f32 %v1566_v56, %v1564_v17  ;;  %v1575_v37 = vmul.f32 %v1574_v50, %v1572_v27  ;;  %s3958_s12 = sld [smem:[#allocation8 + $0x13]] }
 0x390   : > { %v1506_v0 = vadd.f32 %v1504_v54, %v1498_v28  ;;  %v1511_v45 = vmul.f32 %v1510_v53, %v1508_v30  ;;  %v1512_v7 = vmul.f32 %v1510_v53, %v1509_v8  ;;  %v1582_v53 = vstv %s3903_s9  ;;  %v1581_v54 = vld [vmem:[#allocation2 + $0x51] sm:$0xff]  ;;  %v1580_v28 = vld [vmem:[#allocation2 + $0x49] sm:$0xff]  ;;  %s3945_s9 = sld [smem:[#allocation8 + $0x11]] }
 0x391   : > { %v1505_v29 = vadd.f32 %v1503_v23, %v1497_v3  ;;  %v1524_v39 = vld [vmem:[#allocation3 + $0x90] sm:$0xff]  ;;  %v1525_v59 = vld [vmem:[#allocation3 + $0x98] sm:$0xff]  ;;  %v1576_v63 = vmul.f32 %v1574_v50, %v1573_v19  ;;  %v1622_v11 = vstv %s3918_s8  ;;  %v1630_v14 = vstv %s3922_s13  ;;  %s3960_s8 = sld [smem:[#allocation8 + $0x44]] }
 0x392   : > { %v1514_v5 = vadd.f32 %v1512_v7, %v1506_v0  ;;  %v1527_v49 = vmul.f32 %v1526_v22, %v1524_v39  ;;  %v1528_v34 = vmul.f32 %v1526_v22, %v1525_v59  ;;  %v1588_v8 = vld [vmem:[#allocation3 + $0x49] sm:$0xff]  ;;  %v1590_v0 = vstv %s3907_s20  ;;  %v1596_v22 = vld [vmem:[#allocation2 + $0x61] sm:$0xff]  ;;  %v1604_v59 = vld [vmem:[#allocation3 + $0x61] sm:$0xff]  ;;  %s3949_s20 = sld [smem:[#allocation8 + $0x42]] }
 0x393   : > { %v1513_v43 = vadd.f32 %v1511_v45, %v1505_v29  ;;  %v1584_v45 = vmul.f32 %v1582_v53, %v1581_v54  ;;  %v1592_v21 = vmul.f32 %v1590_v0, %v1589_v47  ;;  %v1606_v39 = vstv %s3913_s30  ;;  %s3955_s30 = sld [smem:[#allocation8 + $0x43]] }
 0x394   : > { %v1522_v44 = vadd.f32 %v1520_v1, %v1514_v5  ;;  %v1598_v5 = vstv %s3910_s25  ;;  %v1591_v1 = vmul.f32 %v1590_v0, %v1588_v8  ;;  %v1638_v18 = vstv %s3925_s14  ;;  %s3952_s25 = sld [smem:[#allocation8 + $0x12]] }
 0x395   : > { %v1521_v6 = vadd.f32 %v1519_v40, %v1513_v43  ;;  %v1583_v43 = vmul.f32 %v1582_v53, %v1580_v28  ;;  %v1646_v19 = vstv %s3927_s22  ;;  %v1654_v28 = vstv %s3930_s23  ;;  %s3964_s13 = sld [smem:[#allocation8 + $0x14]] }
 0x396   : > { %v1530_v25 = vadd.f32 %v1528_v34, %v1522_v44  ;;  %v1605_v44 = vld [vmem:[#allocation3 + $0x69] sm:$0xff]  ;;  %v1600_v34 = vmul.f32 %v1598_v5, %v1597_v24  ;;  %v1662_v0 = vstv %s3933_s5  ;;  %v1670_v24 = vstv %s3936_s10  ;;  %s3967_s14 = sld [smem:[#allocation8 + $0x45]] }
 0x397   : > { %v1529_v31 = vadd.f32 %v1527_v49, %v1521_v6  ;;  %v1599_v49 = vmul.f32 %v1598_v5, %v1596_v22  ;;  %s3969_s22 = sld [smem:[#allocation8 + $0x15]] }
 0x398   : > { %v1538_v13 = vadd.f32 %v1536_v46, %v1530_v25  ;;  %v1613_v46 = vld [vmem:[#allocation2 + $0x81] sm:$0xff]  ;;  %v1608_v25 = vmul.f32 %v1606_v39, %v1605_v44  ;;  %v1678_v44 = vstv %s3940_s26  ;;  %s3972_s23 = sld [smem:[#allocation8 + $0x46]] }
 0x399   : > { %v1537_v9 = vadd.f32 %v1535_v36, %v1529_v31  ;;  %v1612_v36 = vld [vmem:[#allocation2 + $0x79] sm:$0xff]  ;;  %v1607_v31 = vmul.f32 %v1606_v39, %v1604_v59  ;;  %s3975_s5 = sld [smem:[#allocation8 + $0x16]] }
 0x39a   : > { %v1546_v55 = vadd.f32 %v1544_v51, %v1538_v13  ;;  %v1621_v51 = vld [vmem:[#allocation3 + $0x81] sm:$0xff]  ;;  %v1616_v13 = vmul.f32 %v1614_v48, %v1613_v46  ;;  %v1686_v46 = vstv %s3943_s29  ;;  %s3978_s10 = sld [smem:[#allocation8 + $0x47]] }
 0x39b   : > { %v1545_v61 = vadd.f32 %v1543_v26, %v1537_v9  ;;  %v1620_v26 = vld [vmem:[#allocation3 + $0x79] sm:$0xff]  ;;  %v1615_v9 = vmul.f32 %v1614_v48, %v1612_v36  ;;  %s3982_s26 = sld [smem:[#allocation8 + $0x17]] }
 0x39c   : > { %v1554_v12 = vadd.f32 %v1552_v41, %v1546_v55  ;;  %v1629_v41 = vld [vmem:[#allocation2 + $0x99] sm:$0xff]  ;;  %v1624_v55 = vmul.f32 %v1622_v11, %v1621_v51  ;;  %v1694_v51 = vstv %s3945_s9  ;;  %s3985_s29 = sld [smem:[#allocation8 + $0x48]] }
 0x39d   : > { %v1553_v52 = vadd.f32 %v1551_v15, %v1545_v61  ;;  %v1628_v15 = vld [vmem:[#allocation2 + $0x91] sm:$0xff]  ;;  %v1623_v61 = vmul.f32 %v1622_v11, %v1620_v26  ;;  %s3987_s9 = sld [smem:[#allocation8 + $0x18]] }
 0x39e   : > { %v1562_v3 = vadd.f32 %v1560_v60, %v1554_v12  ;;  %v1637_v60 = vld [vmem:[#allocation3 + $0x99] sm:$0xff]  ;;  %v1632_v12 = vmul.f32 %v1630_v14, %v1629_v41  ;;  %v1700_v41 = vld [vmem:[#allocation3 + $0x4a] sm:$0xff] }
 0x39f   : > { %v1561_v23 = vadd.f32 %v1559_v62, %v1553_v52  ;;  %v1636_v62 = vld [vmem:[#allocation3 + $0x91] sm:$0xff]  ;;  %v1631_v52 = vmul.f32 %v1630_v14, %v1628_v15  ;;  %v1640_v54 = vmul.f32 %v1638_v18, %v1637_v60  ;;  %v1710_v60 = vstv %s3952_s25  ;;  %s3994_s25 = sld [smem:[#allocation8 + $0x19]] }
 0x3a0   : > { %v1570_v30 = vadd.f32 %v1568_v2, %v1562_v3  ;;  %v1645_v2 = vld [vmem:[#allocation2 + $0xa] sm:$0xff]  ;;  %v1639_v53 = vmul.f32 %v1638_v18, %v1636_v62 }
 0x3a1   : > { %v1569_v29 = vadd.f32 %v1567_v20, %v1561_v23  ;;  %v1644_v20 = vld [vmem:[#allocation2 + $0x2] sm:$0xff] }
 0x3a2   : > { %v1578_v40 = vadd.f32 %v1576_v63, %v1570_v30  ;;  %v1653_v63 = vld [vmem:[#allocation3 + $0xa] sm:$0xff]  ;;  %v1648_v30 = vmul.f32 %v1646_v19, %v1645_v2  ;;  %v1718_v2 = vstv %s3955_s30  ;;  %s3997_s30 = sld [smem:[#allocation8 + $0x4a]] }
 0x3a3   : > { %v1577_v7 = vadd.f32 %v1575_v37, %v1569_v29  ;;  %v1652_v37 = vld [vmem:[#allocation3 + $0x2] sm:$0xff]  ;;  %v1647_v29 = vmul.f32 %v1646_v19, %v1644_v20 }
 0x3a4   : > { %v1586_v6 = vadd.f32 %v1584_v45, %v1578_v40  ;;  %v1660_v45 = vld [vmem:[#allocation2 + $0x1a] sm:$0xff]  ;;  %v1655_v40 = vmul.f32 %v1654_v28, %v1652_v37 }
 0x3a5   : > { %v1585_v10 = vadd.f32 %v1583_v43, %v1577_v7  ;;  %v1661_v7 = vld [vmem:[#allocation2 + $0x22] sm:$0xff]  ;;  %v1656_v43 = vmul.f32 %v1654_v28, %v1653_v63  ;;  %v1726_v63 = vstv %s3958_s12  ;;  %s4000_s12 = sld [smem:[#allocation8 + $0x1a]] }
 0x3a6   : > { %v1594_v16 = vadd.f32 %v1592_v21, %v1586_v6  ;;  %v1669_v21 = vld [vmem:[#allocation3 + $0x22] sm:$0xff]  ;;  %v1664_v6 = vmul.f32 %v1662_v0, %v1661_v7  ;;  %v1734_v7 = vstv %s3960_s8  ;;  %s4002_s8 = sld [smem:[#allocation8 + $0x4b]] }
 0x3a7   : > { %v1593_v35 = vadd.f32 %v1591_v1, %v1585_v10  ;;  %v1668_v1 = vld [vmem:[#allocation3 + $0x1a] sm:$0xff]  ;;  %v1663_v10 = vmul.f32 %v1662_v0, %v1660_v45 }
 0x3a8   : > { %v1602_v58 = vadd.f32 %v1600_v34, %v1594_v16  ;;  %v1677_v34 = vld [vmem:[#allocation2 + $0x3a] sm:$0xff]  ;;  %v1672_v16 = vmul.f32 %v1670_v24, %v1669_v21  ;;  %v1742_v21 = vstv %s3964_s13  ;;  %s4006_s13 = sld [smem:[#allocation8 + $0x1b]] }
 0x3a9   : > { %v1601_v57 = vadd.f32 %v1599_v49, %v1593_v35  ;;  %v1676_v49 = vld [vmem:[#allocation2 + $0x32] sm:$0xff]  ;;  %v1671_v35 = vmul.f32 %v1670_v24, %v1668_v1 }
 0x3aa   : > { %v1610_v42 = vadd.f32 %v1608_v25, %v1602_v58  ;;  %v1685_v25 = vld [vmem:[#allocation3 + $0x3a] sm:$0xff]  ;;  %v1680_v58 = vmul.f32 %v1678_v44, %v1677_v34  ;;  %v1750_v34 = vstv %s3967_s14  ;;  %s4009_s14 = sld [smem:[#allocation8 + $0x4c]] }
 0x3ab   : > { %v1609_v4 = vadd.f32 %v1607_v31, %v1601_v57  ;;  %v1684_v31 = vld [vmem:[#allocation3 + $0x32] sm:$0xff]  ;;  %v1679_v57 = vmul.f32 %v1678_v44, %v1676_v49 }
 0x3ac   : > { %v1618_v17 = vadd.f32 %v1616_v13, %v1610_v42  ;;  %v1692_v13 = vld [vmem:[#allocation2 + $0x4a] sm:$0xff]  ;;  %v1688_v42 = vmul.f32 %v1686_v46, %v1685_v25  ;;  %v1758_v25 = vstv %s3969_s22  ;;  %s4011_s22 = sld [smem:[#allocation8 + $0x1c]] }
 0x3ad   : > { %v1617_v56 = vadd.f32 %v1615_v9, %v1609_v4  ;;  %v1693_v9 = vld [vmem:[#allocation2 + $0x52] sm:$0xff]  ;;  %v1687_v4 = vmul.f32 %v1686_v46, %v1684_v31  ;;  %v1695_v62 = vmul.f32 %v1694_v51, %v1692_v13  ;;  %v1766_v13 = vstv %s3972_s23  ;;  %s4014_s23 = sld [smem:[#allocation8 + $0x4d]] }
 0x3ae   : > { %v1626_v27 = vadd.f32 %v1624_v55, %v1618_v17  ;;  %v1702_v55 = vstv %s3949_s20  ;;  %s3991_s20 = sld [smem:[#allocation8 + $0x49]] }
 0x3af   : > { %v1625_v50 = vadd.f32 %v1623_v61, %v1617_v56  ;;  %v1701_v61 = vld [vmem:[#allocation3 + $0x52] sm:$0xff]  ;;  %v1696_v56 = vmul.f32 %v1694_v51, %v1693_v9 }
 0x3b0   : > { %v1634_v3 = vadd.f32 %v1632_v12, %v1626_v27  ;;  %v1709_v12 = vld [vmem:[#allocation2 + $0x6a] sm:$0xff]  ;;  %v1704_v27 = vmul.f32 %v1702_v55, %v1701_v61 }
 0x3b1   : > { %v1633_v23 = vadd.f32 %v1631_v52, %v1625_v50  ;;  %v1708_v52 = vld [vmem:[#allocation2 + $0x62] sm:$0xff]  ;;  %v1703_v50 = vmul.f32 %v1702_v55, %v1700_v41  ;;  %v1774_v55 = vstv %s3975_s5  ;;  %s4017_s5 = sld [smem:[#allocation8 + $0x1d]] }
 0x3b2   : > { %v1642_v47 = vadd.f32 %v1640_v54, %v1634_v3  ;;  %v1717_v3 = vld [vmem:[#allocation3 + $0x6a] sm:$0xff]  ;;  %v1712_v54 = vmul.f32 %v1710_v60, %v1709_v12  ;;  %v1782_v12 = vstv %s3978_s10  ;;  %s4020_s10 = sld [smem:[#allocation8 + $0x4e]] }
 0x3b3   : > { %v1641_v8 = vadd.f32 %v1639_v53, %v1633_v23  ;;  %v1716_v23 = vld [vmem:[#allocation3 + $0x62] sm:$0xff]  ;;  %v1711_v53 = vmul.f32 %v1710_v60, %v1708_v52 }
 0x3b4   : > { %v1650_v22 = vadd.f32 %v1648_v30, %v1642_v47  ;;  %v1725_v30 = vld [vmem:[#allocation2 + $0x82] sm:$0xff]  ;;  %v1720_v47 = vmul.f32 %v1718_v2, %v1717_v3  ;;  %v1790_v3 = vstv %s3982_s26  ;;  %s4024_s26 = sld [smem:[#allocation8 + $0x1e]] }
 0x3b5   : > { %v1649_v5 = vadd.f32 %v1647_v29, %v1641_v8  ;;  %v1724_v29 = vld [vmem:[#allocation2 + $0x7a] sm:$0xff]  ;;  %v1719_v8 = vmul.f32 %v1718_v2, %v1716_v23 }
 0x3b6   : > { %v1658_v59 = vadd.f32 %v1656_v43, %v1650_v22  ;;  %v1733_v43 = vld [vmem:[#allocation3 + $0x82] sm:$0xff]  ;;  %v1728_v22 = vmul.f32 %v1726_v63, %v1725_v30  ;;  %v1798_v30 = vstv %s3985_s29  ;;  %s4027_s29 = sld [smem:[#allocation8 + $0x4f]] }
 0x3b7   : > { %v1657_v39 = vadd.f32 %v1655_v40, %v1649_v5  ;;  %v1732_v40 = vld [vmem:[#allocation3 + $0x7a] sm:$0xff]  ;;  %v1727_v5 = vmul.f32 %v1726_v63, %v1724_v29 }
 0x3b8   : > { %v1666_v36 = vadd.f32 %v1664_v6, %v1658_v59  ;;  %v1741_v6 = vld [vmem:[#allocation2 + $0x9a] sm:$0xff]  ;;  %v1736_v59 = vmul.f32 %v1734_v7, %v1733_v43  ;;  %v1806_v43 = vstv %s3987_s9  ;;  %s4029_s9 = sld [smem:[#allocation8 + $0x1f]] }
 0x3b9   : > { %v1665_v48 = vadd.f32 %v1663_v10, %v1657_v39  ;;  %v1740_v10 = vld [vmem:[#allocation2 + $0x92] sm:$0xff]  ;;  %v1735_v39 = vmul.f32 %v1734_v7, %v1732_v40 }
 0x3ba   : > { %v1674_v26 = vadd.f32 %v1672_v16, %v1666_v36  ;;  %v1749_v16 = vld [vmem:[#allocation3 + $0x9a] sm:$0xff]  ;;  %v1744_v36 = vmul.f32 %v1742_v21, %v1741_v6  ;;  %v1812_v6 = vld [vmem:[#allocation3 + $0x4b] sm:$0xff] }
 0x3bb   : > { %v1673_v11 = vadd.f32 %v1671_v35, %v1665_v48  ;;  %v1748_v35 = vld [vmem:[#allocation3 + $0x92] sm:$0xff]  ;;  %v1743_v48 = vmul.f32 %v1742_v21, %v1740_v10  ;;  %v1752_v9 = vmul.f32 %v1750_v34, %v1749_v16  ;;  %v1822_v16 = vstv %s3994_s25  ;;  %s4036_s25 = sld [smem:[#allocation8 + $0x20]] }
 0x3bc   : > { %v1682_v15 = vadd.f32 %v1680_v58, %v1674_v26  ;;  %v1757_v58 = vld [vmem:[#allocation2 + $0xb] sm:$0xff]  ;;  %v1751_v51 = vmul.f32 %v1750_v34, %v1748_v35 }
 0x3bd   : > { %v1681_v14 = vadd.f32 %v1679_v57, %v1673_v11  ;;  %v1756_v57 = vld [vmem:[#allocation2 + $0x3] sm:$0xff] }
 0x3be   : > { %v1690_v18 = vadd.f32 %v1688_v42, %v1682_v15  ;;  %v1765_v42 = vld [vmem:[#allocation3 + $0xb] sm:$0xff]  ;;  %v1760_v15 = vmul.f32 %v1758_v25, %v1757_v58  ;;  %v1830_v58 = vstv %s3997_s30  ;;  %s4039_s30 = sld [smem:[#allocation8 + $0x51]] }
 0x3bf   : > { %v1689_v17 = vadd.f32 %v1687_v4, %v1681_v14  ;;  %v1764_v4 = vld [vmem:[#allocation3 + $0x3] sm:$0xff]  ;;  %v1759_v14 = vmul.f32 %v1758_v25, %v1756_v57 }
 0x3c0   : > { %v1698_v20 = vadd.f32 %v1696_v56, %v1690_v18  ;;  %v1772_v56 = vld [vmem:[#allocation2 + $0x1b] sm:$0xff]  ;;  %v1767_v18 = vmul.f32 %v1766_v13, %v1764_v4 }
 0x3c1   : > { %v1697_v19 = vadd.f32 %v1695_v62, %v1689_v17  ;;  %v1773_v17 = vld [vmem:[#allocation2 + $0x23] sm:$0xff]  ;;  %v1768_v62 = vmul.f32 %v1766_v13, %v1765_v42  ;;  %v1838_v42 = vstv %s4000_s12  ;;  %s4042_s12 = sld [smem:[#allocation8 + $0x21]] }
 0x3c2   : > { %v1706_v37 = vadd.f32 %v1704_v27, %v1698_v20  ;;  %v1781_v27 = vld [vmem:[#allocation3 + $0x23] sm:$0xff]  ;;  %v1776_v20 = vmul.f32 %v1774_v55, %v1773_v17  ;;  %v1846_v17 = vstv %s4002_s8  ;;  %s4044_s8 = sld [smem:[#allocation8 + $0x52]] }
 0x3c3   : > { %v1705_v28 = vadd.f32 %v1703_v50, %v1697_v19  ;;  %v1780_v50 = vld [vmem:[#allocation3 + $0x1b] sm:$0xff]  ;;  %v1775_v19 = vmul.f32 %v1774_v55, %v1772_v56 }
 0x3c4   : > { %v1714_v45 = vadd.f32 %v1712_v54, %v1706_v37  ;;  %v1789_v54 = vld [vmem:[#allocation2 + $0x3b] sm:$0xff]  ;;  %v1784_v37 = vmul.f32 %v1782_v12, %v1781_v27  ;;  %v1854_v27 = vstv %s4006_s13  ;;  %s4048_s13 = sld [smem:[#allocation8 + $0x22]] }
 0x3c5   : > { %v1713_v0 = vadd.f32 %v1711_v53, %v1705_v28  ;;  %v1788_v53 = vld [vmem:[#allocation2 + $0x33] sm:$0xff]  ;;  %v1783_v28 = vmul.f32 %v1782_v12, %v1780_v50 }
 0x3c6   : > { %v1722_v1 = vadd.f32 %v1720_v47, %v1714_v45  ;;  %v1797_v47 = vld [vmem:[#allocation3 + $0x3b] sm:$0xff]  ;;  %v1792_v45 = vmul.f32 %v1790_v3, %v1789_v54  ;;  %v1862_v54 = vstv %s4009_s14  ;;  %s4051_s14 = sld [smem:[#allocation8 + $0x53]] }
 0x3c7   : > { %v1721_v24 = vadd.f32 %v1719_v8, %v1713_v0  ;;  %v1796_v8 = vld [vmem:[#allocation3 + $0x33] sm:$0xff]  ;;  %v1791_v0 = vmul.f32 %v1790_v3, %v1788_v53 }
 0x3c8   : > { %v1730_v49 = vadd.f32 %v1728_v22, %v1722_v1  ;;  %v1804_v22 = vld [vmem:[#allocation2 + $0x4b] sm:$0xff]  ;;  %v1800_v1 = vmul.f32 %v1798_v30, %v1797_v47  ;;  %v1870_v47 = vstv %s4011_s22  ;;  %s4053_s22 = sld [smem:[#allocation8 + $0x23]] }
 0x3c9   : > { %v1729_v44 = vadd.f32 %v1727_v5, %v1721_v24  ;;  %v1805_v5 = vld [vmem:[#allocation2 + $0x53] sm:$0xff]  ;;  %v1799_v24 = vmul.f32 %v1798_v30, %v1796_v8  ;;  %v1807_v35 = vmul.f32 %v1806_v43, %v1804_v22  ;;  %v1878_v22 = vstv %s4014_s23  ;;  %s4056_s23 = sld [smem:[#allocation8 + $0x54]] }
 0x3ca   : > { %v1738_v31 = vadd.f32 %v1736_v59, %v1730_v49  ;;  %v1814_v59 = vstv %s3991_s20  ;;  %s4033_s20 = sld [smem:[#allocation8 + $0x50]] }
 0x3cb   : > { %v1737_v46 = vadd.f32 %v1735_v39, %v1729_v44  ;;  %v1813_v39 = vld [vmem:[#allocation3 + $0x53] sm:$0xff]  ;;  %v1808_v44 = vmul.f32 %v1806_v43, %v1805_v5 }
 0x3cc   : > { %v1746_v26 = vadd.f32 %v1744_v36, %v1738_v31  ;;  %v1821_v36 = vld [vmem:[#allocation2 + $0x6b] sm:$0xff]  ;;  %v1816_v31 = vmul.f32 %v1814_v59, %v1813_v39 }
 0x3cd   : > { %v1745_v11 = vadd.f32 %v1743_v48, %v1737_v46  ;;  %v1820_v48 = vld [vmem:[#allocation2 + $0x63] sm:$0xff]  ;;  %v1815_v46 = vmul.f32 %v1814_v59, %v1812_v6  ;;  %v1886_v59 = vstv %s4017_s5  ;;  %s4059_s5 = sld [smem:[#allocation8 + $0x24]] }
 0x3ce   : > { %v1754_v61 = vadd.f32 %v1752_v9, %v1746_v26  ;;  %v1829_v26 = vld [vmem:[#allocation3 + $0x6b] sm:$0xff]  ;;  %v1824_v9 = vmul.f32 %v1822_v16, %v1821_v36  ;;  %v1894_v36 = vstv %s4020_s10  ;;  %s4062_s10 = sld [smem:[#allocation8 + $0x55]] }
 0x3cf   : > { %v1753_v41 = vadd.f32 %v1751_v51, %v1745_v11  ;;  %v1828_v11 = vld [vmem:[#allocation3 + $0x63] sm:$0xff]  ;;  %v1823_v51 = vmul.f32 %v1822_v16, %v1820_v48 }
 0x3d0   : > { %v1762_v52 = vadd.f32 %v1760_v15, %v1754_v61  ;;  %v1837_v15 = vld [vmem:[#allocation2 + $0x83] sm:$0xff]  ;;  %v1832_v61 = vmul.f32 %v1830_v58, %v1829_v26  ;;  %v1902_v26 = vstv %s4024_s26  ;;  %s4066_s26 = sld [smem:[#allocation8 + $0x25]] }
 0x3d1   : > { %v1761_v60 = vadd.f32 %v1759_v14, %v1753_v41  ;;  %v1836_v14 = vld [vmem:[#allocation2 + $0x7b] sm:$0xff]  ;;  %v1831_v41 = vmul.f32 %v1830_v58, %v1828_v11 }
 0x3d2   : > { %v1770_v23 = vadd.f32 %v1768_v62, %v1762_v52  ;;  %v1845_v62 = vld [vmem:[#allocation3 + $0x83] sm:$0xff]  ;;  %v1840_v52 = vmul.f32 %v1838_v42, %v1837_v15  ;;  %v1910_v15 = vstv %s4027_s29  ;;  %s4069_s29 = sld [smem:[#allocation8 + $0x56]] }
 0x3d3   : > { %v1769_v2 = vadd.f32 %v1767_v18, %v1761_v60  ;;  %v1844_v18 = vld [vmem:[#allocation3 + $0x7b] sm:$0xff]  ;;  %v1839_v60 = vmul.f32 %v1838_v42, %v1836_v14 }
 0x3d4   : > { %v1778_v29 = vadd.f32 %v1776_v20, %v1770_v23  ;;  %v1853_v20 = vld [vmem:[#allocation2 + $0x9b] sm:$0xff]  ;;  %v1848_v23 = vmul.f32 %v1846_v17, %v1845_v62  ;;  %v1918_v62 = vstv %s4029_s9  ;;  %s4071_s9 = sld [smem:[#allocation8 + $0x26]] }
 0x3d5   : > { %v1777_v63 = vadd.f32 %v1775_v19, %v1769_v2  ;;  %v1852_v19 = vld [vmem:[#allocation2 + $0x93] sm:$0xff]  ;;  %v1847_v2 = vmul.f32 %v1846_v17, %v1844_v18 }
 0x3d6   : > { %v1786_v40 = vadd.f32 %v1784_v37, %v1778_v29  ;;  %v1861_v37 = vld [vmem:[#allocation3 + $0x9b] sm:$0xff]  ;;  %v1856_v29 = vmul.f32 %v1854_v27, %v1853_v20  ;;  %v1924_v20 = vld [vmem:[#allocation3 + $0x4c] sm:$0xff] }
 0x3d7   : > { %v1785_v7 = vadd.f32 %v1783_v28, %v1777_v63  ;;  %v1860_v28 = vld [vmem:[#allocation3 + $0x93] sm:$0xff]  ;;  %v1855_v63 = vmul.f32 %v1854_v27, %v1852_v19  ;;  %v1864_v5 = vmul.f32 %v1862_v54, %v1861_v37  ;;  %v1934_v37 = vstv %s4036_s25  ;;  %s4078_s25 = sld [smem:[#allocation8 + $0x27]] }
 0x3d8   : > { %v1794_v10 = vadd.f32 %v1792_v45, %v1786_v40  ;;  %v1869_v45 = vld [vmem:[#allocation2 + $0xc] sm:$0xff]  ;;  %v1863_v43 = vmul.f32 %v1862_v54, %v1860_v28 }
 0x3d9   : > { %v1793_v21 = vadd.f32 %v1791_v0, %v1785_v7  ;;  %v1868_v0 = vld [vmem:[#allocation2 + $0x4] sm:$0xff] }
 0x3da   : > { %v1802_v34 = vadd.f32 %v1800_v1, %v1794_v10  ;;  %v1877_v1 = vld [vmem:[#allocation3 + $0xc] sm:$0xff]  ;;  %v1872_v10 = vmul.f32 %v1870_v47, %v1869_v45  ;;  %v1942_v45 = vstv %s4039_s30  ;;  %s4081_s30 = sld [smem:[#allocation8 + $0x58]] }
 0x3db   : > { %v1801_v49 = vadd.f32 %v1799_v24, %v1793_v21  ;;  %v1876_v24 = vld [vmem:[#allocation3 + $0x4] sm:$0xff]  ;;  %v1871_v21 = vmul.f32 %v1870_v47, %v1868_v0 }
 0x3dc   : > { %v1810_v57 = vadd.f32 %v1808_v44, %v1802_v34  ;;  %v1884_v44 = vld [vmem:[#allocation2 + $0x1c] sm:$0xff]  ;;  %v1879_v34 = vmul.f32 %v1878_v22, %v1876_v24 }
 0x3dd   : > { %v1809_v25 = vadd.f32 %v1807_v35, %v1801_v49  ;;  %v1885_v49 = vld [vmem:[#allocation2 + $0x24] sm:$0xff]  ;;  %v1880_v35 = vmul.f32 %v1878_v22, %v1877_v1  ;;  %v1950_v1 = vstv %s4042_s12  ;;  %s4084_s12 = sld [smem:[#allocation8 + $0x28]] }
 0x3de   : > { %v1818_v4 = vadd.f32 %v1816_v31, %v1810_v57  ;;  %v1893_v31 = vld [vmem:[#allocation3 + $0x24] sm:$0xff]  ;;  %v1888_v57 = vmul.f32 %v1886_v59, %v1885_v49  ;;  %v1958_v49 = vstv %s4044_s8  ;;  %s4086_s8 = sld [smem:[#allocation8 + $0x59]] }
 0x3df   : > { %v1817_v13 = vadd.f32 %v1815_v46, %v1809_v25  ;;  %v1892_v46 = vld [vmem:[#allocation3 + $0x1c] sm:$0xff]  ;;  %v1887_v25 = vmul.f32 %v1886_v59, %v1884_v44 }
 0x3e0   : > { %v1826_v56 = vadd.f32 %v1824_v9, %v1818_v4  ;;  %v1901_v9 = vld [vmem:[#allocation2 + $0x3c] sm:$0xff]  ;;  %v1896_v4 = vmul.f32 %v1894_v36, %v1893_v31  ;;  %v1966_v31 = vstv %s4048_s13  ;;  %s4090_s13 = sld [smem:[#allocation8 + $0x29]] }
 0x3e1   : > { %v1825_v55 = vadd.f32 %v1823_v51, %v1817_v13  ;;  %v1900_v51 = vld [vmem:[#allocation2 + $0x34] sm:$0xff]  ;;  %v1895_v13 = vmul.f32 %v1894_v36, %v1892_v46 }
 0x3e2   : > { %v1834_v50 = vadd.f32 %v1832_v61, %v1826_v56  ;;  %v1909_v61 = vld [vmem:[#allocation3 + $0x3c] sm:$0xff]  ;;  %v1904_v56 = vmul.f32 %v1902_v26, %v1901_v9  ;;  %v1974_v9 = vstv %s4051_s14  ;;  %s4093_s14 = sld [smem:[#allocation8 + $0x5a]] }
 0x3e3   : > { %v1833_v12 = vadd.f32 %v1831_v41, %v1825_v55  ;;  %v1908_v41 = vld [vmem:[#allocation3 + $0x34] sm:$0xff]  ;;  %v1903_v55 = vmul.f32 %v1902_v26, %v1900_v51 }
 0x3e4   : > { %v1842_v53 = vadd.f32 %v1840_v52, %v1834_v50  ;;  %v1916_v52 = vld [vmem:[#allocation2 + $0x4c] sm:$0xff]  ;;  %v1912_v50 = vmul.f32 %v1910_v15, %v1909_v61  ;;  %v1982_v61 = vstv %s4053_s22  ;;  %s4095_s22 = sld [smem:[#allocation8 + $0x2a]] }
 0x3e5   : > { %v1841_v3 = vadd.f32 %v1839_v60, %v1833_v12  ;;  %v1917_v60 = vld [vmem:[#allocation2 + $0x54] sm:$0xff]  ;;  %v1911_v12 = vmul.f32 %v1910_v15, %v1908_v41  ;;  %v1919_v28 = vmul.f32 %v1918_v62, %v1916_v52  ;;  %v1990_v52 = vstv %s4056_s23  ;;  %s4098_s23 = sld [smem:[#allocation8 + $0x5b]] }
 0x3e6   : > { %v1850_v8 = vadd.f32 %v1848_v23, %v1842_v53  ;;  %v1926_v23 = vstv %s4033_s20  ;;  %s4075_s20 = sld [smem:[#allocation8 + $0x57]] }
 0x3e7   : > { %v1849_v30 = vadd.f32 %v1847_v2, %v1841_v3  ;;  %v1925_v2 = vld [vmem:[#allocation3 + $0x54] sm:$0xff]  ;;  %v1920_v3 = vmul.f32 %v1918_v62, %v1917_v60 }
 0x3e8   : > { %v1858_v40 = vadd.f32 %v1856_v29, %v1850_v8  ;;  %v1933_v29 = vld [vmem:[#allocation2 + $0x6c] sm:$0xff]  ;;  %v1928_v8 = vmul.f32 %v1926_v23, %v1925_v2 }
 0x3e9   : > { %v1857_v7 = vadd.f32 %v1855_v63, %v1849_v30  ;;  %v1932_v63 = vld [vmem:[#allocation2 + $0x64] sm:$0xff]  ;;  %v1927_v30 = vmul.f32 %v1926_v23, %v1924_v20  ;;  %v1998_v23 = vstv %s4059_s5  ;;  %s4101_s5 = sld [smem:[#allocation8 + $0x2b]] }
 0x3ea   : > { %v1866_v39 = vadd.f32 %v1864_v5, %v1858_v40  ;;  %v1941_v40 = vld [vmem:[#allocation3 + $0x6c] sm:$0xff]  ;;  %v1936_v5 = vmul.f32 %v1934_v37, %v1933_v29  ;;  %v2006_v29 = vstv %s4062_s10  ;;  %s4104_s10 = sld [smem:[#allocation8 + $0x5c]] }
 0x3eb   : > { %v1865_v6 = vadd.f32 %v1863_v43, %v1857_v7  ;;  %v1940_v7 = vld [vmem:[#allocation3 + $0x64] sm:$0xff]  ;;  %v1935_v43 = vmul.f32 %v1934_v37, %v1932_v63 }
 0x3ec   : > { %v1874_v48 = vadd.f32 %v1872_v10, %v1866_v39  ;;  %v1949_v10 = vld [vmem:[#allocation2 + $0x84] sm:$0xff]  ;;  %v1944_v39 = vmul.f32 %v1942_v45, %v1941_v40  ;;  %v2014_v40 = vstv %s4066_s26  ;;  %s4108_s26 = sld [smem:[#allocation8 + $0x2c]] }
 0x3ed   : > { %v1873_v16 = vadd.f32 %v1871_v21, %v1865_v6  ;;  %v1948_v21 = vld [vmem:[#allocation2 + $0x7c] sm:$0xff]  ;;  %v1943_v6 = vmul.f32 %v1942_v45, %v1940_v7 }
 0x3ee   : > { %v1882_v11 = vadd.f32 %v1880_v35, %v1874_v48  ;;  %v1957_v35 = vld [vmem:[#allocation3 + $0x84] sm:$0xff]  ;;  %v1952_v48 = vmul.f32 %v1950_v1, %v1949_v10  ;;  %v2022_v10 = vstv %s4069_s29  ;;  %s4111_s29 = sld [smem:[#allocation8 + $0x5d]] }
 0x3ef   : > { %v1881_v58 = vadd.f32 %v1879_v34, %v1873_v16  ;;  %v1956_v34 = vld [vmem:[#allocation3 + $0x7c] sm:$0xff]  ;;  %v1951_v16 = vmul.f32 %v1950_v1, %v1948_v21 }
 0x3f0   : > { %v1890_v14 = vadd.f32 %v1888_v57, %v1882_v11  ;;  %v1965_v57 = vld [vmem:[#allocation2 + $0x9c] sm:$0xff]  ;;  %v1960_v11 = vmul.f32 %v1958_v49, %v1957_v35  ;;  %v2030_v35 = vstv %s4071_s9  ;;  %s4113_s9 = sld [smem:[#allocation8 + $0x2d]] }
 0x3f1   : > { %v1889_v42 = vadd.f32 %v1887_v25, %v1881_v58  ;;  %v1964_v25 = vld [vmem:[#allocation2 + $0x94] sm:$0xff]  ;;  %v1959_v58 = vmul.f32 %v1958_v49, %v1956_v34 }
 0x3f2   : > { %v1898_v18 = vadd.f32 %v1896_v4, %v1890_v14  ;;  %v1973_v4 = vld [vmem:[#allocation3 + $0x9c] sm:$0xff]  ;;  %v1968_v14 = vmul.f32 %v1966_v31, %v1965_v57  ;;  %v2036_v57 = vld [vmem:[#allocation3 + $0x4d] sm:$0xff] }
 0x3f3   : > { %v1897_v17 = vadd.f32 %v1895_v13, %v1889_v42  ;;  %v1972_v13 = vld [vmem:[#allocation3 + $0x94] sm:$0xff]  ;;  %v1967_v42 = vmul.f32 %v1966_v31, %v1964_v25  ;;  %v1976_v60 = vmul.f32 %v1974_v9, %v1973_v4  ;;  %v2046_v4 = vstv %s4078_s25  ;;  %s4120_s25 = sld [smem:[#allocation8 + $0x2e]] }
 0x3f4   : > { %v1906_v19 = vadd.f32 %v1904_v56, %v1898_v18  ;;  %v1981_v56 = vld [vmem:[#allocation2 + $0xd] sm:$0xff]  ;;  %v1975_v62 = vmul.f32 %v1974_v9, %v1972_v13 }
 0x3f5   : > { %v1905_v27 = vadd.f32 %v1903_v55, %v1897_v17  ;;  %v1980_v55 = vld [vmem:[#allocation2 + $0x5] sm:$0xff] }
 0x3f6   : > { %v1914_v54 = vadd.f32 %v1912_v50, %v1906_v19  ;;  %v1989_v50 = vld [vmem:[#allocation3 + $0xd] sm:$0xff]  ;;  %v1984_v19 = vmul.f32 %v1982_v61, %v1981_v56  ;;  %v2054_v56 = vstv %s4081_s30  ;;  %s4123_s30 = sld [smem:[#allocation8 + $0x5f]] }
 0x3f7   : > { %v1913_v53 = vadd.f32 %v1911_v12, %v1905_v27  ;;  %v1988_v12 = vld [vmem:[#allocation3 + $0x5] sm:$0xff]  ;;  %v1983_v27 = vmul.f32 %v1982_v61, %v1980_v55 }
 0x3f8   : > { %v1922_v0 = vadd.f32 %v1920_v3, %v1914_v54  ;;  %v1996_v3 = vld [vmem:[#allocation2 + $0x1d] sm:$0xff]  ;;  %v1991_v54 = vmul.f32 %v1990_v52, %v1988_v12 }
 0x3f9   : > { %v1921_v47 = vadd.f32 %v1919_v28, %v1913_v53  ;;  %v1997_v53 = vld [vmem:[#allocation2 + $0x25] sm:$0xff]  ;;  %v1992_v28 = vmul.f32 %v1990_v52, %v1989_v50  ;;  %v2062_v50 = vstv %s4084_s12  ;;  %s4126_s12 = sld [smem:[#allocation8 + $0x2f]] }
 0x3fa   : > { %v1930_v24 = vadd.f32 %v1928_v8, %v1922_v0  ;;  %v2005_v8 = vld [vmem:[#allocation3 + $0x25] sm:$0xff]  ;;  %v2000_v0 = vmul.f32 %v1998_v23, %v1997_v53  ;;  %v2070_v53 = vstv %s4086_s8  ;;  %s4128_s8 = sld [smem:[#allocation8 + $0x60]] }
 0x3fb   : > { %v1929_v22 = vadd.f32 %v1927_v30, %v1921_v47  ;;  %v2004_v30 = vld [vmem:[#allocation3 + $0x1d] sm:$0xff]  ;;  %v1999_v47 = vmul.f32 %v1998_v23, %v1996_v3 }
 0x3fc   : > { %v1938_v44 = vadd.f32 %v1936_v5, %v1930_v24  ;;  %v2013_v5 = vld [vmem:[#allocation2 + $0x3d] sm:$0xff]  ;;  %v2008_v24 = vmul.f32 %v2006_v29, %v2005_v8  ;;  %v2078_v8 = vstv %s4090_s13  ;;  %s4132_s13 = sld [smem:[#allocation8 + $0x30]] }
 0x3fd   : > { %v1937_v59 = vadd.f32 %v1935_v43, %v1929_v22  ;;  %v2012_v43 = vld [vmem:[#allocation2 + $0x35] sm:$0xff]  ;;  %v2007_v22 = vmul.f32 %v2006_v29, %v2004_v30 }
 0x3fe   : > { %v1946_v46 = vadd.f32 %v1944_v39, %v1938_v44  ;;  %v2021_v39 = vld [vmem:[#allocation3 + $0x3d] sm:$0xff]  ;;  %v2016_v44 = vmul.f32 %v2014_v40, %v2013_v5  ;;  %v2086_v5 = vstv %s4093_s14  ;;  %s4135_s14 = sld [smem:[#allocation8 + $0x61]] }
 0x3ff   : > { %v1945_v36 = vadd.f32 %v1943_v6, %v1937_v59  ;;  %v2020_v6 = vld [vmem:[#allocation3 + $0x35] sm:$0xff]  ;;  %v2015_v59 = vmul.f32 %v2014_v40, %v2012_v43 }
 0x400   : > { %v1954_v51 = vadd.f32 %v1952_v48, %v1946_v46  ;;  %v2028_v48 = vld [vmem:[#allocation2 + $0x4d] sm:$0xff]  ;;  %v2024_v46 = vmul.f32 %v2022_v10, %v2021_v39  ;;  %v2094_v39 = vstv %s4095_s22  ;;  %s4158_s22 = scalar_lea.vmem [#allocation9], %s2627_s7  ;;  %s2797_s7 = sshll.u32 %s3074_s19, 12 }
 0x401   : > { %v1953_v26 = vadd.f32 %v1951_v16, %v1945_v36  ;;  %v2029_v16 = vld [vmem:[#allocation2 + $0x55] sm:$0xff]  ;;  %v2023_v36 = vmul.f32 %v2022_v10, %v2020_v6  ;;  %v2031_v13 = vmul.f32 %v2030_v35, %v2028_v48  ;;  %v2102_v48 = vstv %s4098_s23  ;;  %s2534_s23 = sshll.u32 %s4158_s22, 4  ;;  %s2521_s19 = scalar_lea.sflag [#allocation6], %s3173_s6  ;;  %s4255_s23 = int_to_ptr.vmem [resolvable:$true] %s2534_s23 }
 0x402   : > { %v1962_v41 = vadd.f32 %v1960_v11, %v1954_v51  ;;  %v2038_v11 = vstv %s4075_s20  ;;  %s4117_s20 = sld [smem:[#allocation8 + $0x5e]] }
 0x403   : > { %v1961_v15 = vadd.f32 %v1959_v58, %v1953_v26  ;;  %v2037_v58 = vld [vmem:[#allocation3 + $0x55] sm:$0xff]  ;;  %v2032_v26 = vmul.f32 %v2030_v35, %v2029_v16 }
 0x404   : > { %v1970_v18 = vadd.f32 %v1968_v14, %v1962_v41  ;;  %v2045_v14 = vld [vmem:[#allocation2 + $0x6d] sm:$0xff]  ;;  %v2040_v41 = vmul.f32 %v2038_v11, %v2037_v58 }
 0x405   : > { %v1969_v17 = vadd.f32 %v1967_v42, %v1961_v15  ;;  %v2044_v42 = vld [vmem:[#allocation2 + $0x65] sm:$0xff]  ;;  %v2039_v15 = vmul.f32 %v2038_v11, %v2036_v57  ;;  %v2110_v11 = vstv %s4101_s5 }
 0x406   : > { %v1978_v2 = vadd.f32 %v1976_v60, %v1970_v18  ;;  %v2053_v18 = vld [vmem:[#allocation3 + $0x6d] sm:$0xff]  ;;  %v2048_v60 = vmul.f32 %v2046_v4, %v2045_v14  ;;  %v2118_v14 = vstv %s4104_s10 }
 0x407   : > { %v1977_v20 = vadd.f32 %v1975_v62, %v1969_v17  ;;  %v2052_v17 = vld [vmem:[#allocation3 + $0x65] sm:$0xff]  ;;  %v2047_v62 = vmul.f32 %v2046_v4, %v2044_v42 }
 0x408   : > { %v1986_v63 = vadd.f32 %v1984_v19, %v1978_v2  ;;  %v2061_v19 = vld [vmem:[#allocation2 + $0x85] sm:$0xff]  ;;  %v2056_v2 = vmul.f32 %v2054_v56, %v2053_v18  ;;  %v2126_v18 = vstv %s4108_s26  ;;  %s4253_s26 = scalar_lea.hbm %s4304_s4, %s2797_s7 }
 0x409   : > { %v1985_v37 = vadd.f32 %v1983_v27, %v1977_v20  ;;  %v2060_v27 = vld [vmem:[#allocation2 + $0x7d] sm:$0xff]  ;;  %v2055_v20 = vmul.f32 %v2054_v56, %v2052_v17 }
 0x40a   : > { %v1994_v7 = vadd.f32 %v1992_v28, %v1986_v63  ;;  %v2069_v28 = vld [vmem:[#allocation3 + $0x85] sm:$0xff]  ;;  %v2064_v63 = vmul.f32 %v2062_v50, %v2061_v19  ;;  %v2134_v19 = vstv %s4111_s29  ;;  %s3025_s29 = smov [#allocation9]  }
 0x40b   : > { %v1993_v45 = vadd.f32 %v1991_v54, %v1985_v37  ;;  %v2068_v54 = vld [vmem:[#allocation3 + $0x7d] sm:$0xff]  ;;  %v2063_v37 = vmul.f32 %v2062_v50, %v2060_v27 }
 0x40c   : > { %v2002_v21 = vadd.f32 %v2000_v0, %v1994_v7  ;;  %v2077_v0 = vld [vmem:[#allocation2 + $0x9d] sm:$0xff]  ;;  %v2072_v7 = vmul.f32 %v2070_v53, %v2069_v28 }
 0x40d   : > { %v2001_v1 = vadd.f32 %v1999_v47, %v1993_v45  ;;  %v2076_v47 = vld [vmem:[#allocation2 + $0x95] sm:$0xff]  ;;  %v2071_v45 = vmul.f32 %v2070_v53, %v2068_v54  ;;  %v2125_v27 = vld [vmem:[#allocation2 + $0x3e] sm:$0xff]  ;;  %v2142_v53 = vstv %s4113_s9  ;;  %s2941_s9 = sshll.u32 %s3025_s29, 4  ;;  %s2942_s9 = int_to_ptr.vmem [resolvable:$false] %s2941_s9 }
 0x40e   : > { %v2010_v34 = vadd.f32 %v2008_v24, %v2002_v21  ;;  %v2085_v24 = vld [vmem:[#allocation3 + $0x9d] sm:$0xff]  ;;  %v2080_v21 = vmul.f32 %v2078_v8, %v2077_v0  ;;  %v2140_v54 = vld [vmem:[#allocation2 + $0x4e] sm:$0xff]  ;;  %v2128_v28 = vmul.f32 %v2126_v18, %v2125_v27  ;;  %p2944_p8 = scmp.lt.s32.totalorder %s4255_s23, %s2942_s9 }
 0x40f   : > { %v2009_v49 = vadd.f32 %v2007_v22, %v2001_v1  ;;  %v2084_v22 = vld [vmem:[#allocation3 + $0x95] sm:$0xff]  ;;  %v2079_v1 = vmul.f32 %v2078_v8, %v2076_v47  ;;  %v2088_v16 = vmul.f32 %v2086_v5, %v2085_v24  ;;  %v2150_v8 = vstv %s4117_s20  ;;  %s2943_s20 = scalar_lea.vmem %s2942_s9, 8192 }
 0x410   : > { %v2018_v25 = vadd.f32 %v2016_v44, %v2010_v34  ;;  %v2093_v44 = vld [vmem:[#allocation2 + $0xe] sm:$0xff]  ;;  %v2087_v35 = vmul.f32 %v2086_v5, %v2084_v22  ;;  %v2141_v24 = vld [vmem:[#allocation2 + $0x56] sm:$0xff] }
 0x411   : > { %v2017_v31 = vadd.f32 %v2015_v59, %v2009_v49  ;;  %v2092_v59 = vld [vmem:[#allocation2 + $0x6] sm:$0xff] }
 0x412   : > { %v2026_v9 = vadd.f32 %v2024_v46, %v2018_v25  ;;  %v2101_v46 = vld [vmem:[#allocation3 + $0xe] sm:$0xff]  ;;  %v2096_v25 = vmul.f32 %v2094_v39, %v2093_v44  ;;  %v2172_v44 = vld [vmem:[#allocation2 + $0x7e] sm:$0xff] }
 0x413   : > { %v2025_v51 = vadd.f32 %v2023_v36, %v2017_v31  ;;  %v2100_v36 = vld [vmem:[#allocation3 + $0x6] sm:$0xff]  ;;  %v2095_v31 = vmul.f32 %v2094_v39, %v2092_v59  ;;  %v2174_v59 = vstv %s4126_s12 }
 0x414   : > { %v2034_v55 = vadd.f32 %v2032_v26, %v2026_v9  ;;  %v2108_v26 = vld [vmem:[#allocation2 + $0x1e] sm:$0xff]  ;;  %v2103_v9 = vmul.f32 %v2102_v48, %v2100_v36 }
 0x415   : > { %v2033_v61 = vadd.f32 %v2031_v13, %v2025_v51  ;;  %v2109_v51 = vld [vmem:[#allocation2 + $0x26] sm:$0xff]  ;;  %v2104_v13 = vmul.f32 %v2102_v48, %v2101_v46  ;;  %v2149_v36 = vld [vmem:[#allocation3 + $0x56] sm:$0xff]  ;;  %v2175_v46 = vmul.f32 %v2174_v59, %v2172_v44  ;;  %v2315_v44 = vsub.s32 6, %v3409_v32 }
 0x416   : > { %v2042_v12 = vadd.f32 %v2040_v41, %v2034_v55  ;;  %v2117_v41 = vld [vmem:[#allocation3 + $0x26] sm:$0xff]  ;;  %v2112_v55 = vmul.f32 %v2110_v11, %v2109_v51  ;;  %v2180_v48 = vld [vmem:[#allocation3 + $0x7e] sm:$0xff] }
 0x417   : > { %v2041_v52 = vadd.f32 %v2039_v15, %v2033_v61  ;;  %v2116_v15 = vld [vmem:[#allocation3 + $0x1e] sm:$0xff]  ;;  %v2111_v61 = vmul.f32 %v2110_v11, %v2108_v26  ;;  %v2152_v26 = vmul.f32 %v2150_v8, %v2149_v36 }
 0x418   : > { %v2050_v3 = vadd.f32 %v2048_v60, %v2042_v12  ;;  %v2119_v60 = vmul.f32 %v2118_v14, %v2116_v15 }
 0x419   : > { %v2049_v23 = vadd.f32 %v2047_v62, %v2041_v52  ;;  %v2124_v62 = vld [vmem:[#allocation2 + $0x36] sm:$0xff]  ;;  %v2120_v52 = vmul.f32 %v2118_v14, %v2117_v41 }
 0x41a   : > { %v2058_v30 = vadd.f32 %v2056_v2, %v2050_v3  ;;  %v2127_v2 = vmul.f32 %v2126_v18, %v2124_v62 }
 0x41b   : > { %v2057_v29 = vadd.f32 %v2055_v20, %v2049_v23  ;;  %v2132_v20 = vld [vmem:[#allocation3 + $0x36] sm:$0xff] }
 0x41c   : > { %v2066_v43 = vadd.f32 %v2064_v63, %v2058_v30  ;;  %v2148_v30 = vld [vmem:[#allocation3 + $0x4e] sm:$0xff] }
 0x41d   : > { %v2065_v40 = vadd.f32 %v2063_v37, %v2057_v29  ;;  %v2135_v37 = vmul.f32 %v2134_v19, %v2132_v20  ;;  %v2133_v29 = vld [vmem:[#allocation3 + $0x3e] sm:$0xff]  ;;  %v2151_v5 = vmul.f32 %v2150_v8, %v2148_v30 }
 0x41e   : > { %v2074_v6 = vadd.f32 %v2072_v7, %v2066_v43  ;;  %v2158_v7 = vstv %s4120_s25  ;;  %v2136_v43 = vmul.f32 %v2134_v19, %v2133_v29  ;;  %v2181_v19 = vld [vmem:[#allocation3 + $0x86] sm:$0xff] }
 0x41f   : > { %v2073_v10 = vadd.f32 %v2071_v45, %v2065_v40  ;;  %v2143_v45 = vmul.f32 %v2142_v53, %v2140_v54  ;;  %v2156_v40 = vld [vmem:[#allocation2 + $0x66] sm:$0xff] }
 0x420   : > { %v2082_v34 = vadd.f32 %v2080_v21, %v2074_v6  ;;  %v2164_v21 = vld [vmem:[#allocation3 + $0x66] sm:$0xff]  ;;  %v2197_v54 = vld [vmem:[#allocation3 + $0x9e] sm:$0xff] }
 0x421   : > { %v2081_v49 = vadd.f32 %v2079_v1, %v2073_v10  ;;  %v2166_v1 = vstv %s4123_s30  ;;  %v2159_v10 = vmul.f32 %v2158_v7, %v2156_v40 }
 0x422   : > { %v2090_v58 = vadd.f32 %v2088_v16, %v2082_v34  ;;  %v2167_v34 = vmul.f32 %v2166_v1, %v2164_v21  ;;  %v2182_v16 = vstv %s4128_s8 }
 0x423   : > { %v2089_v57 = vadd.f32 %v2087_v35, %v2081_v49  ;;  %v2144_v49 = vmul.f32 %v2142_v53, %v2141_v24  ;;  %v2183_v11 = vmul.f32 %v2182_v16, %v2180_v48 }
 0x424   : > { %v2098_v42 = vadd.f32 %v2096_v25, %v2090_v58  ;;  %v2188_v58 = vld [vmem:[#allocation2 + $0x96] sm:$0xff] }
 0x425   : > { %v2097_v4 = vadd.f32 %v2095_v31, %v2089_v57  ;;  %v2190_v57 = vstv %s4132_s13 }
 0x426   : > { %v2106_v17 = vadd.f32 %v2104_v13, %v2098_v42  ;;  %v2198_v13 = vstv %s4135_s14  ;;  %v2191_v42 = vmul.f32 %v2190_v57, %v2188_v58  ;;  %v2216_v58 = vld [vmem:[%s3179_s11 + $0x8] sm:$0xff] }
 0x427   : > { %v2105_v56 = vadd.f32 %v2103_v9, %v2097_v4  ;;  %v2157_v9 = vld [vmem:[#allocation2 + $0x6e] sm:$0xff]  ;;  %v2196_v4 = vld [vmem:[#allocation3 + $0x96] sm:$0xff] }
 0x428   : > { %v2114_v50 = vadd.f32 %v2112_v55, %v2106_v17  ;;  %v2160_v41 = vmul.f32 %v2158_v7, %v2157_v9  ;;  %v2199_v55 = vmul.f32 %v2198_v13, %v2196_v4  ;;  %v2260_v7 = vsub.s32 1, %v3409_v32  ;;  %v2218_v4 = vld [vmem:[%s3179_s11 + $0x18] sm:$0xff] }
 0x429   : > { %v2113_v12 = vadd.f32 %v2111_v61, %v2105_v56  ;;  %v2165_v56 = vld [vmem:[#allocation3 + $0x6e] sm:$0xff] }
 0x42a   : > { %v2122_v3 = vadd.f32 %v2120_v52, %v2114_v50  ;;  %v2168_v62 = vmul.f32 %v2166_v1, %v2165_v56  ;;  %v2173_v52 = vld [vmem:[#allocation2 + $0x86] sm:$0xff] }
 0x42b   : > { %v2121_v23 = vadd.f32 %v2119_v60, %v2113_v12  ;;  %v2176_v27 = vmul.f32 %v2174_v59, %v2173_v52 }
 0x42c   : > { %v2130_v47 = vadd.f32 %v2128_v28, %v2122_v3 }
 0x42d   : > { %v2129_v63 = vadd.f32 %v2127_v2, %v2121_v23  ;;  %v2184_v2 = vmul.f32 %v2182_v16, %v2181_v19  ;;  %v2189_v23 = vld [vmem:[#allocation2 + $0x9e] sm:$0xff]  ;;  %v2222_v19 = vld [vmem:[%s3179_s11 + $0x38] sm:$0xff] }
 0x42e   : > { %v2138_v6 = vadd.f32 %v2136_v43, %v2130_v47  ;;  %v2192_v53 = vmul.f32 %v2190_v57, %v2189_v23  ;;  %v2271_v43 = vsub.s32 2, %v3409_v32 }
 0x42f   : > { %v2137_v0 = vadd.f32 %v2135_v37, %v2129_v63  ;;  %v2200_v37 = vmul.f32 %v2198_v13, %v2197_v54 }
 0x430   : > { %v2146_v31 = vadd.f32 %v2144_v49, %v2138_v6 }
 0x431   : > { %v2145_v22 = vadd.f32 %v2143_v45, %v2137_v0 }
 0x432   : > { %v2154_v14 = vadd.f32 %v2152_v26, %v2146_v31  ;;  %v2232_v26 = vmul.f32 %v2216_v58, %v3415_v38  ;;  %v2759_v58 = vld [vmem:[%s3179_s11 + $0x80] sm:$0xff] }
 0x433   : > { %v2153_v39 = vadd.f32 %v2151_v5, %v2145_v22  ;;  %v2282_v22 = vsub.s32 3, %v3409_v32 }
 0x434   : > { %v2162_v17 = vadd.f32 %v2160_v41, %v2154_v14  ;;  %v2234_v41 = vmul.f32 %v2218_v4, %v3415_v38 }
 0x435   : > { %v2161_v35 = vadd.f32 %v2159_v10, %v2153_v39  ;;  %v2293_v10 = vsub.s32 4, %v3409_v32  ;;  %v2304_v39 = vsub.s32 5, %v3409_v32 }
 0x436   : > { %v2170_v12 = vadd.f32 %v2168_v62, %v2162_v17  ;;  %v2220_v17 = vld [vmem:[%s3179_s11 + $0x28] sm:$0xff] }
 0x437   : > { %v2169_v25 = vadd.f32 %v2167_v34, %v2161_v35  ;;  %v2326_v34 = vsub.s32 7, %v3409_v32  ;;  %v2236_v52 = vmul.f32 %v2220_v17, %v3415_v38 }
 0x438   : > { %v2178_v20 = vadd.f32 %v2176_v27, %v2170_v12 }
 0x439   : > { %v2177_v51 = vadd.f32 %v2175_v46, %v2169_v25 }
 0x43a   : > { %v2186_v3 = vadd.f32 %v2184_v2, %v2178_v20  ;;  %v2221_v20 = vld [vmem:[%s3179_s11 + $0x30] sm:$0xff] }
 0x43b   : > { %v2185_v15 = vadd.f32 %v2183_v11, %v2177_v51  ;;  %v2215_v11 = vld [vmem:[%s3179_s11] sm:$0xff] }
 0x43c   : > { %v2194_v28 = vadd.f32 %v2192_v53, %v2186_v3  ;;  %v2231_v51 = vmul.f32 %v2215_v11, %v3415_v38  ;;  %v2238_v3 = vmul.f32 %v2222_v19, %v3415_v38  ;;  %v2237_v53 = vmul.f32 %v2221_v20, %v3415_v38  ;;  %v2766_v20 = vld [vmem:[%s3179_s11 + $0xb8] sm:$0xff] }
 0x43d   : > { %v2193_v61 = vadd.f32 %v2191_v42, %v2185_v15  ;;  %v2217_v42 = vld [vmem:[%s3179_s11 + $0x10] sm:$0xff] }
 0x43e   : > { %v2202_v29 = vadd.f32 %v2200_v37, %v2194_v28  ;;  %v2224_v37 = vld [vmem:[%s3179_s11 + $0x48] sm:$0xff] }
 0x43f   : > { %v2201_v18 = vadd.f32 %v2199_v55, %v2193_v61  ;;  %v2233_v61 = vmul.f32 %v2217_v42, %v3415_v38  ;;  %v2762_v42 = vld [vmem:[%s3179_s11 + $0x98] sm:$0xff] }
 0x440   : > { %v2204_v8 = vsub.f32 0.0, %v2202_v29 }
 0x441   : > { %v2203_v60 = vsub.f32 0.0, %v2201_v18  ;;  %v2219_v18 = vld [vmem:[%s3179_s11 + $0x20] sm:$0xff] }
 0x442   : > { %v2207_v47 = vmul.f32 1.442695, %v2204_v8  ;;  %v2235_v12 = vmul.f32 %v2219_v18, %v3415_v38  ;;  %v2240_v8 = vmul.f32 %v2224_v37, %v3415_v38  ;;  %v2764_v18 = vld [vmem:[%s3179_s11 + $0xa8] sm:$0xff] }
 0x443   : > { %v2205_v50 = vmul.f32 1.442695, %v2203_v60 }
 0x445   : > { %2886 = vpow2.f32 %v2205_v50 }
 0x452   : > { %v2887_v63 = vpop.eup %2886 }
 0x453   : > { %v2209_v30 = vadd.f32 1.0, %v2887_v63  ;;  %v2223_v63 = vld [vmem:[%s3179_s11 + $0x40] sm:$0xff] }
 0x455   : > { %2888 = vrcp.f32 %v2209_v30 }
 0x456   : > { %2890 = vpow2.f32 %v2207_v47  ;;  %v2239_v47 = vmul.f32 %v2223_v63, %v3415_v38  ;;  %v2768_v63 = vld [vmem:[%s3179_s11 + $0xc8] sm:$0xff] }
 0x462   : > { %v2889_v0 = vpop.eup %2888 }
 0x463   : > { %v2250_v45 = vrot.slane %v2889_v0, %v3412_v33  ;;  %v2261_v40 = vrot.slane %v2889_v0, %v2260_v7  ;;  %v2272_v5 = vrot.slane %v2889_v0, %v2271_v43  ;;  %v2891_v24 = vpop.eup %2890  ;;  %v2283_v21 = vrot.slane %v2889_v0, %v2282_v22 }
 0x464   : > { %v2210_v1 = vadd.f32 1.0, %v2891_v24  ;;  %v2294_v6 = vrot.slane %v2889_v0, %v2293_v10  ;;  %v2305_v59 = vrot.slane %v2889_v0, %v2304_v39  ;;  %v2316_v49 = vrot.slane %v2889_v0, %v2315_v44 }
 0x465   : > { %2256 = vbcast.lane.b32.xlu0 %v2250_v45, 264  ;;  %2252 = vbcast.lane.b32.xlu1 %v2250_v45, 256  ;;  %v2327_v35 = vrot.slane %v2889_v0, %v2326_v34 }
 0x466   : > { %2892 = vrcp.f32 %v2210_v1 }
 0x469   : > { %2267 = vbcast.lane.b32.xlu0 %v2261_v40, 264  ;;  %2263 = vbcast.lane.b32.xlu1 %v2261_v40, 256  ;;  %v2225_v40 = vld [vmem:[%s3179_s11 + $0x50] sm:$0xff] }
 0x46a   : > { %v2241_v24 = vmul.f32 %v2225_v40, %v3415_v38  ;;  %v2770_v40 = vld [vmem:[%s3179_s11 + $0xd8] sm:$0xff] }
 0x46d   : > { %2278 = vbcast.lane.b32.xlu0 %v2272_v5, 264  ;;  %2274 = vbcast.lane.b32.xlu1 %v2272_v5, 256 }
 0x471   : > { %2289 = vbcast.lane.b32.xlu0 %v2283_v21, 264  ;;  %2285 = vbcast.lane.b32.xlu1 %v2283_v21, 256 }
 0x473   : > { %v2893_v16 = vpop.eup %2892 }
 0x474   : > { %v2402_v48 = vrot.slane %v2893_v16, %v3412_v33  ;;  %v2413_v36 = vrot.slane %v2893_v16, %v2260_v7  ;;  %v2424_v46 = vrot.slane %v2893_v16, %v2271_v43  ;;  %v2435_v31 = vrot.slane %v2893_v16, %v2282_v22  ;;  %v2226_v7 = vld [vmem:[%s3179_s11 + $0x58] sm:$0xff] }
 0x475   : > { %2300 = vbcast.lane.b32.xlu0 %v2294_v6, 264  ;;  %2296 = vbcast.lane.b32.xlu1 %v2294_v6, 256  ;;  %v2446_v32 = vrot.slane %v2893_v16, %v2293_v10  ;;  %v2457_v25 = vrot.slane %v2893_v16, %v2304_v39  ;;  %v2468_v33 = vrot.slane %v2893_v16, %v2315_v44  ;;  %v2228_v10 = vld [vmem:[%s3179_s11 + $0x68] sm:$0xff]  ;;  %v2227_v6 = vld [vmem:[%s3179_s11 + $0x60] sm:$0xff] }
 0x476   : > { %v2479_v57 = vrot.slane %v2893_v16, %v2326_v34  ;;  %v2242_v22 = vmul.f32 %v2226_v7, %v3415_v38  ;;  %v2244_v44 = vmul.f32 %v2228_v10, %v3415_v38  ;;  %v2230_v16 = vld [vmem:[%s3179_s11 + $0x78] sm:$0xff] }
 0x479   : > { %2311 = vbcast.lane.b32.xlu0 %v2305_v59, 264  ;;  %2307 = vbcast.lane.b32.xlu1 %v2305_v59, 256 }
 0x47d   : > { %2322 = vbcast.lane.b32.xlu0 %v2316_v49, 264  ;;  %2318 = vbcast.lane.b32.xlu1 %v2316_v49, 256  ;;  %v2243_v49 = vmul.f32 %v2227_v6, %v3415_v38  ;;  %v2772_v6 = vld [vmem:[%s3179_s11 + $0xe8] sm:$0xff] }
 0x481   : > { %2333 = vbcast.lane.b32.xlu0 %v2327_v35, 264  ;;  %2329 = vbcast.lane.b32.xlu1 %v2327_v35, 256 }
 0x485   : > { %2408 = vbcast.lane.b32.xlu0 %v2402_v48, 264  ;;  %2404 = vbcast.lane.b32.xlu1 %v2402_v48, 256  ;;  %v2229_v48 = vld [vmem:[%s3179_s11 + $0x70] sm:$0xff] }
 0x489   : > { %2419 = vbcast.lane.b32.xlu0 %v2413_v36, 264  ;;  %2415 = vbcast.lane.b32.xlu1 %v2413_v36, 256 }
 0x48d   : > { %2430 = vbcast.lane.b32.xlu0 %v2424_v46, 264  ;;  %2426 = vbcast.lane.b32.xlu1 %v2424_v46, 256 }
 0x491   : > { %2441 = vbcast.lane.b32.xlu0 %v2435_v31, 264  ;;  %2437 = vbcast.lane.b32.xlu1 %v2435_v31, 256  ;;  %v2246_v31 = vmul.f32 %v2230_v16, %v3415_v38 }
 0x495   : > { %2452 = vbcast.lane.b32.xlu0 %v2446_v32, 264  ;;  %2448 = vbcast.lane.b32.xlu1 %v2446_v32, 256  ;;  %v2245_v32 = vmul.f32 %v2229_v48, %v3415_v38  ;;  %v2774_v48 = vld [vmem:[%s3179_s11 + $0xf8] sm:$0xff] }
 0x499   : > { %2463 = vbcast.lane.b32.xlu0 %v2457_v25, 264  ;;  %2459 = vbcast.lane.b32.xlu1 %v2457_v25, 256 }
 0x49d   : > { %2474 = vbcast.lane.b32.xlu0 %v2468_v33, 264  ;;  %2470 = vbcast.lane.b32.xlu1 %v2468_v33, 256 }
 0x4a1   : > { %2485 = vbcast.lane.b32.xlu0 %v2479_v57, 264  ;;  %2481 = vbcast.lane.b32.xlu1 %v2479_v57, 256  ;;  %v2760_v57 = vld [vmem:[%s3179_s11 + $0x88] sm:$0xff] }
 0x4d7   : > { %v2257_v9 = vpop.permute.xlu0 %2256  ;;  %v2253_v13 = vpop.permute.xlu1 %2252 }
 0x4d8   : > { %v2336_v14 = vmul.f32 %v2257_v9, %v2232_v26  ;;  %v2335_v15 = vmul.f32 %v2253_v13, %v2231_v51  ;;  %v2384_v51 = vmul.f32 %v2760_v57, %v3415_v38  ;;  %v2383_v9 = vmul.f32 %v2759_v58, %v3415_v38 }
 0x4da   : > { %2352 = vst [vmem:[%s4158_s22 + $0x8] sm:$0xff] %v2336_v14  ;;  %2351 = vst [vmem:[%s4158_s22] sm:$0xff] %v2335_v15  ;;  %v2761_v14 = vld [vmem:[%s3179_s11 + $0x90] sm:$0xff] }
 0x4db   : > { %v2268_v55 = vpop.permute.xlu0 %2267  ;;  %v2264_v56 = vpop.permute.xlu1 %2263 }
 0x4dc   : > { %v2338_v62 = vmul.f32 %v2268_v55, %v2234_v41  ;;  %v2337_v60 = vmul.f32 %v2264_v56, %v2233_v61  ;;  %v2386_v61 = vmul.f32 %v2762_v42, %v3415_v38  ;;  %v2385_v55 = vmul.f32 %v2761_v14, %v3415_v38 }
 0x4de   : > { %2354 = vst [vmem:[%s4158_s22 + $0x18] sm:$0xff] %v2338_v62  ;;  %2353 = vst [vmem:[%s4158_s22 + $0x10] sm:$0xff] %v2337_v60  ;;  %v2763_v62 = vld [vmem:[%s3179_s11 + $0xa0] sm:$0xff] }
 0x4df   : > { %v2279_v50 = vpop.permute.xlu0 %2278  ;;  %v2275_v27 = vpop.permute.xlu1 %2274 }
 0x4e0   : > { %v2340_v2 = vmul.f32 %v2279_v50, %v2236_v52  ;;  %v2339_v23 = vmul.f32 %v2275_v27, %v2235_v12  ;;  %v2388_v12 = vmul.f32 %v2764_v18, %v3415_v38  ;;  %v2387_v50 = vmul.f32 %v2763_v62, %v3415_v38 }
 0x4e2   : > { %2356 = vst [vmem:[%s4158_s22 + $0x28] sm:$0xff] %v2340_v2  ;;  %2355 = vst [vmem:[%s4158_s22 + $0x20] sm:$0xff] %v2339_v23  ;;  %v2765_v2 = vld [vmem:[%s3179_s11 + $0xb0] sm:$0xff] }
 0x4e3   : > { %v2290_v54 = vpop.permute.xlu0 %2289  ;;  %v2286_v28 = vpop.permute.xlu1 %2285 }
 0x4e4   : > { %v2342_v29 = vmul.f32 %v2290_v54, %v2238_v3  ;;  %v2341_v30 = vmul.f32 %v2286_v28, %v2237_v53  ;;  %v2390_v53 = vmul.f32 %v2766_v20, %v3415_v38  ;;  %v2389_v54 = vmul.f32 %v2765_v2, %v3415_v38 }
 0x4e6   : > { %2358 = vst [vmem:[%s4158_s22 + $0x38] sm:$0xff] %v2342_v29  ;;  %2357 = vst [vmem:[%s4158_s22 + $0x30] sm:$0xff] %v2341_v30  ;;  %v2767_v29 = vld [vmem:[%s3179_s11 + $0xc0] sm:$0xff] }
 0x4e7   : > { %v2301_v0 = vpop.permute.xlu0 %2300  ;;  %v2297_v45 = vpop.permute.xlu1 %2296 }
 0x4e8   : > { %v2344_v43 = vmul.f32 %v2301_v0, %v2240_v8  ;;  %v2343_v5 = vmul.f32 %v2297_v45, %v2239_v47  ;;  %v2392_v47 = vmul.f32 %v2768_v63, %v3415_v38  ;;  %v2391_v0 = vmul.f32 %v2767_v29, %v3415_v38 }
 0x4ea   : > { %2360 = vst [vmem:[%s4158_s22 + $0x48] sm:$0xff] %v2344_v43  ;;  %2359 = vst [vmem:[%s4158_s22 + $0x40] sm:$0xff] %v2343_v5  ;;  %v2769_v43 = vld [vmem:[%s3179_s11 + $0xd0] sm:$0xff] }
 0x4eb   : > { %v2312_v1 = vpop.permute.xlu0 %2311  ;;  %v2308_v21 = vpop.permute.xlu1 %2307 }
 0x4ec   : > { %v2346_v39 = vmul.f32 %v2312_v1, %v2242_v22  ;;  %v2345_v59 = vmul.f32 %v2308_v21, %v2241_v24  ;;  %v2394_v24 = vmul.f32 %v2770_v40, %v3415_v38  ;;  %v2393_v1 = vmul.f32 %v2769_v43, %v3415_v38 }
 0x4ee   : > { %2362 = vst [vmem:[%s4158_s22 + $0x58] sm:$0xff] %v2346_v39  ;;  %2361 = vst [vmem:[%s4158_s22 + $0x50] sm:$0xff] %v2345_v59  ;;  %v2771_v39 = vld [vmem:[%s3179_s11 + $0xe0] sm:$0xff] }
 0x4ef   : > { %v2323_v34 = vpop.permute.xlu0 %2322  ;;  %v2319_v35 = vpop.permute.xlu1 %2318 }
 0x4f0   : > { %v2348_v36 = vmul.f32 %v2323_v34, %v2244_v44  ;;  %v2347_v46 = vmul.f32 %v2319_v35, %v2243_v49  ;;  %v2396_v49 = vmul.f32 %v2772_v6, %v3415_v38  ;;  %v2395_v34 = vmul.f32 %v2771_v39, %v3415_v38 }
 0x4f2   : > { %2364 = vst [vmem:[%s4158_s22 + $0x68] sm:$0xff] %v2348_v36  ;;  %2363 = vst [vmem:[%s4158_s22 + $0x60] sm:$0xff] %v2347_v46  ;;  %v2773_v36 = vld [vmem:[%s3179_s11 + $0xf0] sm:$0xff]  ;;  %s2937_s11 = scalar_lea.vmem %s4255_s23, 4096 }
 0x4f3   : > { %v2334_v25 = vpop.permute.xlu0 %2333  ;;  %v2330_v33 = vpop.permute.xlu1 %2329  ;;  %p2938_p12 = scmp.ne.s32.totalorder %s4255_s23, %s2937_s11  ;;  %p2945_p9 = scmp.lt.s32.totalorder %s2943_s20, %s2937_s11 }
 0x4f4   : > { %v2350_v11 = vmul.f32 %v2334_v25, %v2246_v31  ;;  %v2349_v26 = vmul.f32 %v2330_v33, %v2245_v32  ;;  %v2398_v32 = vmul.f32 %v2774_v48, %v3415_v38  ;;  %v2397_v25 = vmul.f32 %v2773_v36, %v3415_v38 }
 0x4f5   : > { %p2939_p2 = pnand %p2938_p12, %p4320_p0  ;;  %p2946_p10 = por %p2945_p9, %p2944_p8 }
 0x4f6   : > { %2366 = vst [vmem:[%s4158_s22 + $0x78] sm:$0xff] %v2350_v11  ;;  %2365 = vst [vmem:[%s4158_s22 + $0x70] sm:$0xff] %v2349_v26 }
 0x4f7   : > { %v2409_v13 = vpop.permute.xlu0 %2408  ;;  %v2405_v4 = vpop.permute.xlu1 %2404  ;;  %p2940_p7 = pneg %p2939_p2 }
 0x4f8   : > { %v2488_v15 = vmul.f32 %v2409_v13, %v2384_v51  ;;  %v2487_v41 = vmul.f32 %v2405_v4, %v2383_v9 }
 0x4f9   : > { %p2947_p1 = pnand %p2946_p10, %p2940_p7 }
 0x4fa   : > { %2776 = vst [vmem:[%s4158_s22 + $0x88] sm:$0xff] %v2488_v15  ;;  %2775 = vst [vmem:[%s4158_s22 + $0x80] sm:$0xff] %v2487_v41 }
 0x4fb   : > { %v2420_v56 = vpop.permute.xlu0 %2419  ;;  %v2416_v17 = vpop.permute.xlu1 %2415 }
 0x4fc   : > { %v2490_v60 = vmul.f32 %v2420_v56, %v2386_v61  ;;  %v2489_v52 = vmul.f32 %v2416_v17, %v2385_v55 }
 0x4fe   : > { %2778 = vst [vmem:[%s4158_s22 + $0x98] sm:$0xff] %v2490_v60  ;;  %2777 = vst [vmem:[%s4158_s22 + $0x90] sm:$0xff] %v2489_v52 }
 0x4ff   : > { %v2431_v27 = vpop.permute.xlu0 %2430  ;;  %v2427_v19 = vpop.permute.xlu1 %2426 }
 0x500   : > { %v2492_v23 = vmul.f32 %v2431_v27, %v2388_v12  ;;  %v2491_v3 = vmul.f32 %v2427_v19, %v2387_v50 }
 0x502   : > { %2780 = vst [vmem:[%s4158_s22 + $0xa8] sm:$0xff] %v2492_v23  ;;  %2779 = vst [vmem:[%s4158_s22 + $0xa0] sm:$0xff] %v2491_v3 }
 0x503   : > { %v2442_v28 = vpop.permute.xlu0 %2441  ;;  %v2438_v37 = vpop.permute.xlu1 %2437 }
 0x504   : > { %v2494_v30 = vmul.f32 %v2442_v28, %v2390_v53  ;;  %v2493_v8 = vmul.f32 %v2438_v37, %v2389_v54 }
 0x506   : > { %2782 = vst [vmem:[%s4158_s22 + $0xb8] sm:$0xff] %v2494_v30  ;;  %2781 = vst [vmem:[%s4158_s22 + $0xb0] sm:$0xff] %v2493_v8 }
 0x507   : > { %v2453_v45 = vpop.permute.xlu0 %2452  ;;  %v2449_v7 = vpop.permute.xlu1 %2448 }
 0x508   : > { %v2496_v5 = vmul.f32 %v2453_v45, %v2392_v47  ;;  %v2495_v22 = vmul.f32 %v2449_v7, %v2391_v0 }
 0x50a   : > { %2784 = vst [vmem:[%s4158_s22 + $0xc8] sm:$0xff] %v2496_v5  ;;  %2783 = vst [vmem:[%s4158_s22 + $0xc0] sm:$0xff] %v2495_v22 }
 0x50b   : > { %v2464_v21 = vpop.permute.xlu0 %2463  ;;  %v2460_v10 = vpop.permute.xlu1 %2459 }
 0x50c   : > { %v2498_v59 = vmul.f32 %v2464_v21, %v2394_v24  ;;  %v2497_v44 = vmul.f32 %v2460_v10, %v2393_v1 }
 0x50e   : > { %2786 = vst [vmem:[%s4158_s22 + $0xd8] sm:$0xff] %v2498_v59  ;;  %2785 = vst [vmem:[%s4158_s22 + $0xd0] sm:$0xff] %v2497_v44 }
 0x50f   : > { %v2475_v35 = vpop.permute.xlu0 %2474  ;;  %v2471_v16 = vpop.permute.xlu1 %2470 }
 0x510   : > { %v2500_v46 = vmul.f32 %v2475_v35, %v2396_v49  ;;  %v2499_v31 = vmul.f32 %v2471_v16, %v2395_v34 }
 0x512   : > { %2788 = vst [vmem:[%s4158_s22 + $0xe8] sm:$0xff] %v2500_v46  ;;  %2787 = vst [vmem:[%s4158_s22 + $0xe0] sm:$0xff] %v2499_v31 }
 0x513   : > { %v2486_v33 = vpop.permute.xlu0 %2485  ;;  %v2482_v57 = vpop.permute.xlu1 %2481 }
 0x514   : > { %v2502_v58 = vmul.f32 %v2486_v33, %v2398_v32  ;;  %v2501_v11 = vmul.f32 %v2482_v57, %v2397_v25 }
 0x516   : > { %2790 = vst [vmem:[%s4158_s22 + $0xf8] sm:$0xff] %v2502_v58  ;;  %2789 = vst [vmem:[%s4158_s22 + $0xf0] sm:$0xff] %v2501_v11 }
 0x517   : > { %2950 = shalt.err (!%p2947_p1)
}
 0x518   : > { %s2951_s25 = scalar_lea.hbm %s4253_s26, 4096  ;;  %s2955_s8 = scalar_lea.hbm %s4304_s4, 8192 }
 0x519   : > { %p2952_p4 = scmp.ne.s32.totalorder %s4253_s26, %s2951_s25  ;;  %p2956_p6 = scmp.lt.s32.totalorder %s4253_s26, %s4304_s4 }
 0x51a   : > { %p2957_p13 = scmp.lt.s32.totalorder %s2955_s8, %s2951_s25 }
 0x51b   : > { %p2953_p11 = pnand %p2952_p4, %p4320_p0 }
 0x51c   : > { %p2958_p3 = por %p2957_p13, %p2956_p6 }
 0x51d   : > { %p2954_p5 = pneg %p2953_p11 }
 0x51f   : > { %p2959_p12 = pnand %p2958_p3, %p2954_p5 }
 0x521   : > { %2962 = shalt.err (!%p2959_p12)
}
 0x522   : > { %s3026_s22 = smov 128   ;;  %s3027_s7 = smov 8  }
 0x523   : > { %2804 = dma.vmem_to_hbm [thread:$0]  (%p4320_p0), %s4255_s23, 4096, %s4253_s26, %s2521_s19, %s3026_s22, %s3026_s22, %s3027_s7  }
 0x524 PF: > { %s2549_s5 = sand.u32 1, %s2993_s15   ;;  %p4321_p2 = scmp.ne.s32.totalorder %s4312_s28, 0 }
 0x525   : > { %p4322_p7 = scmp.ge.s32.totalorder %s3005_s18, 2  ;;  %s2550_s10 = scalar_lea.sflag [#allocation6], %s2549_s5 }
 0x527   : > { %p2815_p8 = pnand %p4322_p7, %p4321_p2 }
 0x529   : > { %p2816_p9 = pneg %p2815_p8 }
 0x52b   : > { %2988 = dma.done.wait (%p2816_p9), %s2550_s10, 4096  }
 0x52c   : > { %2990 = vsyncadd (%p2816_p9), %s2550_s10, 4294963200  ;;  %p18_p10 = scmp.ge.s32.totalorder %s3078_s21, 4   ;;  %s4323_s15 = smov %s2997_s16 }
 0x52d   : > { %s4324_s16 = smov %s3001_s17  ;;  %s4325_s17 = smov %s3090_s24 }
 0x52e   : > { %s4326_s18 = smov %s3078_s21  ;;  %20 = sbr.rel (!%p18_p10) target bundleno = 6 (0x6), region = 100 }
 0x533   :  { %2555 = vsyncpa [#allocation5], 1 }
 0x534   :  { %2557 = vsyncpa [#allocation5 + $0x1], 1 }
 0x535   :  { %2558 = vsyncpa [#allocation6], 1 }
 0x536   :  { %2560 = vsyncpa [#allocation6 + $0x1], 1 }
 0x537   :  { %2561 = vsyncpa [#allocation7], 1 }
 0x538   :  { %2563 = vsyncpa [#allocation7 + $0x1], 1 }

</bundles_post_ra>
